<compile_context>
chip_gen: v7x
topology: tpu7x:2x2x1
jax: 0.10.0
libtpu: 0.0.40
codegen_flags: <defaults>
</compile_context>

<pallas_src>
import functools
import math

import numpy as np
import jax
import jax.numpy as jnp
from jax import lax
from jax.experimental import pallas as pl
from jax.experimental.pallas import tpu as pltpu


DILATIONS = (1, 2, 4, 8, 16)
KSIZE = 3


# --------------------------------------------------------------------------- #
# Trace-time layout helpers
# --------------------------------------------------------------------------- #
def _active_taps(H, W):
    """All (branch, kh, kw, dr, dc) taps that touch at least one valid pixel."""
    taps = []
    for b, d in enumerate(DILATIONS):
        for kh in range(KSIZE):
            for kw in range(KSIZE):
                dr, dc = (kh - 1) * d, (kw - 1) * d
                if abs(dr) >= H or abs(dc) >= W:
                    continue  # tap reads only zero padding -> prune at trace time
                taps.append((b, kh, kw, dr, dc))
    return taps


def _tap_layout(n_taps, n, row_align):
    """Group taps so every scratch store is a whole (row_align, 128) tile."""
    gsize = row_align // math.gcd(n, row_align)   # taps per aligned store
    group_rows = gsize * n                        # multiple of row_align
    n_groups = -(-n_taps // gsize)
    k_tap_rows = n_groups * group_rows
    k_total = k_tap_rows + row_align              # + constant block (BN bias fold)
    return gsize, group_rows, n_groups, k_tap_rows, k_total


def _build_fused_weight(w_branches, taps, n, n1, k_tap_rows, row_align,
                        bn_scale, bn_bias):
    """Fold the 5 dilated convs, the hierarchical adds / concat, the BN scale and
    the BN bias into a single (nOut, k_total) matrix matching the patch layout.

    Output row groups (torch.cat order): [ d1 | d2 | d2+d4 | d2+d4+d8 | d2+..+d16 ].
    Column blocks: one (n)-wide block per *active* tap, zero padding up to the
    aligned tap-row count, then a row_align-wide constant block whose first column
    is the BN bias (paired with a ones row in the patch).
    """
    f32 = jnp.float32
    cols = []
    for (b, kh, kw, _dr, _dc) in taps:
        blocks = [w_branches[0][:, :, kh, kw].astype(f32) if b == 0
                  else jnp.zeros((n1, n), f32)]
        for g in range(1, 5):                      # output groups add1..add4
            if 1 <= b <= g:
                blocks.append(w_branches[b][:, :, kh, kw].astype(f32))
            else:
                blocks.append(jnp.zeros((n, n), f32))
        cols.append(jnp.concatenate(blocks, axis=0))            # (nOut, n)
    w_taps = jnp.concatenate(cols, axis=1)                       # (nOut, n_taps*n)
    nOut = w_taps.shape[0]
    pad = k_tap_rows - w_taps.shape[1]
    if pad:
        w_taps = jnp.concatenate([w_taps, jnp.zeros((nOut, pad), f32)], axis=1)
    w_taps = w_taps * bn_scale[:, None]            # fold BN scale into conv weight
    const_cols = jnp.concatenate(
        [bn_bias[:, None], jnp.zeros((nOut, row_align - 1), f32)], axis=1)
    return jnp.concatenate([w_taps, const_cols], axis=1)         # (nOut, k_total)


def _build_masks(H, W, taps, n, k_tap_rows, lane_batch):
    """(k_tap_rows, lane_batch*H*W) f32 masks, pre-replicated to the group layout."""
    HW = H * W
    L = lane_batch * HW
    ii, jj = np.mgrid[0:H, 0:W]
    m = np.zeros((k_tap_rows, L), np.float32)
    for ti, (_b, _kh, _kw, dr, dc) in enumerate(taps):
        valid = ((ii + dr >= 0) & (ii + dr < H) &
                 (jj + dc >= 0) & (jj + dc < W)).reshape(-1).astype(np.float32)
        m[ti * n:(ti + 1) * n, :] = np.tile(valid, lane_batch)[None, :]
    return jnp.asarray(m)


def _pick_lane_batch(N, HW, lane_cap=2048):
    """Largest batch factor packed onto the lane axis (lanes = B*HW <= lane_cap).

    Note: packing shortens the grid; on v7x keep an eye on grid length >= 2 if
    megacore sharding matters for your batch size (override via lane_batch=).
    """
    best = 1
    for b in range(1, N + 1):
        if N % b == 0 and b * HW <= lane_cap:
            best = b
    return best


# --------------------------------------------------------------------------- #
# Kernel
# --------------------------------------------------------------------------- #
def _esp_block_kernel(x_ref, w1_ref, w_ref, masks_ref, scale_ref, alpha_ref,
                      o_ref, patch_ref, *,
                      tap_offsets, gsize, group_rows, n, row_align,
                      k_tap_rows, L, add, needs_mask, patch_dtype):
    """One grid step = `lane_batch` images, channel-major, spatial+batch on lanes.

    x_ref:     (1, Cin, L)        input tile (L = lane_batch * H * W)
    w1_ref:    (n, Cin)           1x1 reduce-conv weight
    w_ref:     (nOut, k_total)    fused dilated-conv weight (BN scale/bias folded)
    masks_ref: (k_tap_rows, L)    boundary masks, pre-replicated to group layout
    scale_ref: (nOut, 1)          BN scale (only used for the residual path)
    alpha_ref: (nOut, 1)          PReLU slope
    o_ref:     (1, nOut, L)       output tile
    patch_ref: (k_total, L)       VMEM scratch: fused "im2col" patch matrix
    """
    # 1x1 reduce conv: a single MXU matmul; keep the rest of the pipeline in f32.
    out1 = jnp.dot(w1_ref[...], x_ref[0],
                   precision=lax.Precision.HIGHEST,
                   preferred_element_type=jnp.float32)           # (n, L) f32

    # Build the fused patch matrix group by group; every store is a full
    # (row_align, 128)-aligned slab, masks are applied as one equal-shape select.
    n_groups = len(needs_mask)
    for g in range(n_groups):
        offs = tap_offsets[g * gsize:(g + 1) * gsize]
        pieces = []
        for off in offs:
            if off == 0:
                pieces.append(out1)                               # centre tap
            else:
                pieces.append(pltpu.roll(out1, (-off) % L, axis=1))
        pad_taps = gsize - len(offs)
        if pad_taps:
            pieces.append(jnp.zeros((pad_taps * n, L), jnp.float32))
        block = pieces[0] if len(pieces) == 1 else jnp.concatenate(pieces, axis=0)
        if needs_mask[g]:
            mask = masks_ref[g * group_rows:(g + 1) * group_rows, :]
            block = jnp.where(mask != 0.0, block, 0.0)           # zero padded taps
        patch_ref[g * group_rows:(g + 1) * group_rows, :] = block.astype(patch_dtype)

    # Constant block for the folded BN bias: row 0 = ones, remaining rows = zeros.
    ridx = lax.broadcasted_iota(jnp.int32, (row_align, L), 0)
    patch_ref[k_tap_rows:k_tap_rows + row_align, :] = (ridx == 0).astype(patch_dtype)

    # All 5 dilated branches, hierarchical adds, channel concat, BN scale and BN
    # bias as ONE MXU matmul: (nOut, k_total) x (k_total, L) -> (nOut, L) in f32.
    acc = jnp.dot(w_ref[...], patch_ref[...],
                  precision=lax.Precision.HIGHEST,
                  preferred_element_type=jnp.float32)

    if add:
        # Residual (nIn == nOut); re-read x here so it is not live across the
        # tap loop.  BN scale must also hit the residual: y = scale*(conv+x)+bias.
        acc = acc + x_ref[0].astype(jnp.float32) * scale_ref[...]

    # PReLU with per-channel slope.
    y = jnp.where(acc >= 0.0, acc, acc * alpha_ref[...])
    o_ref[0] = y.astype(o_ref.dtype)


# --------------------------------------------------------------------------- #
# Wrapper
# --------------------------------------------------------------------------- #
def esp_block_forward(x, w_c1, w_d1, w_d2, w_d4, w_d8, w_d16,
                      bn_gamma, bn_beta, bn_mean, bn_var, prelu_alpha,
                      *, add=True, eps=1e-3, matmul_dtype=jnp.float32,
                      lane_batch=None):
    """DilatedParllelResidualBlockB forward (BatchNorm in inference mode).

    x:      (N, nIn, H, W)  NCHW, like the PyTorch module
    w_c1:   (n, nIn, 1, 1)
    w_dX:   (n1|n, n, 3, 3)
    bn_*:   (nOut,)  gamma / beta / running_mean / running_var
    prelu_alpha: (nOut,)
    matmul_dtype: dtype fed to the MXU (f32 or bf16); accumulation/epilogue stay f32
    returns (N, nOut, H, W) in x.dtype
    """
    N, Cin, H, W = x.shape
    n = w_c1.shape[0]
    n1 = w_d1.shape[0]
    nOut = n1 + 4 * n
    HW = H * W
    if add:
        assert Cin == nOut, "residual add requires nIn == nOut"

    out_dtype = x.dtype
    mm_dtype = jnp.dtype(matmul_dtype)
    row_align = 8 * (4 // mm_dtype.itemsize)        # 8 for f32, 16 for bf16

    if lane_batch is None:
        lane_batch = _pick_lane_batch(N, HW)
    B = lane_batch
    assert N % B == 0, "lane_batch must divide the batch size"
    G = N // B
    L = B * HW

    taps = _active_taps(H, W)
    gsize, group_rows, n_groups, k_tap_rows, k_total = _tap_layout(
        len(taps), n, row_align)
    tap_offsets = tuple(dr * W + dc for (_b, _kh, _kw, dr, dc) in taps)
    needs_mask = tuple(
        any(off != 0 for off in tap_offsets[g * gsize:(g + 1) * gsize])
        for g in range(n_groups))

    # ---- parameter folding (would be done once at init in a real deployment) ----
    bn_scale = (bn_gamma / jnp.sqrt(bn_var + eps)).astype(jnp.float32)
    bn_bias = (bn_beta - bn_mean * bn_scale).astype(jnp.float32)
    w1 = w_c1.reshape(n, Cin).astype(mm_dtype)
    w_big = _build_fused_weight([w_d1, w_d2, w_d4, w_d8, w_d16], taps, n, n1,
                                k_tap_rows, row_align, bn_scale, bn_bias
                                ).astype(mm_dtype)
    masks = _build_masks(H, W, taps, n, k_tap_rows, B)
    scale_col = bn_scale[:, None]                               # (nOut, 1) f32
    alpha_col = prelu_alpha.astype(jnp.float32)[:, None]        # (nOut, 1) f32

    # Input layout: pack B images onto the lane axis -> (G, Cin, B*HW).
    xr = (x.reshape(G, B, Cin, HW).transpose(0, 2, 1, 3)
           .reshape(G, Cin, L).astype(mm_dtype))

    kernel = functools.partial(
        _esp_block_kernel, tap_offsets=tap_offsets, gsize=gsize,
        group_rows=group_rows, n=n, row_align=row_align, k_tap_rows=k_tap_rows,
        L=L, add=add, needs_mask=needs_mask, patch_dtype=mm_dtype)

    # VMEM budget: double-buffered inputs/outputs + the patch scratch, with headroom.
    mm_b = mm_dtype.itemsize
    out_b = jnp.dtype(out_dtype).itemsize
    working_set = (2 * Cin * L * mm_b            # x tile
                   + 2 * nOut * L * out_b        # output tile
                   + 2 * nOut * k_total * mm_b   # fused weight
                   + 2 * k_tap_rows * L * 4      # masks
                   + k_total * L * mm_b          # patch scratch
                   + 4 * nOut * 4)               # scale/alpha
    vmem_limit = int(min(48 * 2**20, max(16 * 2**20, 2 * working_set)))

    out_flat = pl.pallas_call(
        kernel,
        out_shape=jax.ShapeDtypeStruct((G, nOut, L), out_dtype),
        grid=(G,),
        in_specs=[
            pl.BlockSpec((1, Cin, L), lambda b: (b, 0, 0)),
            pl.BlockSpec((n, Cin), lambda b: (0, 0)),
            pl.BlockSpec((nOut, k_total), lambda b: (0, 0)),
            pl.BlockSpec((k_tap_rows, L), lambda b: (0, 0)),
            pl.BlockSpec((nOut, 1), lambda b: (0, 0)),
            pl.BlockSpec((nOut, 1), lambda b: (0, 0)),
        ],
        out_specs=pl.BlockSpec((1, nOut, L), lambda b: (b, 0, 0)),
        scratch_shapes=[pltpu.VMEM((k_total, L), mm_dtype)],
        compiler_params=pltpu.CompilerParams(
            dimension_semantics=("parallel",),
            vmem_limit_bytes=vmem_limit,
        ),
    )(xr, w1, w_big, masks, scale_col, alpha_col)

    # Unpack the lane-batched output back to NCHW.
    return (out_flat.reshape(G, nOut, B, HW).transpose(0, 2, 1, 3)
            .reshape(N, nOut, H, W))


# --------------------------------------------------------------------------- #
# Pure-XLA reference (mirrors the PyTorch module, eval-mode BN)
# --------------------------------------------------------------------------- #
def _reference(x, w_c1, w_d1, w_d2, w_d4, w_d8, w_d16,
               bn_gamma, bn_beta, bn_mean, bn_var, prelu_alpha,
               *, add=True, eps=1e-3):
    def dconv(inp, w, d):
        pad = ((w.shape[-1] - 1) // 2) * d
        return lax.conv_general_dilated(
            inp, w, window_strides=(1, 1),
            padding=((pad, pad), (pad, pad)), rhs_dilation=(d, d),
            dimension_numbers=("NCHW", "OIHW", "NCHW"))

    out1 = lax.conv_general_dilated(
        x, w_c1, (1, 1), ((0, 0), (0, 0)),
        dimension_numbers=("NCHW", "OIHW", "NCHW"))
    d1 = dconv(out1, w_d1, 1)
    d2 = dconv(out1, w_d2, 2)
    d4 = dconv(out1, w_d4, 4)
    d8 = dconv(out1, w_d8, 8)
    d16 = dconv(out1, w_d16, 16)
    add1 = d2
    add2 = add1 + d4
    add3 = add2 + d8
    add4 = add3 + d16
    comb = jnp.concatenate([d1, add1, add2, add3, add4], axis=1)
    if add:
        comb = x + comb
    scale = bn_gamma / jnp.sqrt(bn_var + eps)
    bias = bn_beta - bn_mean * scale
    y = comb * scale[None, :, None, None] + bias[None, :, None, None]
    a = prelu_alpha[None, :, None, None]
    return jnp.where(y >= 0, y, a * y)


if __name__ == "__main__":
    # Module hyper-params: DilatedParllelResidualBlockB(nIn=20, nOut=20, add=True)
    N, nIn, nOut, H, W = 2, 20, 20, 16, 16
    n = nOut // 5
    n1 = nOut - 4 * n

    key = jax.random.PRNGKey(0)
    ks = jax.random.split(key, 12)
    x = jax.random.normal(ks[0], (N, nIn, H, W), jnp.float32)
    w_c1 = jax.random.normal(ks[1], (n, nIn, 1, 1), jnp.float32) * 0.1
    w_d1 = jax.random.normal(ks[2], (n1, n, 3, 3), jnp.float32) * 0.1
    w_d2 = jax.random.normal(ks[3], (n, n, 3, 3), jnp.float32) * 0.1
    w_d4 = jax.random.normal(ks[4], (n, n, 3, 3), jnp.float32) * 0.1
    w_d8 = jax.random.normal(ks[5], (n, n, 3, 3), jnp.float32) * 0.1
    w_d16 = jax.random.normal(ks[6], (n, n, 3, 3), jnp.float32) * 0.1
    bn_gamma = 1.0 + 0.1 * jax.random.normal(ks[7], (nOut,), jnp.float32)
    bn_beta = 0.1 * jax.random.normal(ks[8], (nOut,), jnp.float32)
    bn_mean = 0.05 * jax.random.normal(ks[9], (nOut,), jnp.float32)
    bn_var = 1.0 + 0.1 * jax.random.uniform(ks[10], (nOut,), jnp.float32)
    prelu_alpha = 0.25 + 0.01 * jax.random.normal(ks[11], (nOut,), jnp.float32)

    ref = _reference(x, w_c1, w_d1, w_d2, w_d4, w_d8, w_d16,
                     bn_gamma, bn_beta, bn_mean, bn_var, prelu_alpha, add=True)

    # f32 MXU path (tight tolerance).
    out = esp_block_forward(x, w_c1, w_d1, w_d2, w_d4, w_d8, w_d16,
                            bn_gamma, bn_beta, bn_mean, bn_var, prelu_alpha,
                            add=True, matmul_dtype=jnp.float32)
    out = jax.block_until_ready(out)
    assert out.shape == ref.shape, (out.shape, ref.shape)
    err = float(jnp.max(jnp.abs(out - ref)))
    assert err < 2e-3, f"f32 max abs err {err}"

    # bf16 MXU path (f32 accumulation + f32 epilogue); looser tolerance because
    # inputs/weights are rounded to bf16.
    out_bf = esp_block_forward(x, w_c1, w_d1, w_d2, w_d4, w_d8, w_d16,
                               bn_gamma, bn_beta, bn_mean, bn_var, prelu_alpha,
                               add=True, matmul_dtype=jnp.bfloat16)
    out_bf = jax.block_until_ready(out_bf)
    err_bf = float(jnp.max(jnp.abs(out_bf - ref)))
    assert err_bf < 1e-1, f"bf16 max abs err {err_bf}"

    print("KERNEL_OK")
</pallas_src>

<mosaic_0001>
module attributes {stable_mosaic.version = 11 : i64} {
  func.func @_esp_block_kernel(%arg0: i32, %arg1: memref<1x20x512xf32, #tpu.memory_space<vmem>>, %arg2: memref<4x20xf32, #tpu.memory_space<vmem>>, %arg3: memref<20x160xf32, #tpu.memory_space<vmem>>, %arg4: memref<152x512xf32, #tpu.memory_space<vmem>>, %arg5: memref<20x1xf32, #tpu.memory_space<vmem>>, %arg6: memref<20x1xf32, #tpu.memory_space<vmem>>, %arg7: memref<1x20x512xf32, #tpu.memory_space<vmem>>, %arg8: memref<160x512xf32, #tpu.memory_space<vmem>>) attributes {dimension_semantics = [#tpu.dimension_semantics<parallel>], iteration_bounds = array<i64: 1>, scalar_prefetch = 0 : i64, scratch_operands = 1 : i64, tpu.core_type = #tpu.core_type<tc>, window_params = [{transform_indices = @transform_0, window_bounds = array<i64: 1, 20, 512>}, {pipeline_mode = #tpu.pipeline_mode<synchronous>, transform_indices = @transform_1, window_bounds = array<i64: 4, 20>}, {pipeline_mode = #tpu.pipeline_mode<synchronous>, transform_indices = @transform_2, window_bounds = array<i64: 20, 160>}, {pipeline_mode = #tpu.pipeline_mode<synchronous>, transform_indices = @transform_3, window_bounds = array<i64: 152, 512>}, {pipeline_mode = #tpu.pipeline_mode<synchronous>, transform_indices = @transform_4, window_bounds = array<i64: 20, 1>}, {pipeline_mode = #tpu.pipeline_mode<synchronous>, transform_indices = @transform_5, window_bounds = array<i64: 20, 1>}, {transform_indices = @transform_6, window_bounds = array<i64: 1, 20, 512>}]} {
    %c0 = arith.constant 0 : index
    %c0_0 = arith.constant 0 : index
    %0 = vector.load %arg2[%c0, %c0_0] : memref<4x20xf32, #tpu.memory_space<vmem>>, vector<4x20xf32>
    %c0_1 = arith.constant 0 : index
    %c0_2 = arith.constant 0 : index
    %c0_3 = arith.constant 0 : index
    %1 = vector.load %arg1[%c0_1, %c0_2, %c0_3] : memref<1x20x512xf32, #tpu.memory_space<vmem>>, vector<1x20x512xf32>
    %2 = vector.shape_cast %1 : vector<1x20x512xf32> to vector<20x512xf32>
    %cst = arith.constant dense<0.000000e+00> : vector<4x512xf32>
    %3 = tpu.matmul %0, %2, %cst {dimension_numbers = #tpu.dot_dimension_numbers<[1], [0], [0], [1], [0, 0, 1, 1], [], []>, precision = #tpu.contract_precision<fp32>} : vector<4x20xf32>, vector<20x512xf32>, vector<4x512xf32> -> vector<4x512xf32>
    %c17_i32 = arith.constant 17 : i32
    %4 = tpu.dynamic_rotate %3 by %c17_i32 dim 1 : vector<4x512xf32>, i32 -> vector<4x512xf32>
    %c16_i32 = arith.constant 16 : i32
    %5 = tpu.dynamic_rotate %3 by %c16_i32 dim 1 : vector<4x512xf32>, i32 -> vector<4x512xf32>
    %6 = tpu.concatenate %4, %5 in 0 : vector<4x512xf32>, vector<4x512xf32> -> vector<8x512xf32>
    %c0_4 = arith.constant 0 : index
    %c0_5 = arith.constant 0 : index
    %7 = vector.load %arg4[%c0_4, %c0_5] : memref<152x512xf32, #tpu.memory_space<vmem>>, vector<8x512xf32>
    %cst_6 = arith.constant 0.000000e+00 : f32
    %8 = vector.broadcast %cst_6 : f32 to vector<8x512xf32>
    %9 = arith.cmpf one, %7, %8 : vector<8x512xf32>
    %cst_7 = arith.constant 0.000000e+00 : f32
    %10 = vector.broadcast %cst_7 : f32 to vector<8x512xf32>
    %11 = arith.select %9, %6, %10 : vector<8x512xi1>, vector<8x512xf32>
    %c0_8 = arith.constant 0 : index
    %c0_9 = arith.constant 0 : index
    %12 = vector.load %arg8[%c0_8, %c0_9] : memref<160x512xf32, #tpu.memory_space<vmem>>, vector<8x512xf32>
    tpu.vector_store %arg8[%c0_8, %c0_9], %11 {strides = array<i32>} : memref<160x512xf32, #tpu.memory_space<vmem>>, vector<8x512xf32>,
    %c15_i32 = arith.constant 15 : i32
    %13 = tpu.dynamic_rotate %3 by %c15_i32 dim 1 : vector<4x512xf32>, i32 -> vector<4x512xf32>
    %c1_i32 = arith.constant 1 : i32
    %14 = tpu.dynamic_rotate %3 by %c1_i32 dim 1 : vector<4x512xf32>, i32 -> vector<4x512xf32>
    %15 = tpu.concatenate %13, %14 in 0 : vector<4x512xf32>, vector<4x512xf32> -> vector<8x512xf32>
    %c8 = arith.constant 8 : index
    %c0_10 = arith.constant 0 : index
    %16 = vector.load %arg4[%c8, %c0_10] : memref<152x512xf32, #tpu.memory_space<vmem>>, vector<8x512xf32>
    %cst_11 = arith.constant 0.000000e+00 : f32
    %17 = vector.broadcast %cst_11 : f32 to vector<8x512xf32>
    %18 = arith.cmpf one, %16, %17 : vector<8x512xf32>
    %cst_12 = arith.constant 0.000000e+00 : f32
    %19 = vector.broadcast %cst_12 : f32 to vector<8x512xf32>
    %20 = arith.select %18, %15, %19 : vector<8x512xi1>, vector<8x512xf32>
    %c8_13 = arith.constant 8 : index
    %c0_14 = arith.constant 0 : index
    %21 = vector.load %arg8[%c8_13, %c0_14] : memref<160x512xf32, #tpu.memory_space<vmem>>, vector<8x512xf32>
    tpu.vector_store %arg8[%c8_13, %c0_14], %20 {strides = array<i32>} : memref<160x512xf32, #tpu.memory_space<vmem>>, vector<8x512xf32>,
    %c511_i32 = arith.constant 511 : i32
    %22 = tpu.dynamic_rotate %3 by %c511_i32 dim 1 : vector<4x512xf32>, i32 -> vector<4x512xf32>
    %23 = tpu.concatenate %3, %22 in 0 : vector<4x512xf32>, vector<4x512xf32> -> vector<8x512xf32>
    %c16 = arith.constant 16 : index
    %c0_15 = arith.constant 0 : index
    %24 = vector.load %arg4[%c16, %c0_15] : memref<152x512xf32, #tpu.memory_space<vmem>>, vector<8x512xf32>
    %cst_16 = arith.constant 0.000000e+00 : f32
    %25 = vector.broadcast %cst_16 : f32 to vector<8x512xf32>
    %26 = arith.cmpf one, %24, %25 : vector<8x512xf32>
    %cst_17 = arith.constant 0.000000e+00 : f32
    %27 = vector.broadcast %cst_17 : f32 to vector<8x512xf32>
    %28 = arith.select %26, %23, %27 : vector<8x512xi1>, vector<8x512xf32>
    %c16_18 = arith.constant 16 : index
    %c0_19 = arith.constant 0 : index
    %29 = vector.load %arg8[%c16_18, %c0_19] : memref<160x512xf32, #tpu.memory_space<vmem>>, vector<8x512xf32>
    tpu.vector_store %arg8[%c16_18, %c0_19], %28 {strides = array<i32>} : memref<160x512xf32, #tpu.memory_space<vmem>>, vector<8x512xf32>,
    %c497_i32 = arith.constant 497 : i32
    %30 = tpu.dynamic_rotate %3 by %c497_i32 dim 1 : vector<4x512xf32>, i32 -> vector<4x512xf32>
    %c496_i32 = arith.constant 496 : i32
    %31 = tpu.dynamic_rotate %3 by %c496_i32 dim 1 : vector<4x512xf32>, i32 -> vector<4x512xf32>
    %32 = tpu.concatenate %30, %31 in 0 : vector<4x512xf32>, vector<4x512xf32> -> vector<8x512xf32>
    %c24 = arith.constant 24 : index
    %c0_20 = arith.constant 0 : index
    %33 = vector.load %arg4[%c24, %c0_20] : memref<152x512xf32, #tpu.memory_space<vmem>>, vector<8x512xf32>
    %cst_21 = arith.constant 0.000000e+00 : f32
    %34 = vector.broadcast %cst_21 : f32 to vector<8x512xf32>
    %35 = arith.cmpf one, %33, %34 : vector<8x512xf32>
    %cst_22 = arith.constant 0.000000e+00 : f32
    %36 = vector.broadcast %cst_22 : f32 to vector<8x512xf32>
    %37 = arith.select %35, %32, %36 : vector<8x512xi1>, vector<8x512xf32>
    %c24_23 = arith.constant 24 : index
    %c0_24 = arith.constant 0 : index
    %38 = vector.load %arg8[%c24_23, %c0_24] : memref<160x512xf32, #tpu.memory_space<vmem>>, vector<8x512xf32>
    tpu.vector_store %arg8[%c24_23, %c0_24], %37 {strides = array<i32>} : memref<160x512xf32, #tpu.memory_space<vmem>>, vector<8x512xf32>,
    %c495_i32 = arith.constant 495 : i32
    %39 = tpu.dynamic_rotate %3 by %c495_i32 dim 1 : vector<4x512xf32>, i32 -> vector<4x512xf32>
    %c34_i32 = arith.constant 34 : i32
    %40 = tpu.dynamic_rotate %3 by %c34_i32 dim 1 : vector<4x512xf32>, i32 -> vector<4x512xf32>
    %41 = tpu.concatenate %39, %40 in 0 : vector<4x512xf32>, vector<4x512xf32> -> vector<8x512xf32>
    %c32 = arith.constant 32 : index
    %c0_25 = arith.constant 0 : index
    %42 = vector.load %arg4[%c32, %c0_25] : memref<152x512xf32, #tpu.memory_space<vmem>>, vector<8x512xf32>
    %cst_26 = arith.constant 0.000000e+00 : f32
    %43 = vector.broadcast %cst_26 : f32 to vector<8x512xf32>
    %44 = arith.cmpf one, %42, %43 : vector<8x512xf32>
    %cst_27 = arith.constant 0.000000e+00 : f32
    %45 = vector.broadcast %cst_27 : f32 to vector<8x512xf32>
    %46 = arith.select %44, %41, %45 : vector<8x512xi1>, vector<8x512xf32>
    %c32_28 = arith.constant 32 : index
    %c0_29 = arith.constant 0 : index
    %47 = vector.load %arg8[%c32_28, %c0_29] : memref<160x512xf32, #tpu.memory_space<vmem>>, vector<8x512xf32>
    tpu.vector_store %arg8[%c32_28, %c0_29], %46 {strides = array<i32>} : memref<160x512xf32, #tpu.memory_space<vmem>>, vector<8x512xf32>,
    %c32_i32 = arith.constant 32 : i32
    %48 = tpu.dynamic_rotate %3 by %c32_i32 dim 1 : vector<4x512xf32>, i32 -> vector<4x512xf32>
    %c30_i32 = arith.constant 30 : i32
    %49 = tpu.dynamic_rotate %3 by %c30_i32 dim 1 : vector<4x512xf32>, i32 -> vector<4x512xf32>
    %50 = tpu.concatenate %48, %49 in 0 : vector<4x512xf32>, vector<4x512xf32> -> vector<8x512xf32>
    %c40 = arith.constant 40 : index
    %c0_30 = arith.constant 0 : index
    %51 = vector.load %arg4[%c40, %c0_30] : memref<152x512xf32, #tpu.memory_space<vmem>>, vector<8x512xf32>
    %cst_31 = arith.constant 0.000000e+00 : f32
    %52 = vector.broadcast %cst_31 : f32 to vector<8x512xf32>
    %53 = arith.cmpf one, %51, %52 : vector<8x512xf32>
    %cst_32 = arith.constant 0.000000e+00 : f32
    %54 = vector.broadcast %cst_32 : f32 to vector<8x512xf32>
    %55 = arith.select %53, %50, %54 : vector<8x512xi1>, vector<8x512xf32>
    %c40_33 = arith.constant 40 : index
    %c0_34 = arith.constant 0 : index
    %56 = vector.load %arg8[%c40_33, %c0_34] : memref<160x512xf32, #tpu.memory_space<vmem>>, vector<8x512xf32>
    tpu.vector_store %arg8[%c40_33, %c0_34], %55 {strides = array<i32>} : memref<160x512xf32, #tpu.memory_space<vmem>>, vector<8x512xf32>,
    %c2_i32 = arith.constant 2 : i32
    %57 = tpu.dynamic_rotate %3 by %c2_i32 dim 1 : vector<4x512xf32>, i32 -> vector<4x512xf32>
    %58 = tpu.concatenate %57, %3 in 0 : vector<4x512xf32>, vector<4x512xf32> -> vector<8x512xf32>
    %c48 = arith.constant 48 : index
    %c0_35 = arith.constant 0 : index
    %59 = vector.load %arg4[%c48, %c0_35] : memref<152x512xf32, #tpu.memory_space<vmem>>, vector<8x512xf32>
    %cst_36 = arith.constant 0.000000e+00 : f32
    %60 = vector.broadcast %cst_36 : f32 to vector<8x512xf32>
    %61 = arith.cmpf one, %59, %60 : vector<8x512xf32>
    %cst_37 = arith.constant 0.000000e+00 : f32
    %62 = vector.broadcast %cst_37 : f32 to vector<8x512xf32>
    %63 = arith.select %61, %58, %62 : vector<8x512xi1>, vector<8x512xf32>
    %c48_38 = arith.constant 48 : index
    %c0_39 = arith.constant 0 : index
    %64 = vector.load %arg8[%c48_38, %c0_39] : memref<160x512xf32, #tpu.memory_space<vmem>>, vector<8x512xf32>
    tpu.vector_store %arg8[%c48_38, %c0_39], %63 {strides = array<i32>} : memref<160x512xf32, #tpu.memory_space<vmem>>, vector<8x512xf32>,
    %c510_i32 = arith.constant 510 : i32
    %65 = tpu.dynamic_rotate %3 by %c510_i32 dim 1 : vector<4x512xf32>, i32 -> vector<4x512xf32>
    %c482_i32 = arith.constant 482 : i32
    %66 = tpu.dynamic_rotate %3 by %c482_i32 dim 1 : vector<4x512xf32>, i32 -> vector<4x512xf32>
    %67 = tpu.concatenate %65, %66 in 0 : vector<4x512xf32>, vector<4x512xf32> -> vector<8x512xf32>
    %c56 = arith.constant 56 : index
    %c0_40 = arith.constant 0 : index
    %68 = vector.load %arg4[%c56, %c0_40] : memref<152x512xf32, #tpu.memory_space<vmem>>, vector<8x512xf32>
    %cst_41 = arith.constant 0.000000e+00 : f32
    %69 = vector.broadcast %cst_41 : f32 to vector<8x512xf32>
    %70 = arith.cmpf one, %68, %69 : vector<8x512xf32>
    %cst_42 = arith.constant 0.000000e+00 : f32
    %71 = vector.broadcast %cst_42 : f32 to vector<8x512xf32>
    %72 = arith.select %70, %67, %71 : vector<8x512xi1>, vector<8x512xf32>
    %c56_43 = arith.constant 56 : index
    %c0_44 = arith.constant 0 : index
    %73 = vector.load %arg8[%c56_43, %c0_44] : memref<160x512xf32, #tpu.memory_space<vmem>>, vector<8x512xf32>
    tpu.vector_store %arg8[%c56_43, %c0_44], %72 {strides = array<i32>} : memref<160x512xf32, #tpu.memory_space<vmem>>, vector<8x512xf32>,
    %c480_i32 = arith.constant 480 : i32
    %74 = tpu.dynamic_rotate %3 by %c480_i32 dim 1 : vector<4x512xf32>, i32 -> vector<4x512xf32>
    %c478_i32 = arith.constant 478 : i32
    %75 = tpu.dynamic_rotate %3 by %c478_i32 dim 1 : vector<4x512xf32>, i32 -> vector<4x512xf32>
    %76 = tpu.concatenate %74, %75 in 0 : vector<4x512xf32>, vector<4x512xf32> -> vector<8x512xf32>
    %c64 = arith.constant 64 : index
    %c0_45 = arith.constant 0 : index
    %77 = vector.load %arg4[%c64, %c0_45] : memref<152x512xf32, #tpu.memory_space<vmem>>, vector<8x512xf32>
    %cst_46 = arith.constant 0.000000e+00 : f32
    %78 = vector.broadcast %cst_46 : f32 to vector<8x512xf32>
    %79 = arith.cmpf one, %77, %78 : vector<8x512xf32>
    %cst_47 = arith.constant 0.000000e+00 : f32
    %80 = vector.broadcast %cst_47 : f32 to vector<8x512xf32>
    %81 = arith.select %79, %76, %80 : vector<8x512xi1>, vector<8x512xf32>
    %c64_48 = arith.constant 64 : index
    %c0_49 = arith.constant 0 : index
    %82 = vector.load %arg8[%c64_48, %c0_49] : memref<160x512xf32, #tpu.memory_space<vmem>>, vector<8x512xf32>
    tpu.vector_store %arg8[%c64_48, %c0_49], %81 {strides = array<i32>} : memref<160x512xf32, #tpu.memory_space<vmem>>, vector<8x512xf32>,
    %c68_i32 = arith.constant 68 : i32
    %83 = tpu.dynamic_rotate %3 by %c68_i32 dim 1 : vector<4x512xf32>, i32 -> vector<4x512xf32>
    %c64_i32 = arith.constant 64 : i32
    %84 = tpu.dynamic_rotate %3 by %c64_i32 dim 1 : vector<4x512xf32>, i32 -> vector<4x512xf32>
    %85 = tpu.concatenate %83, %84 in 0 : vector<4x512xf32>, vector<4x512xf32> -> vector<8x512xf32>
    %c72 = arith.constant 72 : index
    %c0_50 = arith.constant 0 : index
    %86 = vector.load %arg4[%c72, %c0_50] : memref<152x512xf32, #tpu.memory_space<vmem>>, vector<8x512xf32>
    %cst_51 = arith.constant 0.000000e+00 : f32
    %87 = vector.broadcast %cst_51 : f32 to vector<8x512xf32>
    %88 = arith.cmpf one, %86, %87 : vector<8x512xf32>
    %cst_52 = arith.constant 0.000000e+00 : f32
    %89 = vector.broadcast %cst_52 : f32 to vector<8x512xf32>
    %90 = arith.select %88, %85, %89 : vector<8x512xi1>, vector<8x512xf32>
    %c72_53 = arith.constant 72 : index
    %c0_54 = arith.constant 0 : index
    %91 = vector.load %arg8[%c72_53, %c0_54] : memref<160x512xf32, #tpu.memory_space<vmem>>, vector<8x512xf32>
    tpu.vector_store %arg8[%c72_53, %c0_54], %90 {strides = array<i32>} : memref<160x512xf32, #tpu.memory_space<vmem>>, vector<8x512xf32>,
    %c60_i32 = arith.constant 60 : i32
    %92 = tpu.dynamic_rotate %3 by %c60_i32 dim 1 : vector<4x512xf32>, i32 -> vector<4x512xf32>
    %c4_i32 = arith.constant 4 : i32
    %93 = tpu.dynamic_rotate %3 by %c4_i32 dim 1 : vector<4x512xf32>, i32 -> vector<4x512xf32>
    %94 = tpu.concatenate %92, %93 in 0 : vector<4x512xf32>, vector<4x512xf32> -> vector<8x512xf32>
    %c80 = arith.constant 80 : index
    %c0_55 = arith.constant 0 : index
    %95 = vector.load %arg4[%c80, %c0_55] : memref<152x512xf32, #tpu.memory_space<vmem>>, vector<8x512xf32>
    %cst_56 = arith.constant 0.000000e+00 : f32
    %96 = vector.broadcast %cst_56 : f32 to vector<8x512xf32>
    %97 = arith.cmpf one, %95, %96 : vector<8x512xf32>
    %cst_57 = arith.constant 0.000000e+00 : f32
    %98 = vector.broadcast %cst_57 : f32 to vector<8x512xf32>
    %99 = arith.select %97, %94, %98 : vector<8x512xi1>, vector<8x512xf32>
    %c80_58 = arith.constant 80 : index
    %c0_59 = arith.constant 0 : index
    %100 = vector.load %arg8[%c80_58, %c0_59] : memref<160x512xf32, #tpu.memory_space<vmem>>, vector<8x512xf32>
    tpu.vector_store %arg8[%c80_58, %c0_59], %99 {strides = array<i32>} : memref<160x512xf32, #tpu.memory_space<vmem>>, vector<8x512xf32>,
    %c508_i32 = arith.constant 508 : i32
    %101 = tpu.dynamic_rotate %3 by %c508_i32 dim 1 : vector<4x512xf32>, i32 -> vector<4x512xf32>
    %102 = tpu.concatenate %3, %101 in 0 : vector<4x512xf32>, vector<4x512xf32> -> vector<8x512xf32>
    %c88 = arith.constant 88 : index
    %c0_60 = arith.constant 0 : index
    %103 = vector.load %arg4[%c88, %c0_60] : memref<152x512xf32, #tpu.memory_space<vmem>>, vector<8x512xf32>
    %cst_61 = arith.constant 0.000000e+00 : f32
    %104 = vector.broadcast %cst_61 : f32 to vector<8x512xf32>
    %105 = arith.cmpf one, %103, %104 : vector<8x512xf32>
    %cst_62 = arith.constant 0.000000e+00 : f32
    %106 = vector.broadcast %cst_62 : f32 to vector<8x512xf32>
    %107 = arith.select %105, %102, %106 : vector<8x512xi1>, vector<8x512xf32>
    %c88_63 = arith.constant 88 : index
    %c0_64 = arith.constant 0 : index
    %108 = vector.load %arg8[%c88_63, %c0_64] : memref<160x512xf32, #tpu.memory_space<vmem>>, vector<8x512xf32>
    tpu.vector_store %arg8[%c88_63, %c0_64], %107 {strides = array<i32>} : memref<160x512xf32, #tpu.memory_space<vmem>>, vector<8x512xf32>,
    %c452_i32 = arith.constant 452 : i32
    %109 = tpu.dynamic_rotate %3 by %c452_i32 dim 1 : vector<4x512xf32>, i32 -> vector<4x512xf32>
    %c448_i32 = arith.constant 448 : i32
    %110 = tpu.dynamic_rotate %3 by %c448_i32 dim 1 : vector<4x512xf32>, i32 -> vector<4x512xf32>
    %111 = tpu.concatenate %109, %110 in 0 : vector<4x512xf32>, vector<4x512xf32> -> vector<8x512xf32>
    %c96 = arith.constant 96 : index
    %c0_65 = arith.constant 0 : index
    %112 = vector.load %arg4[%c96, %c0_65] : memref<152x512xf32, #tpu.memory_space<vmem>>, vector<8x512xf32>
    %cst_66 = arith.constant 0.000000e+00 : f32
    %113 = vector.broadcast %cst_66 : f32 to vector<8x512xf32>
    %114 = arith.cmpf one, %112, %113 : vector<8x512xf32>
    %cst_67 = arith.constant 0.000000e+00 : f32
    %115 = vector.broadcast %cst_67 : f32 to vector<8x512xf32>
    %116 = arith.select %114, %111, %115 : vector<8x512xi1>, vector<8x512xf32>
    %c96_68 = arith.constant 96 : index
    %c0_69 = arith.constant 0 : index
    %117 = vector.load %arg8[%c96_68, %c0_69] : memref<160x512xf32, #tpu.memory_space<vmem>>, vector<8x512xf32>
    tpu.vector_store %arg8[%c96_68, %c0_69], %116 {strides = array<i32>} : memref<160x512xf32, #tpu.memory_space<vmem>>, vector<8x512xf32>,
    %c444_i32 = arith.constant 444 : i32
    %118 = tpu.dynamic_rotate %3 by %c444_i32 dim 1 : vector<4x512xf32>, i32 -> vector<4x512xf32>
    %c136_i32 = arith.constant 136 : i32
    %119 = tpu.dynamic_rotate %3 by %c136_i32 dim 1 : vector<4x512xf32>, i32 -> vector<4x512xf32>
    %120 = tpu.concatenate %118, %119 in 0 : vector<4x512xf32>, vector<4x512xf32> -> vector<8x512xf32>
    %c104 = arith.constant 104 : index
    %c0_70 = arith.constant 0 : index
    %121 = vector.load %arg4[%c104, %c0_70] : memref<152x512xf32, #tpu.memory_space<vmem>>, vector<8x512xf32>
    %cst_71 = arith.constant 0.000000e+00 : f32
    %122 = vector.broadcast %cst_71 : f32 to vector<8x512xf32>
    %123 = arith.cmpf one, %121, %122 : vector<8x512xf32>
    %cst_72 = arith.constant 0.000000e+00 : f32
    %124 = vector.broadcast %cst_72 : f32 to vector<8x512xf32>
    %125 = arith.select %123, %120, %124 : vector<8x512xi1>, vector<8x512xf32>
    %c104_73 = arith.constant 104 : index
    %c0_74 = arith.constant 0 : index
    %126 = vector.load %arg8[%c104_73, %c0_74] : memref<160x512xf32, #tpu.memory_space<vmem>>, vector<8x512xf32>
    tpu.vector_store %arg8[%c104_73, %c0_74], %125 {strides = array<i32>} : memref<160x512xf32, #tpu.memory_space<vmem>>, vector<8x512xf32>,
    %c128_i32 = arith.constant 128 : i32
    %127 = tpu.dynamic_rotate %3 by %c128_i32 dim 1 : vector<4x512xf32>, i32 -> vector<4x512xf32>
    %c120_i32 = arith.constant 120 : i32
    %128 = tpu.dynamic_rotate %3 by %c120_i32 dim 1 : vector<4x512xf32>, i32 -> vector<4x512xf32>
    %129 = tpu.concatenate %127, %128 in 0 : vector<4x512xf32>, vector<4x512xf32> -> vector<8x512xf32>
    %c112 = arith.constant 112 : index
    %c0_75 = arith.constant 0 : index
    %130 = vector.load %arg4[%c112, %c0_75] : memref<152x512xf32, #tpu.memory_space<vmem>>, vector<8x512xf32>
    %cst_76 = arith.constant 0.000000e+00 : f32
    %131 = vector.broadcast %cst_76 : f32 to vector<8x512xf32>
    %132 = arith.cmpf one, %130, %131 : vector<8x512xf32>
    %cst_77 = arith.constant 0.000000e+00 : f32
    %133 = vector.broadcast %cst_77 : f32 to vector<8x512xf32>
    %134 = arith.select %132, %129, %133 : vector<8x512xi1>, vector<8x512xf32>
    %c112_78 = arith.constant 112 : index
    %c0_79 = arith.constant 0 : index
    %135 = vector.load %arg8[%c112_78, %c0_79] : memref<160x512xf32, #tpu.memory_space<vmem>>, vector<8x512xf32>
    tpu.vector_store %arg8[%c112_78, %c0_79], %134 {strides = array<i32>} : memref<160x512xf32, #tpu.memory_space<vmem>>, vector<8x512xf32>,
    %c8_i32 = arith.constant 8 : i32
    %136 = tpu.dynamic_rotate %3 by %c8_i32 dim 1 : vector<4x512xf32>, i32 -> vector<4x512xf32>
    %137 = tpu.concatenate %136, %3 in 0 : vector<4x512xf32>, vector<4x512xf32> -> vector<8x512xf32>
    %c120 = arith.constant 120 : index
    %c0_80 = arith.constant 0 : index
    %138 = vector.load %arg4[%c120, %c0_80] : memref<152x512xf32, #tpu.memory_space<vmem>>, vector<8x512xf32>
    %cst_81 = arith.constant 0.000000e+00 : f32
    %139 = vector.broadcast %cst_81 : f32 to vector<8x512xf32>
    %140 = arith.cmpf one, %138, %139 : vector<8x512xf32>
    %cst_82 = arith.constant 0.000000e+00 : f32
    %141 = vector.broadcast %cst_82 : f32 to vector<8x512xf32>
    %142 = arith.select %140, %137, %141 : vector<8x512xi1>, vector<8x512xf32>
    %c120_83 = arith.constant 120 : index
    %c0_84 = arith.constant 0 : index
    %143 = vector.load %arg8[%c120_83, %c0_84] : memref<160x512xf32, #tpu.memory_space<vmem>>, vector<8x512xf32>
    tpu.vector_store %arg8[%c120_83, %c0_84], %142 {strides = array<i32>} : memref<160x512xf32, #tpu.memory_space<vmem>>, vector<8x512xf32>,
    %c504_i32 = arith.constant 504 : i32
    %144 = tpu.dynamic_rotate %3 by %c504_i32 dim 1 : vector<4x512xf32>, i32 -> vector<4x512xf32>
    %c392_i32 = arith.constant 392 : i32
    %145 = tpu.dynamic_rotate %3 by %c392_i32 dim 1 : vector<4x512xf32>, i32 -> vector<4x512xf32>
    %146 = tpu.concatenate %144, %145 in 0 : vector<4x512xf32>, vector<4x512xf32> -> vector<8x512xf32>
    %c128 = arith.constant 128 : index
    %c0_85 = arith.constant 0 : index
    %147 = vector.load %arg4[%c128, %c0_85] : memref<152x512xf32, #tpu.memory_space<vmem>>, vector<8x512xf32>
    %cst_86 = arith.constant 0.000000e+00 : f32
    %148 = vector.broadcast %cst_86 : f32 to vector<8x512xf32>
    %149 = arith.cmpf one, %147, %148 : vector<8x512xf32>
    %cst_87 = arith.constant 0.000000e+00 : f32
    %150 = vector.broadcast %cst_87 : f32 to vector<8x512xf32>
    %151 = arith.select %149, %146, %150 : vector<8x512xi1>, vector<8x512xf32>
    %c128_88 = arith.constant 128 : index
    %c0_89 = arith.constant 0 : index
    %152 = vector.load %arg8[%c128_88, %c0_89] : memref<160x512xf32, #tpu.memory_space<vmem>>, vector<8x512xf32>
    tpu.vector_store %arg8[%c128_88, %c0_89], %151 {strides = array<i32>} : memref<160x512xf32, #tpu.memory_space<vmem>>, vector<8x512xf32>,
    %c384_i32 = arith.constant 384 : i32
    %153 = tpu.dynamic_rotate %3 by %c384_i32 dim 1 : vector<4x512xf32>, i32 -> vector<4x512xf32>
    %c376_i32 = arith.constant 376 : i32
    %154 = tpu.dynamic_rotate %3 by %c376_i32 dim 1 : vector<4x512xf32>, i32 -> vector<4x512xf32>
    %155 = tpu.concatenate %153, %154 in 0 : vector<4x512xf32>, vector<4x512xf32> -> vector<8x512xf32>
    %c136 = arith.constant 136 : index
    %c0_90 = arith.constant 0 : index
    %156 = vector.load %arg4[%c136, %c0_90] : memref<152x512xf32, #tpu.memory_space<vmem>>, vector<8x512xf32>
    %cst_91 = arith.constant 0.000000e+00 : f32
    %157 = vector.broadcast %cst_91 : f32 to vector<8x512xf32>
    %158 = arith.cmpf one, %156, %157 : vector<8x512xf32>
    %cst_92 = arith.constant 0.000000e+00 : f32
    %159 = vector.broadcast %cst_92 : f32 to vector<8x512xf32>
    %160 = arith.select %158, %155, %159 : vector<8x512xi1>, vector<8x512xf32>
    %c136_93 = arith.constant 136 : index
    %c0_94 = arith.constant 0 : index
    %161 = vector.load %arg8[%c136_93, %c0_94] : memref<160x512xf32, #tpu.memory_space<vmem>>, vector<8x512xf32>
    tpu.vector_store %arg8[%c136_93, %c0_94], %160 {strides = array<i32>} : memref<160x512xf32, #tpu.memory_space<vmem>>, vector<8x512xf32>,
    %cst_95 = arith.constant 0.000000e+00 : f32
    %162 = vector.broadcast %cst_95 : f32 to vector<4x512xf32>
    %163 = tpu.concatenate %3, %162 in 0 : vector<4x512xf32>, vector<4x512xf32> -> vector<8x512xf32>
    %c144 = arith.constant 144 : index
    %c0_96 = arith.constant 0 : index
    %164 = vector.load %arg8[%c144, %c0_96] : memref<160x512xf32, #tpu.memory_space<vmem>>, vector<8x512xf32>
    tpu.vector_store %arg8[%c144, %c0_96], %163 {strides = array<i32>} : memref<160x512xf32, #tpu.memory_space<vmem>>, vector<8x512xf32>,
    %165 = tpu.iota {dimensions = array<i32: 0>} : vector<8x512xi32>
    %c0_i32 = arith.constant 0 : i32
    %166 = vector.broadcast %c0_i32 : i32 to vector<8x512xi32>
    %167 = arith.cmpi eq, %165, %166 : vector<8x512xi32>
    %168 = arith.extui %167 : vector<8x512xi1> to vector<8x512xi32>
    %169 = arith.sitofp %168 : vector<8x512xi32> to vector<8x512xf32>
    %c152 = arith.constant 152 : index
    %c0_97 = arith.constant 0 : index
    %170 = vector.load %arg8[%c152, %c0_97] : memref<160x512xf32, #tpu.memory_space<vmem>>, vector<8x512xf32>
    tpu.vector_store %arg8[%c152, %c0_97], %169 {strides = array<i32>} : memref<160x512xf32, #tpu.memory_space<vmem>>, vector<8x512xf32>,
    %c0_98 = arith.constant 0 : index
    %c0_99 = arith.constant 0 : index
    %171 = vector.load %arg3[%c0_98, %c0_99] : memref<20x160xf32, #tpu.memory_space<vmem>>, vector<20x160xf32>
    %c0_100 = arith.constant 0 : index
    %c0_101 = arith.constant 0 : index
    %172 = vector.load %arg8[%c0_100, %c0_101] : memref<160x512xf32, #tpu.memory_space<vmem>>, vector<160x512xf32>
    %cst_102 = arith.constant dense<0.000000e+00> : vector<20x512xf32>
    %173 = tpu.matmul %171, %172, %cst_102 {dimension_numbers = #tpu.dot_dimension_numbers<[1], [0], [0], [1], [0, 0, 1, 1], [], []>, precision = #tpu.contract_precision<fp32>} : vector<20x160xf32>, vector<160x512xf32>, vector<20x512xf32> -> vector<20x512xf32>
    %c0_103 = arith.constant 0 : index
    %c0_104 = arith.constant 0 : index
    %c0_105 = arith.constant 0 : index
    %174 = vector.load %arg1[%c0_103, %c0_104, %c0_105] : memref<1x20x512xf32, #tpu.memory_space<vmem>>, vector<1x20x512xf32>
    %175 = vector.shape_cast %174 : vector<1x20x512xf32> to vector<20x512xf32>
    %c0_106 = arith.constant 0 : index
    %c0_107 = arith.constant 0 : index
    %176 = vector.load %arg5[%c0_106, %c0_107] : memref<20x1xf32, #tpu.memory_space<vmem>>, vector<20x1xf32>
    %177 = vector.broadcast %176 : vector<20x1xf32> to vector<20x512xf32>
    %178 = arith.mulf %175, %177 : vector<20x512xf32>
    %179 = arith.addf %173, %178 : vector<20x512xf32>
    %cst_108 = arith.constant 0.000000e+00 : f32
    %180 = vector.broadcast %cst_108 : f32 to vector<20x512xf32>
    %181 = arith.cmpf oge, %179, %180 : vector<20x512xf32>
    %c0_109 = arith.constant 0 : index
    %c0_110 = arith.constant 0 : index
    %182 = vector.load %arg6[%c0_109, %c0_110] : memref<20x1xf32, #tpu.memory_space<vmem>>, vector<20x1xf32>
    %183 = vector.broadcast %182 : vector<20x1xf32> to vector<20x512xf32>
    %184 = arith.mulf %179, %183 : vector<20x512xf32>
    %185 = arith.select %181, %179, %184 : vector<20x512xi1>, vector<20x512xf32>
    %c0_111 = arith.constant 0 : index
    %c0_112 = arith.constant 0 : index
    %c0_113 = arith.constant 0 : index
    %186 = vector.load %arg7[%c0_111, %c0_112, %c0_113] : memref<1x20x512xf32, #tpu.memory_space<vmem>>, vector<1x20x512xf32>
    %187 = vector.shape_cast %186 : vector<1x20x512xf32> to vector<20x512xf32>
    %188 = vector.shape_cast %185 : vector<20x512xf32> to vector<1x20x512xf32>
    tpu.vector_store %arg7[%c0_111, %c0_112, %c0_113], %188 {strides = array<i32>} : memref<1x20x512xf32, #tpu.memory_space<vmem>>, vector<1x20x512xf32>,
    return
  }
  func.func @transform_0(%arg0: i32) -> (i32, i32, i32) {
    %c0_i32 = arith.constant 0 : i32
    %c0_i32_0 = arith.constant 0 : i32
    %c0_i32_1 = arith.constant 0 : i32
    return %arg0, %c0_i32, %c0_i32_0 : i32, i32, i32
  }
  func.func @transform_1(%arg0: i32) -> (i32, i32) {
    %c0_i32 = arith.constant 0 : i32
    %c0_i32_0 = arith.constant 0 : i32
    %c0_i32_1 = arith.constant 0 : i32
    return %c0_i32, %c0_i32_0 : i32, i32
  }
  func.func @transform_2(%arg0: i32) -> (i32, i32) {
    %c0_i32 = arith.constant 0 : i32
    %c0_i32_0 = arith.constant 0 : i32
    %c0_i32_1 = arith.constant 0 : i32
    return %c0_i32, %c0_i32_0 : i32, i32
  }
  func.func @transform_3(%arg0: i32) -> (i32, i32) {
    %c0_i32 = arith.constant 0 : i32
    %c0_i32_0 = arith.constant 0 : i32
    %c0_i32_1 = arith.constant 0 : i32
    return %c0_i32, %c0_i32_0 : i32, i32
  }
  func.func @transform_4(%arg0: i32) -> (i32, i32) {
    %c0_i32 = arith.constant 0 : i32
    %c0_i32_0 = arith.constant 0 : i32
    %c0_i32_1 = arith.constant 0 : i32
    return %c0_i32, %c0_i32_0 : i32, i32
  }
  func.func @transform_5(%arg0: i32) -> (i32, i32) {
    %c0_i32 = arith.constant 0 : i32
    %c0_i32_0 = arith.constant 0 : i32
    %c0_i32_1 = arith.constant 0 : i32
    return %c0_i32, %c0_i32_0 : i32, i32
  }
  func.func @transform_6(%arg0: i32) -> (i32, i32, i32) {
    %c0_i32 = arith.constant 0 : i32
    %c0_i32_0 = arith.constant 0 : i32
    %c0_i32_1 = arith.constant 0 : i32
    return %arg0, %c0_i32, %c0_i32_0 : i32, i32, i32
  }
}

</mosaic_0001>

<bundles_post_ra>
// kernel: tpu_custom_call.1
= control target key start
LH: loop header
LB: loop body
LE: loop exit
PB: predicated region body
PF: predicated region fallthrough
CT: control target
= control target key end

     0   :  { %11 = vsyncpa [#allocation4], 0  ;;  %s5040_s21 = smov [#allocation3]   ;;  %s8018_s0 = inlined_call_operand.vmem [shape: f32[1,20,512], index: 0, kind: input, shape index: {}]   ;;  %s8019_s1 = inlined_call_operand.vmem [shape: f32[4,20], index: 1, kind: input, shape index: {}]   ;;  %s8020_s2 = inlined_call_operand.vmem [shape: f32[20,160], index: 2, kind: input, shape index: {}]   ;;  %s8021_s3 = inlined_call_operand.hbm [shape: f32[152,512], index: 3, kind: input, shape index: {}]   ;;  %s8022_s4 = inlined_call_operand.vmem [shape: f32[20,1], index: 4, kind: input, shape index: {}]   ;;  %s8023_s5 = inlined_call_operand.vmem [shape: f32[20,1], index: 5, kind: input, shape index: {}]   ;;  %s8024_s6 = inlined_call_operand.vmem [shape: f32[1,20,512], index: 6, kind: output, shape index: {}]  }
   0x1   :  { %s23_s22 = sshll.u32 %s5040_s21, 4  ;;  %s5016_s25 = scalar_lea.hbm %s8021_s3, 9728  ;;  %s24_s22 = int_to_ptr.vmem [resolvable:$true] %s23_s22 }
   0x2   :  { %p5017_p0 = scmp.ne.s32.totalorder %s8021_s3, %s5016_s25  ;;  %p5020_p1 = scmp.lt.u32.totalorder %s5016_s25, %s8021_s3 }
   0x4   :  { %p5022_p2 = pnand %p5020_p1, %p5017_p0 }
   0x6   :  { %5025 = shalt.err (!%p5022_p2)
}
   0x7   :  { %s5026_s30 = scalar_lea.vmem %s24_s22, 9728  ;;  %p5031_p4 = scmp.lt.s32.totalorder %s24_s22, %s24_s22 }
   0x8   :  { %p5027_p3 = scmp.ne.s32.totalorder %s24_s22, %s5026_s30  ;;  %p5032_p5 = scmp.lt.s32.totalorder %s5026_s30, %s5026_s30 }
   0xa   :  { %p5033_p6 = por %p5032_p5, %p5031_p4 }
   0xc   :  { %p5034_p7 = pnand %p5033_p6, %p5027_p3 }
   0xe   :  { %5037 = shalt.err (!%p5034_p7)
}
   0xf   :  { %s5041_s7 = smov 512   ;;  %s5042_s8 = smov 32  }
  0x10   :  { %29 = dma.hbm_to_vmem [thread:$0]  %s8021_s3, 9728, %s24_s22, [#allocation4], %s5041_s7, %s5041_s7, %s5042_s8  }
  0x11   :  { %5038 = dma.done.wait [#allocation4], 9728  }
  0x12   :  { %5039 = vsyncadd [#allocation4], 4294957568  ;;  %v5043_v0 = vmov 0.0   ;;  %v39_v1 = vld [vmem:[%s8018_s0 + $0x8] sm:$0xff]  ;;  %v41_v3 = vld [vmem:[%s8018_s0 + $0x18] sm:$0xff]  ;;  %vm54_vm0 = vcmask 1043456  }
  0x13   :  { %137 = vmatprep.mubr.f32.mxu0 %v5043_v0  ;;  %654 = vmatprep.mubr.f32.mxu1 %v5043_v0  ;;  %v43_v2 = vld [vmem:[%s8018_s0 + $0x28] sm:$0xff]  ;;  %v67_v4 = vand.u32 4294901760, %v39_v1  ;;  %v45_v6 = vld [vmem:[%s8018_s0 + $0x38] sm:$0xff]  ;;  %v584_v7 = vand.u32 4294901760, %v41_v3  ;;  %v38_v8 = vld [vmem:[%s8018_s0] sm:$0xff]  ;;  %vm50_vm1 = vcmask 162816  }
  0x14   :  { %v71_v5 = vand.u32 4294901760, %v43_v2  ;;  %v42_v9 = vld [vmem:[%s8018_s0 + $0x20] sm:$0xff]  ;;  %v588_v10 = vand.u32 4294901760, %v45_v6  ;;  %v69_v11 = vand.u32 4294901760, %v38_v8  ;;  %v40_v13 = vld [vmem:[%s8018_s0 + $0x10] sm:$0xff]  ;;  %s5045_s13 = smov 1  }
  0x15   :  { %v73_v12 = vand.u32 4294901760, %v42_v9  ;;  %v44_v14 = vld [vmem:[%s8018_s0 + $0x30] sm:$0xff]  ;;  %v5145_v16 = vsub.f32 %v39_v1, %v67_v4  ;;  %v5149_v18 = vsub.f32 %v41_v3, %v584_v7  ;;  %v47_v19 = vld [vmem:[%s8018_s0 + $0x48] sm:$0xf]  ;;  %v49_v20 = vld [vmem:[%s8018_s0 + $0x58] sm:$0xf] }
  0x16   :  { %v5143_v15 = vpack.c.bf16 %v71_v5, %v67_v4  ;;  %v5147_v17 = vsub.f32 %v43_v2, %v71_v5  ;;  %v46_v21 = vld [vmem:[%s8018_s0 + $0x40] sm:$0xf]  ;;  %v5160_v22 = vpack.c.bf16 %v588_v10, %v584_v7  ;;  %v5162_v23 = vsub.f32 %v45_v6, %v588_v10  ;;  %v48_v26 = vld [vmem:[%s8018_s0 + $0x50] sm:$0xf]  ;;  %s5046_s14 = smov 17   ;;  %s5047_s15 = smov 15  }
  0x17   :  { %v5164_v24 = vpack.c.bf16 %v73_v12, %v69_v11  ;;  %v5166_v25 = vsub.f32 %v38_v8, %v69_v11  ;;  %v5172_v27 = vsub.f32 %v42_v9, %v73_v12  ;;  %v586_v28 = vand.u32 4294901760, %v40_v13  ;;  %v37_v31 = vld [vmem:[%s8019_s1] sm:$0xf]  ;;  %s5044_s1 = smov 16   ;;  %s5048_s16 = smov 127  }
  0x18   :  { %4354 = vmatprep.subr.bf16.mxu0 %v5143_v15  ;;  %v590_v29 = vand.u32 4294901760, %v44_v14  ;;  %v59_v30 = vsel %vm54_vm0, %v47_v19, 0  ;;  %4378 = vmatprep.subr.bf16.mxu1 %v5160_v22  ;;  %v65_v33 = vsel %vm54_vm0, %v49_v20, 0  ;;  %v56_v34 = vsel %vm54_vm0, %v46_v21, 0  ;;  %s5049_s3 = smov 112   ;;  %s5050_s17 = smov 113  }
  0x19   :  { %4356 = vmatpush1.bf16.msra.mxu0 %v5164_v24  ;;  %v5180_v32 = vand.u32 4294901760, %v59_v30  ;;  %v62_v35 = vsel %vm54_vm0, %v48_v26, 0  ;;  %v5187_v37 = vsub.f32 %v40_v13, %v586_v28  ;;  %v5191_v39 = vand.u32 4294901760, %v65_v33  ;;  %s5051_s18 = smov 34   ;;  %s5052_s19 = smov 30  }
  0x1a   :  { %v5185_v36 = vpack.c.bf16 %v590_v29, %v586_v28  ;;  %v5189_v38 = vsub.f32 %v44_v14, %v590_v29  ;;  %v5194_v40 = vand.u32 4294901760, %v56_v34  ;;  %v5196_v41 = vand.u32 4294901760, %v62_v35  ;;  %s5053_s20 = smov 111   ;;  %s5054_s21 = smov 98  }
  0x1b   :  { %76 = vmatprep.subr.mxu0 %v5180_v32  ;;  %v52_v42 = vsel %vm50_vm1, %v37_v31, 0  ;;  %v151_v43 = vand.u32 4294901760, %v5145_v16  ;;  %v163_v45 = vand.u32 4294901760, %v5147_v17  ;;  %v668_v46 = vand.u32 4294901760, %v5149_v18  ;;  %s5055_s22 = smov 2   ;;  %s5056_s23 = smov 126  }
  0x1c   :  { %4380 = vmatpush1.bf16.msra.mxu1 %v5185_v36  ;;  %v5201_v44 = vand.u32 4294901760, %v52_v42  ;;  %v680_v47 = vand.u32 4294901760, %v5162_v23  ;;  %v5209_v48 = vsub.f32 %v56_v34, %v5194_v40  ;;  %v5212_v49 = vsub.f32 %v62_v35, %v5196_v41  ;;  %s5058_s24 = smov 64   ;;  %s5059_s25 = smov 96  }
  0x1d   :  { %593 = vmatprep.subr.mxu1 %v5191_v39  ;;  %78 = vmatpush1.msra.mxu0 %v5194_v40  ;;  %v152_v50 = vsub.f32 %v5145_v16, %v151_v43  ;;  %v157_v51 = vand.u32 4294901760, %v5166_v25  ;;  %v164_v53 = vsub.f32 %v5147_v17, %v163_v45  ;;  %v669_v54 = vsub.f32 %v5149_v18, %v668_v46  ;;  %s5060_s26 = smov 68   ;;  %s5061_s27 = smov 4  }
  0x1e   :  { %v5219_v52 = vsub.f32 %v52_v42, %v5201_v44  ;;  %v681_v55 = vsub.f32 %v5162_v23, %v680_v47  ;;  %v169_v58 = vand.u32 4294901760, %v5172_v27  ;;  %v674_v59 = vand.u32 4294901760, %v5187_v37  ;;  %s5062_s28 = smov 124   ;;  %s5063_s29 = smov 60  }
  0x1f   :  { %v153_v56 = vand.u32 4294901760, %v152_v50  ;;  %v158_v57 = vsub.f32 %v5166_v25, %v157_v51  ;;  %v165_v61 = vand.u32 4294901760, %v164_v53  ;;  %v670_v62 = vand.u32 4294901760, %v669_v54  ;;  %s5064_s30 = smov 8   ;;  %s5065_s7 = smov 120  }
  0x20   :  { %595 = vmatpush1.msra.mxu1 %v5196_v41  ;;  %v5237_v60 = vand.u32 4294901760, %v5219_v52  ;;  %v682_v63 = vand.u32 4294901760, %v681_v55  ;;  %v170_v2 = vsub.f32 %v5172_v27, %v169_v58  ;;  %v675_v3 = vsub.f32 %v5187_v37, %v674_v59 }
  0x21   :  { %v159_v1 = vand.u32 4294901760, %v158_v57  ;;  %v686_v4 = vand.u32 4294901760, %v5189_v38  ;;  %v4357_v6 = vpack.c.bf16 %v165_v61, %v153_v56  ;;  %v5249_v8 = vsub.f32 %v59_v30, %v5180_v32 }
  0x22   :  { %v141_v5 = vsub.f32 %v5219_v52, %v5237_v60  ;;  %v4381_v7 = vpack.c.bf16 %v682_v63, %v670_v62  ;;  %v171_v9 = vand.u32 4294901760, %v170_v2  ;;  %v676_v10 = vand.u32 4294901760, %v675_v3 }
  0x23   :  { %v687_v11 = vsub.f32 %v5189_v38, %v686_v4  ;;  %v5255_v12 = vsub.f32 %v65_v33, %v5191_v39  ;;  %4358 = vmatprep.subr.bf16.mxu0 %v4357_v6  ;;  %v175_v14 = vand.u32 4294901760, %v5249_v8  ;;  %v181_v19 = vand.u32 4294901760, %v5209_v48 }
  0x24   :  { %v142_v13 = vand.u32 4294901760, %v141_v5  ;;  %4382 = vmatprep.subr.bf16.mxu1 %v4381_v7  ;;  %v698_v20 = vand.u32 4294901760, %v5212_v49  ;;  %v4359_v21 = vpack.c.bf16 %v171_v9, %v159_v1  ;;  %v4361_v50 = vpack.c.bf16 %v5147_v17, %v5145_v16 }
  0x25   :  { %v688_v26 = vand.u32 4294901760, %v687_v11  ;;  %v692_v28 = vand.u32 4294901760, %v5255_v12  ;;  %v176_v29 = vsub.f32 %v5249_v8, %v175_v14  ;;  %v182_v30 = vsub.f32 %v5209_v48, %v181_v19 }
  0x26   :  { %143 = vmatmul.mubr.f32.vlgmr.msra.gmra.mrb[0].mxu0 %v142_v13  ;;  %660 = vmatmul.mubr.f32.vlgmr.msra.gmra.mrb[0].mxu1 %v142_v13  ;;  %v699_v31 = vsub.f32 %v5212_v49, %v698_v20  ;;  %v4385_v55 = vpack.c.bf16 %v5162_v23, %v5149_v18  ;;  %v4363_v56 = vpack.c.bf16 %v5172_v27, %v5166_v25  ;;  %v1109_v27 = vlaneseq }
  0x27   :  { %4360 = vmatpush1.bf16.msra.mxu0 %v4359_v21  ;;  %v4383_v33 = vpack.c.bf16 %v688_v26, %v676_v10  ;;  %v693_v34 = vsub.f32 %v5255_v12, %v692_v28  ;;  %243 = vmatprep.mubr.f32.mxu0 %v5043_v0  ;;  %v177_v35 = vand.u32 4294901760, %v176_v29  ;;  %v183_v42 = vand.u32 4294901760, %v182_v30  ;;  %v1145_v10 = vld [vmem:[#allocation3] sm:$0xff] }
  0x28   :  { %760 = vmatprep.mubr.f32.mxu1 %v5043_v0  ;;  %v700_v54 = vand.u32 4294901760, %v699_v31  ;;  %v4387_v57 = vpack.c.bf16 %v5189_v38, %v5187_v37  ;;  %v4369_v61 = vpack.c.bf16 %v163_v45, %v151_v43  ;;  %v4393_v62 = vpack.c.bf16 %v680_v47, %v668_v46  ;;  %v1203_v26 = vld [vmem:[#allocation3 + $0x20] sm:$0xff] }
  0x29   :  { %4384 = vmatpush1.bf16.msra.mxu1 %v4383_v33  ;;  %v694_v53 = vand.u32 4294901760, %v693_v34  ;;  %178 = vmatprep.subr.mxu0 %v177_v35  ;;  %v4371_v16 = vpack.c.bf16 %v169_v58, %v157_v51  ;;  %v4395_v17 = vpack.c.bf16 %v686_v4, %v674_v59  ;;  %v1148_v59 = vld [vmem:[#allocation3 + $0x18] sm:$0xff]  ;;  %vm1149_vm8 = vcmp.ne.f32.partialorder %v1145_v10, 0.0 }
  0x2a   :  { %vm1152_vm5 = vcmp.ne.f32.partialorder %v1148_v59, 0.0  ;;  %vm1207_vm9 = vcmp.ne.f32.partialorder %v1203_v26, 0.0 }
  0x2b   :  { %695 = vmatprep.subr.mxu1 %v694_v53  ;;  %184 = vmatpush1.msra.mxu0 %v183_v42 }
  0x2c   :  { %4362 = vmatprep.subr.bf16.mxu0 %v4361_v50 }
  0x2d   :  { %701 = vmatpush1.msra.mxu1 %v700_v54 }
  0x2e   :  { %245 = vmatmul.mubr.f32.vlgmr.msra.gmra.mrb[0].mxu0 %v5201_v44  ;;  %762 = vmatmul.mubr.f32.vlgmr.msra.gmra.mrb[0].mxu1 %v5201_v44 }
  0x2f   :  { %4386 = vmatprep.subr.bf16.mxu1 %v4385_v55  ;;  %4364 = vmatpush1.bf16.msra.mxu0 %v4363_v56 }
  0x30   :  { %4388 = vmatpush1.bf16.msra.mxu1 %v4387_v57  ;;  %265 = vmatprep.subr.mxu0 %v5249_v8 }
  0x31   :  { %782 = vmatprep.subr.mxu1 %v5255_v12  ;;  %327 = vmatprep.mubr.f32.mxu0 %v5043_v0 }
  0x32   :  { %844 = vmatprep.mubr.f32.mxu1 %v5043_v0 }
  0x33   :  { %268 = vmatpush1.msra.mxu0 %v5209_v48  ;;  %v5433_v48 = vshrl.u32 %v1109_v27, 7 }
  0x34   :  { %785 = vmatpush1.msra.mxu1 %v5212_v49  ;;  %4366 = vmatprep.subr.bf16.mxu0 %v5143_v15 }
  0x35   :  { %4390 = vmatprep.subr.bf16.mxu1 %v5160_v22  ;;  %8255 = vst [vmem:[#allocation7_spill] sm:$0xff] %v5433_v48  ;;  %vm8202_vm6 = vcmp.eq.s32.totalorder %v5433_v48, 0 }
  0x36   :  { %330 = vmatmul.mubr.f32.vlgmr.msra.gmra.mrb[0].mxu0 %v5219_v52  ;;  %847 = vmatmul.mubr.f32.vlgmr.msra.gmra.mrb[0].mxu1 %v5219_v52 }
  0x37   :  { %4368 = vmatpush1.bf16.msra.mxu0 %v5164_v24  ;;  %4392 = vmatpush1.bf16.msra.mxu1 %v5185_v36 }
  0x38   :  { %345 = vmatprep.subr.mxu0 %v5180_v32  ;;  %862 = vmatprep.subr.mxu1 %v5191_v39 }
  0x39   :  { %406 = vmatprep.mubr.f32.mxu0 %v5043_v0  ;;  %923 = vmatprep.mubr.f32.mxu1 %v5043_v0 }
  0x3b   :  { %347 = vmatpush1.msra.mxu0 %v5194_v40  ;;  %864 = vmatpush1.msra.mxu1 %v5196_v41 }
  0x3c   :  { %4370 = vmatprep.subr.bf16.mxu0 %v4369_v61  ;;  %4394 = vmatprep.subr.bf16.mxu1 %v4393_v62 }
  0x3e   :  { %410 = vmatmul.mubr.f32.vlgmr.msra.gmra.mrb[0].mxu0 %v5237_v60  ;;  %927 = vmatmul.mubr.f32.vlgmr.msra.gmra.mrb[0].mxu1 %v5237_v60 }
  0x3f   :  { %4372 = vmatpush1.bf16.msra.mxu0 %v4371_v16  ;;  %4396 = vmatpush1.bf16.msra.mxu1 %v4395_v17 }
  0x40   :  { %435 = vmatprep.subr.mxu0 %v175_v14  ;;  %952 = vmatprep.subr.mxu1 %v692_v28  ;;  %v4340_v14 = vsel %vm8202_vm6, 1.0, %v5043_v0  ;;  %v1206_v28 = vld [vmem:[#allocation3 + $0x38] sm:$0xff] }
  0x41   :  { %498 = vmatprep.mubr.f32.mxu0 %v5043_v0  ;;  %1015 = vmatprep.mubr.f32.mxu1 %v5043_v0  ;;  %vm1210_vm10 = vcmp.ne.f32.partialorder %v1206_v28, 0.0 }
  0x43   :  { %439 = vmatpush1.msra.mxu0 %v181_v19  ;;  %956 = vmatpush1.msra.mxu1 %v698_v20 }
  0x44   :  { %4374 = vmatprep.subr.bf16.mxu0 %v5143_v15  ;;  %4398 = vmatprep.subr.bf16.mxu1 %v5160_v22 }
  0x46   :  { %500 = vmatmul.mubr.f32.vlgmr.msra.gmra.mrb[0].mxu0 %v5201_v44  ;;  %1017 = vmatmul.mubr.f32.vlgmr.msra.gmra.mrb[0].mxu1 %v5201_v44 }
  0x47   :  { %4376 = vmatpush1.bf16.msra.mxu0 %v5164_v24  ;;  %4400 = vmatpush1.bf16.msra.mxu1 %v5185_v36 }
  0x48   :  { %515 = vmatprep.subr.mxu0 %v5180_v32  ;;  %1032 = vmatprep.subr.mxu1 %v5191_v39  ;;  %v5416_v32 = vand.u32 127, %v1109_v27 }
  0x49   :  { %576 = vmatprep.mubr.f32.mxu0 %v5043_v0  ;;  %1093 = vmatprep.mubr.f32.mxu1 %v5043_v0  ;;  %v5485_v0 = vsub.f32 %v4340_v14, %v4340_v14 }
  0x4a   :  { %vm1182_vm2 = vcmp.lt.s32.totalorder %v5416_v32, 1  ;;  %vm1124_vm3 = vcmp.lt.s32.totalorder %v5416_v32, 16  ;;  %vm1111_vm4 = vcmp.lt.s32.totalorder %v5416_v32, 17  ;;  %vm1169_vm7 = vcmp.lt.s32.totalorder %v5416_v32, 15 }
  0x4b   :  { %517 = vmatpush1.msra.mxu0 %v5194_v40  ;;  %1034 = vmatpush1.msra.mxu1 %v5196_v41  ;;  %8257 = vst [vmem:[#allocation9_spill] sm:$0xff] %v5485_v0  ;;  %vm1227_vm11 = vcmp.lt.s32.totalorder %v5416_v32, 127  ;;  %v5499_v62 = vand.u32 4294901760, %v5485_v0  ;;  %vm1285_vm12 = vcmp.lt.s32.totalorder %v5416_v32, 112  ;;  %vm1272_vm1 = vcmp.lt.s32.totalorder %v5416_v32, 113 }
  0x4d   :  { %8258 = vst [vmem:[#allocation10_spill] sm:$0xff] %v5499_v62 }
  0x4e   :  { %578 = vmatmul.mubr.f32.vlgmr.msra.gmra.mrb[0].mxu0 %v5201_v44  ;;  %1095 = vmatmul.mubr.f32.vlgmr.msra.gmra.mrb[0].mxu1 %v5201_v44 }
 0x121   :  { %v5337_v15 = vpop.f32.mrb[0].mxu0  ;;  %v5339_v18 = vpop.f32.mrb[0].mxu1 }
 0x122   :  { %1120 = vrot.lane.b32.xlu1 %v5339_v18, %s5044_s1  ;;  %v5343_v22 = vpop.f32.mrb[1].mxu1  ;;  %1116 = vrot.lane.b32.xlu0 %v5337_v15, %s5044_s1  ;;  %v5347_v23 = vpop.f32.mrb[1].mxu0 }
 0x123   :  { %8254 = vst [vmem:[#allocation6_spill] sm:$0xff] %v5347_v23 }
 0x126   :  { %1122 = vrot.lane.b32.xlu1 %v5343_v22, %s5044_s1  ;;  %1174 = vrot.lane.b32.xlu0 %v5337_v15, %s5045_s13 }
 0x12a   :  { %1178 = vrot.lane.b32.xlu0 %v5339_v18, %s5045_s13  ;;  %1176 = vrot.lane.b32.xlu1 %v5347_v23, %s5045_s13 }
 0x12e   :  { %1101 = vrot.lane.b32.xlu0 %v5337_v15, %s5046_s14  ;;  %1180 = vrot.lane.b32.xlu1 %v5343_v22, %s5045_s13 }
 0x132   :  { %1105 = vrot.lane.b32.xlu0 %v5339_v18, %s5046_s14  ;;  %1103 = vrot.lane.b32.xlu1 %v5347_v23, %s5046_s14 }
 0x136   :  { %1161 = vrot.lane.b32.xlu0 %v5337_v15, %s5047_s15  ;;  %1107 = vrot.lane.b32.xlu1 %v5343_v22, %s5046_s14 }
 0x13a   :  { %1165 = vrot.lane.b32.xlu0 %v5339_v18, %s5047_s15  ;;  %1163 = vrot.lane.b32.xlu1 %v5347_v23, %s5047_s15 }
 0x13e   :  { %1219 = vrot.lane.b32.xlu0 %v5337_v15, %s5048_s16  ;;  %1167 = vrot.lane.b32.xlu1 %v5343_v22, %s5047_s15 }
 0x142   :  { %1223 = vrot.lane.b32.xlu0 %v5339_v18, %s5048_s16  ;;  %1221 = vrot.lane.b32.xlu1 %v5347_v23, %s5048_s16 }
 0x146   :  { %1277 = vrot.lane.b32.xlu0 %v5337_v15, %s5049_s3  ;;  %1225 = vrot.lane.b32.xlu1 %v5343_v22, %s5048_s16 }
 0x14a   :  { %1281 = vrot.lane.b32.xlu0 %v5339_v18, %s5049_s3  ;;  %1279 = vrot.lane.b32.xlu1 %v5347_v23, %s5049_s3 }
 0x14e   :  { %1264 = vrot.lane.b32.xlu0 %v5337_v15, %s5050_s17  ;;  %1283 = vrot.lane.b32.xlu1 %v5343_v22, %s5049_s3 }
 0x152   :  { %1268 = vrot.lane.b32.xlu0 %v5339_v18, %s5050_s17  ;;  %1266 = vrot.lane.b32.xlu1 %v5347_v23, %s5050_s17 }
 0x156   :  { %1335 = vrot.lane.b32.xlu0 %v5337_v15, %s5051_s18  ;;  %1270 = vrot.lane.b32.xlu1 %v5343_v22, %s5050_s17 }
 0x15a   :  { %1339 = vrot.lane.b32.xlu0 %v5339_v18, %s5051_s18  ;;  %1337 = vrot.lane.b32.xlu1 %v5347_v23, %s5051_s18 }
 0x15e   :  { %1393 = vrot.lane.b32.xlu0 %v5337_v15, %s5052_s19  ;;  %1341 = vrot.lane.b32.xlu1 %v5343_v22, %s5051_s18 }
 0x162   :  { %1397 = vrot.lane.b32.xlu0 %v5339_v18, %s5052_s19  ;;  %1395 = vrot.lane.b32.xlu1 %v5347_v23, %s5052_s19 }
 0x166   :  { %1322 = vrot.lane.b32.xlu0 %v5337_v15, %s5053_s20  ;;  %1399 = vrot.lane.b32.xlu1 %v5343_v22, %s5052_s19 }
 0x16a   :  { %1326 = vrot.lane.b32.xlu0 %v5339_v18, %s5053_s20  ;;  %1324 = vrot.lane.b32.xlu1 %v5347_v23, %s5053_s20 }
 0x16e   :  { %1380 = vrot.lane.b32.xlu0 %v5337_v15, %s5042_s8  ;;  %1328 = vrot.lane.b32.xlu1 %v5343_v22, %s5053_s20 }
 0x172   :  { %1384 = vrot.lane.b32.xlu0 %v5339_v18, %s5042_s8  ;;  %1382 = vrot.lane.b32.xlu1 %v5347_v23, %s5042_s8 }
 0x176   :  { %1496 = vrot.lane.b32.xlu0 %v5337_v15, %s5054_s21  ;;  %1386 = vrot.lane.b32.xlu1 %v5343_v22, %s5042_s8  ;;  %s5057_s8 = smov 94  }
 0x17a   :  { %1500 = vrot.lane.b32.xlu0 %v5339_v18, %s5054_s21  ;;  %1498 = vrot.lane.b32.xlu1 %v5347_v23, %s5054_s21 }
 0x17e   :  { %1438 = vrot.lane.b32.xlu0 %v5337_v15, %s5055_s22  ;;  %1502 = vrot.lane.b32.xlu1 %v5343_v22, %s5054_s21 }
 0x182   :  { %1442 = vrot.lane.b32.xlu0 %v5339_v18, %s5055_s22  ;;  %1440 = vrot.lane.b32.xlu1 %v5347_v23, %s5055_s22 }
 0x186   :  { %1483 = vrot.lane.b32.xlu0 %v5337_v15, %s5056_s23  ;;  %1444 = vrot.lane.b32.xlu1 %v5343_v22, %s5055_s22 }
 0x18a   :  { %1487 = vrot.lane.b32.xlu0 %v5339_v18, %s5056_s23  ;;  %1485 = vrot.lane.b32.xlu1 %v5347_v23, %s5056_s23 }
 0x18e   :  { %1554 = vrot.lane.b32.xlu0 %v5337_v15, %s5057_s8  ;;  %1489 = vrot.lane.b32.xlu1 %v5343_v22, %s5056_s23 }
 0x192   :  { %1558 = vrot.lane.b32.xlu0 %v5339_v18, %s5057_s8  ;;  %1556 = vrot.lane.b32.xlu1 %v5347_v23, %s5057_s8 }
 0x194   :  { %v5410_v24 = vpop.permute.xlu1 %1120  ;;  %v5412_v25 = vpop.permute.xlu0 %1116 }
 0x196   :  { %1612 = vrot.lane.b32.xlu0 %v5337_v15, %s5058_s24  ;;  %1560 = vrot.lane.b32.xlu1 %v5343_v22, %s5057_s8 }
 0x198   :  { %v1123_v36 = vpop.permute.xlu1 %1122  ;;  %v1175_v37 = vpop.permute.xlu0 %1174 }
 0x199   :  { %v1125_v49 = vsel %vm1124_vm3, %v5410_v24, %v1123_v36  ;;  %v1128_v51 = vsel %vm1124_vm3, %v1123_v36, %v5412_v25 }
 0x19a   :  { %1616 = vrot.lane.b32.xlu0 %v5339_v18, %s5058_s24  ;;  %1614 = vrot.lane.b32.xlu1 %v5347_v23, %s5058_s24  ;;  %v1133_v60 = vrot.slane %v1128_v51, 4  ;;  %v1136_v63 = vrot.slane %v1125_v49, 4 }
 0x19c   :  { %v1179_v38 = vpop.permute.xlu0 %1178  ;;  %v1177_v39 = vpop.permute.xlu1 %1176 }
 0x19d   :  { %v1184_v40 = vsel %vm1182_vm2, %v1177_v39, %v1179_v38  ;;  %v1185_v41 = vsel %vm1182_vm2, %v1175_v37, %v1177_v39 }
 0x19e   :  { %1541 = vrot.lane.b32.xlu0 %v5337_v15, %s5059_s25  ;;  %1618 = vrot.lane.b32.xlu1 %v5343_v22, %s5058_s24  ;;  %v1192_v8 = vrot.slane %v1185_v41, 4  ;;  %v1193_v9 = vrot.slane %v1184_v40, 4 }
 0x1a0   :  { %v1102_v43 = vpop.permute.xlu0 %1101  ;;  %v1181_v44 = vpop.permute.xlu1 %1180 }
 0x1a1   :  { %v1186_v45 = vsel %vm1182_vm2, %v1181_v44, %v1175_v37  ;;  %v1183_v19 = vsel %vm1182_vm2, %v1179_v38, %v1181_v44 }
 0x1a2   :  { %1545 = vrot.lane.b32.xlu0 %v5339_v18, %s5059_s25  ;;  %1543 = vrot.lane.b32.xlu1 %v5347_v23, %s5059_s25  ;;  %v1191_v33 = vrot.slane %v1186_v45, 4  ;;  %v1194_v34 = vrot.slane %v1183_v19, 4 }
 0x1a4   :  { %v1106_v46 = vpop.permute.xlu0 %1105  ;;  %v1104_v47 = vpop.permute.xlu1 %1103 }
 0x1a5   :  { %v5443_v52 = vsel %vm1111_vm4, %v1104_v47, %v1106_v46  ;;  %v5447_v58 = vsel %vm1111_vm4, %v1102_v43, %v1104_v47 }
 0x1a6   :  { %1599 = vrot.lane.b32.xlu0 %v5337_v15, %s5060_s26  ;;  %1547 = vrot.lane.b32.xlu1 %v5343_v22, %s5059_s25 }
 0x1a8   :  { %v1162_v1 = vpop.permute.xlu0 %1161  ;;  %v1108_v2 = vpop.permute.xlu1 %1107 }
 0x1a9   :  { %v1112_v3 = vsel %vm1111_vm4, %v1106_v46, %v1108_v2  ;;  %v1115_v4 = vsel %vm1111_vm4, %v1108_v2, %v1102_v43  ;;  %v2461_v46 = vsub.f32 %v5485_v0, %v5499_v62  ;;  %v1249_v2 = vld [vmem:[#allocation3 + $0x48] sm:$0xff] }
 0x1aa   :  { %v1141_v5 = vsel %vm54_vm0, %v1115_v4, %v1133_v60  ;;  %v1144_v6 = vsel %vm54_vm0, %v1112_v3, %v1136_v63  ;;  %1603 = vrot.lane.b32.xlu0 %v5339_v18, %s5060_s26  ;;  %1601 = vrot.lane.b32.xlu1 %v5347_v23, %s5060_s26  ;;  %v1248_v60 = vld [vmem:[#allocation3 + $0x40] sm:$0xff]  ;;  %v1250_v3 = vld [vmem:[#allocation3 + $0x50] sm:$0xff]  ;;  %vm1253_vm14 = vcmp.ne.f32.partialorder %v1249_v2, 0.0 }
 0x1ab   :  { %v1156_v7 = vsel %vm1152_vm5, %v1144_v6, 0.0  ;;  %v1153_v54 = vsel %vm1149_vm8, %v1141_v5, 0.0  ;;  %vm1252_vm13 = vcmp.ne.f32.partialorder %v1248_v60, 0.0  ;;  %vm1254_vm15 = vcmp.ne.f32.partialorder %v1250_v3, 0.0 }
 0x1ac   :  { %v3173_v11 = vand.u32 4294901760, %v1156_v7  ;;  %v1166_v12 = vpop.permute.xlu0 %1165  ;;  %v1164_v13 = vpop.permute.xlu1 %1163  ;;  %v2079_v37 = vand.u32 4294901760, %v1153_v54 }
 0x1ad   :  { %v1171_v20 = vsel %vm1169_vm7, %v1164_v13, %v1166_v12  ;;  %v1172_v21 = vsel %vm1169_vm7, %v1162_v1, %v1164_v13 }
 0x1ae   :  { %v5473_v29 = vsub.f32 %v1156_v7, %v3173_v11  ;;  %v5476_v30 = vsel %vm54_vm0, %v1172_v21, %v1192_v8  ;;  %v5479_v31 = vsel %vm54_vm0, %v1171_v20, %v1193_v9  ;;  %1670 = vrot.lane.b32.xlu0 %v5337_v15, %s5061_s27  ;;  %1605 = vrot.lane.b32.xlu1 %v5343_v22, %s5060_s26  ;;  %v5533_v7 = vld [vmem:[#allocation3 + $0x60] sm:$0xff]  ;;  %v1251_v9 = vld [vmem:[#allocation3 + $0x58] sm:$0xff]  ;;  %v1307_v20 = vld [vmem:[#allocation3 + $0x68] sm:$0xff] }
 0x1af   :  { %v5529_v6 = vsub.f32 %v1153_v54, %v2079_v37  ;;  %vm1310_vm2 = vcmp.ne.f32.partialorder %v5533_v7, 0.0  ;;  %vm1255_vm4 = vcmp.ne.f32.partialorder %v1251_v9, 0.0  ;;  %vm1311_vm5 = vcmp.ne.f32.partialorder %v1307_v20, 0.0 }
 0x1b0   :  { %8256 = vst [vmem:[#allocation8_spill] sm:$0xff] %v5473_v29  ;;  %v1220_v35 = vpop.permute.xlu0 %1219  ;;  %v1168_v42 = vpop.permute.xlu1 %1167  ;;  %v8033_v10 = vand.u32 4294901760, %v5473_v29 }
 0x1b1   :  { %v1170_v50 = vsel %vm1169_vm7, %v1166_v12, %v1168_v42  ;;  %v1173_v53 = vsel %vm1169_vm7, %v1168_v42, %v1162_v1  ;;  %8262 = vst [vmem:[#allocation14_spill] sm:$0xff] %v5529_v6  ;;  %v8029_v42 = vand.u32 4294901760, %v5529_v6 }
 0x1b2   :  { %v1199_v55 = vsel %vm54_vm0, %v1173_v53, %v1191_v33  ;;  %v1202_v56 = vsel %vm54_vm0, %v1170_v50, %v1194_v34  ;;  %1674 = vrot.lane.b32.xlu0 %v5339_v18, %s5061_s27  ;;  %1672 = vrot.lane.b32.xlu1 %v5347_v23, %s5061_s27  ;;  %v5549_v33 = vld [vmem:[#allocation3 + $0x70] sm:$0xff]  ;;  %v5555_v34 = vld [vmem:[#allocation3 + $0x78] sm:$0xff]  ;;  %v3329_v53 = vsub.f32 %v5473_v29, %v8033_v10 }
 0x1b3   :  { %v1211_v57 = vsel %vm1207_vm9, %v1199_v55, 0.0  ;;  %v1214_v61 = vsel %vm1210_vm10, %v1202_v56, 0.0  ;;  %vm1312_vm7 = vcmp.ne.f32.partialorder %v5549_v33, 0.0  ;;  %vm1313_vm8 = vcmp.ne.f32.partialorder %v5555_v34, 0.0 }
 0x1b4   :  { %v2083_v16 = vand.u32 4294901760, %v1211_v57  ;;  %v3177_v17 = vand.u32 4294901760, %v1214_v61  ;;  %v1224_v27 = vpop.permute.xlu0 %1223  ;;  %v1222_v36 = vpop.permute.xlu1 %1221  ;;  %vm1343_vm9 = vcmp.lt.s32.totalorder %v5416_v32, 34  ;;  %vm1401_vm10 = vcmp.lt.s32.totalorder %v5416_v32, 30 }
 0x1b5   :  { %v1229_v38 = vsel %vm1227_vm11, %v1222_v36, %v1224_v27  ;;  %v1230_v39 = vsel %vm1227_vm11, %v1220_v35, %v1222_v36 }
 0x1b6   :  { %v5505_v40 = vsub.f32 %v1214_v61, %v3177_v17  ;;  %v1236_v41 = vrot.slane %v1230_v39, 4  ;;  %v1237_v43 = vrot.slane %v1229_v38, 4  ;;  %1715 = vrot.lane.b32.xlu0 %v5337_v15, %s5062_s28  ;;  %1676 = vrot.lane.b32.xlu1 %v5343_v22, %s5061_s27  ;;  %v5511_v44 = vpack.c.bf16 %v3177_v17, %v3173_v11 }
 0x1b7   :  { %v5513_v45 = vpack.c.bf16 %v2083_v16, %v2079_v37  ;;  %v5537_v11 = vand.u32 4294901760, %v2461_v46  ;;  %v5543_v21 = vsub.f32 %v1211_v57, %v2083_v16  ;;  %v2239_v46 = vsub.f32 %v5529_v6, %v8029_v42 }
 0x1b8   :  { %8259 = vst [vmem:[#allocation11_spill] sm:$0xff] %v5505_v40  ;;  %8260 = vst [vmem:[#allocation12_spill] sm:$0xff] %v5511_v44  ;;  %v1244_v47 = vsel %vm54_vm0, %v5337_v15, %v1236_v41  ;;  %v1245_v49 = vsel %vm54_vm0, %v5347_v23, %v1237_v43  ;;  %v1278_v51 = vpop.permute.xlu0 %1277  ;;  %v1226_v59 = vpop.permute.xlu1 %1225  ;;  %4648 = vmatprep.subr.bf16.mxu1 %v5511_v44  ;;  %v8032_v61 = vand.u32 4294901760, %v5505_v40  ;;  %v3330_v43 = vand.u32 4294901760, %v3329_v53 }
 0x1b9   :  { %8261 = vst [vmem:[#allocation13_spill] sm:$0xff] %v5513_v45  ;;  %v1228_v63 = vsel %vm1227_vm11, %v1224_v27, %v1226_v59  ;;  %v1231_v1 = vsel %vm1227_vm11, %v1226_v59, %v1220_v35  ;;  %8263 = vst [vmem:[#allocation15_spill] sm:$0xff] %v5537_v11  ;;  %v5561_v50 = vsel %vm1253_vm14, %v1245_v49, 0.0  ;;  %v1256_v54 = vsel %vm1252_vm13, %v1244_v47, 0.0 }
 0x1ba   :  { %v1238_v4 = vrot.slane %v1228_v63, 4  ;;  %v1239_v5 = vrot.slane %v1231_v1, 4  ;;  %1118 = vrot.lane.b32.xlu0 %v5347_v23, %s5044_s1  ;;  %1717 = vrot.lane.b32.xlu1 %v5347_v23, %s5062_s28  ;;  %8264 = vst [vmem:[#allocation16_spill] sm:$0xff] %v5543_v21  ;;  %v8027_v16 = vand.u32 4294901760, %v5543_v21  ;;  %v2085_v37 = vand.u32 4294901760, %v5561_v50 }
 0x1bb   :  { %v3341_v38 = vsub.f32 %v5505_v40, %v8032_v61  ;;  %v2087_v39 = vand.u32 4294901760, %v1256_v54  ;;  %vm1330_vm11 = vcmp.lt.s32.totalorder %v5416_v32, 111 }
 0x1bc   :  { %v1246_v12 = vsel %vm54_vm0, %v5339_v18, %v1238_v4  ;;  %v1247_v13 = vsel %vm54_vm0, %v5343_v22, %v1239_v5  ;;  %v1282_v14 = vpop.permute.xlu0 %1281  ;;  %v1280_v19 = vpop.permute.xlu1 %1279  ;;  %v2251_v4 = vsub.f32 %v5543_v21, %v8027_v16 }
 0x1bd   :  { %v1287_v26 = vsel %vm1285_vm12, %v1280_v19, %v1282_v14  ;;  %v1288_v28 = vsel %vm1285_vm12, %v1278_v51, %v1280_v19  ;;  %v5568_v55 = vsel %vm1254_vm15, %v1246_v12, 0.0  ;;  %v5581_v36 = vsel %vm1255_vm4, %v1247_v13, 0.0 }
 0x1be   :  { %1719 = vrot.lane.b32.xlu0 %v5339_v18, %s5062_s28  ;;  %1721 = vrot.lane.b32.xlu1 %v5343_v22, %s5062_s28  ;;  %v3183_v41 = vand.u32 4294901760, %v5568_v55  ;;  %v1294_v47 = vrot.slane %v1288_v28, 4  ;;  %v1295_v49 = vrot.slane %v1287_v26, 4  ;;  %v3342_v60 = vand.u32 4294901760, %v3341_v38 }
 0x1bf   :  { %v3181_v3 = vand.u32 4294901760, %v5581_v36  ;;  %v5606_v12 = vsub.f32 %v5561_v50, %v2085_v37  ;;  %v2252_v7 = vand.u32 4294901760, %v2251_v4 }
 0x1c0   :  { %v1265_v56 = vpop.permute.xlu0 %1264  ;;  %v1284_v57 = vpop.permute.xlu1 %1283  ;;  %v5608_v13 = vpack.c.bf16 %v3342_v60, %v3330_v43  ;;  %v5615_v19 = vsub.f32 %v5568_v55, %v3183_v41 }
 0x1c1   :  { %v1286_v17 = vsel %vm1285_vm12, %v1282_v14, %v1284_v57  ;;  %v1289_v27 = vsel %vm1285_vm12, %v1284_v57, %v1278_v51  ;;  %8265 = vst [vmem:[#allocation17_spill] sm:$0xff] %v5606_v12  ;;  %v5610_v14 = vsub.f32 %v1256_v54, %v2087_v39 }
 0x1c2   :  { %1657 = vrot.lane.b32.xlu0 %v5337_v15, %s5063_s29  ;;  %1659 = vrot.lane.b32.xlu1 %v5347_v23, %s5063_s29  ;;  %8266 = vst [vmem:[#allocation18_spill] sm:$0xff] %v5608_v13  ;;  %8268 = vst [vmem:[#allocation20_spill] sm:$0xff] %v5615_v19  ;;  %v1296_v53 = vrot.slane %v1286_v17, 4  ;;  %v1297_v57 = vrot.slane %v1289_v27, 4  ;;  %v2240_v17 = vand.u32 4294901760, %v2239_v46  ;;  %v8026_v27 = vand.u32 4294901760, %v5606_v12 }
 0x1c3   :  { %8267 = vst [vmem:[#allocation19_spill] sm:$0xff] %v5610_v14 }
 0x1c4   :  { %v1269_v51 = vpop.permute.xlu0 %1268  ;;  %v1267_v59 = vpop.permute.xlu1 %1266 }
 0x1c5   :  { %v1274_v1 = vsel %vm1272_vm1, %v1267_v59, %v1269_v51  ;;  %v1275_v2 = vsel %vm1272_vm1, %v1265_v56, %v1267_v59  ;;  %v5626_v59 = vsub.f32 %v5581_v36, %v3181_v3 }
 0x1c6   :  { %v1302_v5 = vsel %vm54_vm0, %v1275_v2, %v1294_v47  ;;  %v1303_v9 = vsel %vm54_vm0, %v1274_v1, %v1295_v49  ;;  %1661 = vrot.lane.b32.xlu0 %v5339_v18, %s5063_s29  ;;  %1663 = vrot.lane.b32.xlu1 %v5343_v22, %s5063_s29 }
 0x1c7   :  { %v1314_v26 = vsel %vm1310_vm2, %v1302_v5, 0.0  ;;  %v1315_v28 = vsel %vm1311_vm5, %v1303_v9, 0.0  ;;  %8269 = vst [vmem:[#allocation21_spill] sm:$0xff] %v5626_v59 }
 0x1c8   :  { %v2089_v50 = vand.u32 4294901760, %v1315_v28  ;;  %v2091_v38 = vand.u32 4294901760, %v1314_v26  ;;  %v1336_v43 = vpop.permute.xlu0 %1335  ;;  %v1271_v47 = vpop.permute.xlu1 %1270 }
 0x1c9   :  { %v1273_v54 = vsel %vm1272_vm1, %v1269_v51, %v1271_v47  ;;  %v1276_v49 = vsel %vm1272_vm1, %v1271_v47, %v1265_v56  ;;  %vm1388_vm1 = vcmp.lt.s32.totalorder %v5416_v32, 32 }
 0x1ca   :  { %v1304_v20 = vsel %vm54_vm0, %v1273_v54, %v1296_v53  ;;  %v1305_v60 = vsel %vm54_vm0, %v1276_v49, %v1297_v57  ;;  %1776 = vrot.lane.b32.xlu0 %v5337_v15, %s5064_s30  ;;  %1778 = vrot.lane.b32.xlu1 %v5347_v23, %s5064_s30  ;;  %v5637_v36 = vpack.c.bf16 %v2089_v50, %v2085_v37  ;;  %v5655_v37 = vsel %vm54_vm0, %v5337_v15, 0.0 }
 0x1cb   :  { %v1316_v51 = vsel %vm1312_vm7, %v1304_v20, 0.0  ;;  %v1317_v56 = vsel %vm1313_vm8, %v1305_v60, 0.0  ;;  %v5639_v1 = vpack.c.bf16 %v2091_v38, %v2087_v39  ;;  %v5641_v2 = vsub.f32 %v1315_v28, %v2089_v50 }
 0x1cc   :  { %8270 = vst [vmem:[#allocation22_spill] sm:$0xff] %v5637_v36  ;;  %v5643_v4 = vsub.f32 %v1314_v26, %v2091_v38  ;;  %v3185_v5 = vand.u32 4294901760, %v1317_v56  ;;  %v3187_v46 = vand.u32 4294901760, %v1316_v51  ;;  %v1340_v9 = vpop.permute.xlu0 %1339  ;;  %v1338_v53 = vpop.permute.xlu1 %1337  ;;  %v5657_v39 = vpack.c.bf16 %v2252_v7, %v2240_v17 }
 0x1cd   :  { %8271 = vst [vmem:[#allocation23_spill] sm:$0xff] %v5639_v1  ;;  %8272 = vst [vmem:[#allocation24_spill] sm:$0xff] %v5641_v2  ;;  %v5647_v33 = vsel %vm1343_vm9, %v1338_v53, %v1340_v9  ;;  %v5651_v34 = vsel %vm1343_vm9, %v1336_v43, %v1338_v53  ;;  %v5664_v28 = vsel %vm54_vm0, %v5347_v23, 0.0  ;;  %v8025_v57 = vand.u32 4294901760, %v5626_v59 }
 0x1ce   :  { %8273 = vst [vmem:[#allocation25_spill] sm:$0xff] %v5643_v4  ;;  %8274 = vst [vmem:[#allocation26_spill] sm:$0xff] %v5657_v39  ;;  %v5659_v26 = vsub.f32 %v1316_v51, %v3187_v46  ;;  %1780 = vrot.lane.b32.xlu0 %v5339_v18, %s5064_s30  ;;  %v8028_v50 = vand.u32 4294901760, %v5610_v14  ;;  %v5668_v38 = vsub.f32 %v1317_v56, %v3185_v5  ;;  %1782 = vrot.lane.b32.xlu1 %v5343_v22, %s5064_s30 }
 0x1cf   :  { %v5671_v47 = vpack.c.bf16 %v3185_v5, %v3181_v3  ;;  %v5675_v54 = vpack.c.bf16 %v3187_v46, %v3183_v41  ;;  %v2257_v49 = vsub.f32 %v5606_v12, %v8026_v27  ;;  %v8030_v7 = vand.u32 4294901760, %v5643_v4 }
 0x1d0   :  { %8275 = vst [vmem:[#allocation27_spill] sm:$0xff] %v5659_v26  ;;  %8276 = vst [vmem:[#allocation28_spill] sm:$0xff] %v5668_v38  ;;  %v8034_v20 = vand.u32 4294901760, %v5659_v26  ;;  %v1394_v60 = vpop.permute.xlu0 %1393  ;;  %v1342_v17 = vpop.permute.xlu1 %1341  ;;  %v2268_v51 = vand.u32 4294901760, %v5641_v2  ;;  %v8031_v56 = vand.u32 4294901760, %v5615_v19  ;;  %v5695_v5 = vsel %vm54_vm0, %v5339_v18, 0.0 }
 0x1d1   :  { %8277 = vst [vmem:[#allocation29_spill] sm:$0xff] %v5671_v47  ;;  %8278 = vst [vmem:[#allocation30_spill] sm:$0xff] %v5675_v54  ;;  %v5686_v3 = vsel %vm1343_vm9, %v1340_v9, %v1342_v17  ;;  %v5690_v55 = vsel %vm1343_vm9, %v1342_v17, %v1336_v43  ;;  %v5703_v53 = vsel %vm54_vm0, %v5343_v22, 0.0  ;;  %v2258_v43 = vand.u32 4294901760, %v2257_v49 }
 0x1d2   :  { %1821 = vrot.lane.b32.xlu0 %v5337_v15, %s5065_s7  ;;  %1823 = vrot.lane.b32.xlu1 %v5347_v23, %s5065_s7  ;;  %v2269_v17 = vsub.f32 %v5641_v2, %v2268_v51  ;;  %v3353_v63 = vsub.f32 %v5626_v59, %v8025_v57  ;;  %v3364_v35 = vand.u32 4294901760, %v5668_v38  ;;  %v2263_v46 = vsub.f32 %v5610_v14, %v8028_v50 }
 0x1d3   :  { %v2275_v9 = vsub.f32 %v5643_v4, %v8030_v7  ;;  %v3359_v49 = vsub.f32 %v5615_v19, %v8031_v56  ;;  %v3371_v57 = vsub.f32 %v5659_v26, %v8034_v20  ;;  %v1365_v20 = vld [vmem:[#allocation3 + $0x88] sm:$0xff]  ;;  %v8293_v7 = vand.u32 4294901760, %v5610_v14 }
 0x1d4   :  { %v1398_v8 = vpop.permute.xlu0 %1397  ;;  %v1396_v41 = vpop.permute.xlu1 %1395  ;;  %v2270_v50 = vand.u32 4294901760, %v2269_v17  ;;  %v3365_v42 = vsub.f32 %v5668_v38, %v3364_v35  ;;  %v2264_v61 = vand.u32 4294901760, %v2263_v46  ;;  %vm1369_vm12 = vcmp.ne.f32.partialorder %v1365_v20, 0.0 }
 0x1d5   :  { %v5725_v27 = vsel %vm1401_vm10, %v1396_v41, %v1398_v8  ;;  %v5729_v16 = vsel %vm1401_vm10, %v1394_v60, %v1396_v41  ;;  %v2276_v10 = vand.u32 4294901760, %v2275_v9  ;;  %v3354_v41 = vand.u32 4294901760, %v3353_v63 }
 0x1d6   :  { %1825 = vrot.lane.b32.xlu0 %v5339_v18, %s5065_s7  ;;  %1827 = vrot.lane.b32.xlu1 %v5343_v22, %s5065_s7  ;;  %v5737_v44 = vpack.c.bf16 %v2270_v50, %v2258_v43  ;;  %v3366_v0 = vand.u32 4294901760, %v3365_v42  ;;  %v3360_v13 = vand.u32 4294901760, %v3359_v49  ;;  %v3372_v48 = vand.u32 4294901760, %v3371_v57  ;;  %v1364_v57 = vld [vmem:[#allocation3 + $0x80] sm:$0xff]  ;;  %v1366_v49 = vld [vmem:[#allocation3 + $0x90] sm:$0xff] }
 0x1d7   :  { %v5739_v39 = vpack.c.bf16 %v2276_v10, %v2264_v61  ;;  %v1352_v63 = vrot.slane %v5690_v55, 4  ;;  %v8287_v55 = vand.u32 4294901760, %v5543_v21  ;;  %vm1368_vm13 = vcmp.ne.f32.partialorder %v1364_v57, 0.0 }
 0x1d8   :  { %8279 = vst [vmem:[#allocation31_spill] sm:$0xff] %v5737_v44  ;;  %v1323_v17 = vpop.permute.xlu0 %1322  ;;  %v1400_v11 = vpop.permute.xlu1 %1399  ;;  %v5751_v50 = vpack.c.bf16 %v3366_v0, %v3354_v41  ;;  %v5756_v10 = vpack.c.bf16 %v3372_v48, %v3360_v13  ;;  %v8283_v48 = vand.u32 4294901760, %v5473_v29  ;;  %v8284_v13 = vand.u32 4294901760, %v5505_v40  ;;  %v5979_v44 = vld [vmem:[#allocation3 + $0xf0] sm:$0xff] }
 0x1d9   :  { %8280 = vst [vmem:[#allocation32_spill] sm:$0xff] %v5739_v39  ;;  %v5745_v46 = vsel %vm1401_vm10, %v1398_v8, %v1400_v11  ;;  %v5749_v9 = vsel %vm1401_vm10, %v1400_v11, %v1394_v60  ;;  %v1353_v8 = vrot.slane %v5651_v34, 4  ;;  %v8286_v34 = vand.u32 4294901760, %v5529_v6 }
 0x1da   :  { %8281 = vst [vmem:[#allocation33_spill] sm:$0xff] %v5751_v50  ;;  %8282 = vst [vmem:[#allocation34_spill] sm:$0xff] %v5756_v10  ;;  %v5770_v41 = vpack.c.bf16 %v8284_v13, %v8283_v48  ;;  %v8289_v0 = vand.u32 4294901760, %v5606_v12  ;;  %v8291_v11 = vand.u32 4294901760, %v5626_v59  ;;  %v1367_v13 = vld [vmem:[#allocation3 + $0x98] sm:$0xff]  ;;  %vm1370_vm14 = vcmp.ne.f32.partialorder %v1366_v49, 0.0 }
 0x1db   :  { %v5776_v42 = vpack.c.bf16 %v8287_v55, %v8286_v34  ;;  %v8294_v34 = vand.u32 4294901760, %v5643_v4  ;;  %vm1371_vm15 = vcmp.ne.f32.partialorder %v1367_v13, 0.0  ;;  %vm1504_vm9 = vcmp.lt.s32.totalorder %v5416_v32, 98  ;;  %v1940_v4 = vld [vmem:[%s8020_s2 + $0x8] sm:$0xff]  ;;  %v5981_v50 = vld [vmem:[#allocation3 + $0xf8] sm:$0xff] }
 0x1dc   :  { %v1327_v60 = vpop.permute.xlu0 %1326  ;;  %v1325_v43 = vpop.permute.xlu1 %1324  ;;  %8285 = vst [vmem:[#allocation35_spill] sm:$0xff] %v5770_v41  ;;  %v5780_v56 = vpack.c.bf16 %v2268_v51, %v8289_v0  ;;  %v5784_v61 = vpack.c.bf16 %v3364_v35, %v8291_v11  ;;  %v8296_v51 = vand.u32 4294901760, %v5615_v19  ;;  %v8297_v0 = vand.u32 4294901760, %v5659_v26  ;;  %v5809_v41 = vld [vmem:[#allocation3 + $0x28] sm:$0xff] }
 0x1dd   :  { %8288 = vst [vmem:[#allocation36_spill] sm:$0xff] %v5776_v42  ;;  %v1332_v62 = vsel %vm1330_vm11, %v1325_v43, %v1327_v60  ;;  %v1333_v48 = vsel %vm1330_vm11, %v1323_v17, %v1325_v43  ;;  %v5794_v55 = vpack.c.bf16 %v8294_v34, %v8293_v7  ;;  %v8044_v42 = vmov 1.0   ;;  %v1423_v34 = vld [vmem:[#allocation3 + $0xa8] sm:$0xff] }
 0x1de   :  { %8290 = vst [vmem:[#allocation37_spill] sm:$0xff] %v5780_v56  ;;  %8292 = vst [vmem:[#allocation38_spill] sm:$0xff] %v5784_v61  ;;  %v5800_v56 = vpack.c.bf16 %v8297_v0, %v8296_v51  ;;  %v1360_v35 = vsel %vm54_vm0, %v1333_v48, %v1352_v63  ;;  %v1361_v11 = vsel %vm54_vm0, %v1332_v62, %v1353_v8  ;;  %v8299_v43 = vand.u32 4294901760, %v5664_v28  ;;  %v1424_v51 = vld [vmem:[#allocation3 + $0xb0] sm:$0xff] }
 0x1df   :  { %8295 = vst [vmem:[#allocation39_spill] sm:$0xff] %v5794_v55  ;;  %v5812_v7 = vsel %vm1369_vm12, %v1361_v11, 0.0  ;;  %v8301_v0 = vand.u32 4294901760, %v5703_v53  ;;  %v1354_v48 = vrot.slane %v5647_v33, 4  ;;  %v1422_v55 = vld [vmem:[#allocation3 + $0xa0] sm:$0xff]  ;;  %v5828_v14 = vsel %vm1368_vm13, %v1360_v35, 0.0 }
 0x1e0   :  { %8298 = vst [vmem:[#allocation40_spill] sm:$0xff] %v5800_v56  ;;  %v5807_v61 = vpack.c.bf16 %v8044_v42, %v8299_v43  ;;  %v8303_v62 = vmov %v8299_v43  ;;  %v1355_v43 = vrot.slane %v5686_v3, 4  ;;  %v1381_v20 = vpop.permute.xlu0 %1380  ;;  %v1329_v11 = vpop.permute.xlu1 %1328  ;;  %v1425_v56 = vld [vmem:[#allocation3 + $0xb8] sm:$0xff]  ;;  %vm1208_vm2 = vcmp.ne.f32.partialorder %v5809_v41, 0.0 }
 0x1e1   :  { %v5817_v63 = vpack.c.bf16 %v8044_v42, %v8301_v0  ;;  %v5822_v8 = vsub.f32 %v5664_v28, %v8303_v62  ;;  %v2093_v0 = vand.u32 4294901760, %v5812_v7  ;;  %v1331_v28 = vsel %vm1330_vm11, %v1327_v60, %v1329_v11 }
 0x1e2   :  { %8300 = vst [vmem:[#allocation41_spill] sm:$0xff] %v5807_v61  ;;  %v1334_v33 = vsel %vm1330_vm11, %v1329_v11, %v1323_v17  ;;  %v1362_v3 = vsel %vm54_vm0, %v1331_v28, %v1354_v48  ;;  %vm1427_vm4 = vcmp.ne.f32.partialorder %v1423_v34, 0.0  ;;  %vm1428_vm5 = vcmp.ne.f32.partialorder %v1424_v51, 0.0  ;;  %v5872_v51 = vld [vmem:[#allocation3 + $0xc8] sm:$0xff] }
 0x1e3   :  { %8302 = vst [vmem:[#allocation42_spill] sm:$0xff] %v5817_v63  ;;  %8304 = vst [vmem:[#allocation43_spill] sm:$0xff] %v5822_v8  ;;  %v1363_v13 = vsel %vm54_vm0, %v1334_v33, %v1355_v43  ;;  %v1374_v57 = vsel %vm1370_vm14, %v1362_v3, 0.0  ;;  %vm1426_vm7 = vcmp.ne.f32.partialorder %v1422_v55, 0.0  ;;  %vm1429_vm8 = vcmp.ne.f32.partialorder %v1425_v56, 0.0 }
 0x1e4   :  { %v5839_v35 = vsel %vm1371_vm15, %v1363_v13, 0.0  ;;  %v1411_v62 = vrot.slane %v5729_v16, 4  ;;  %v1412_v60 = vrot.slane %v5725_v27, 4  ;;  %v2095_v17 = vand.u32 4294901760, %v5828_v14  ;;  %v1385_v11 = vpop.permute.xlu0 %1384  ;;  %v1383_v42 = vpop.permute.xlu1 %1382 }
 0x1e5   :  { %v1410_v48 = vrot.slane %v5749_v9, 4  ;;  %v5847_v43 = vsub.f32 %v5812_v7, %v2093_v0  ;;  %v1390_v49 = vsel %vm1388_vm1, %v1383_v42, %v1385_v11  ;;  %v1391_v28 = vsel %vm1388_vm1, %v1381_v20, %v1383_v42 }
 0x1e6   :  { %v3189_v16 = vand.u32 4294901760, %v5839_v35  ;;  %v3191_v27 = vand.u32 4294901760, %v1374_v57  ;;  %v1419_v33 = vsel %vm54_vm0, %v1391_v28, %v1411_v62  ;;  %v1420_v3 = vsel %vm54_vm0, %v1390_v49, %v1412_v60 }
 0x1e7   :  { %8305 = vst [vmem:[#allocation44_spill] sm:$0xff] %v5847_v43  ;;  %v1413_v13 = vrot.slane %v5745_v46, 4  ;;  %v1431_v9 = vsel %vm1427_vm4, %v1419_v33, 0.0  ;;  %v1432_v7 = vsel %vm1428_vm5, %v1420_v3, 0.0  ;;  %vm2067_vm10 = vcmask 261120  }
 0x1e8   :  { %v5863_v42 = vsub.f32 %v5828_v14, %v2095_v17  ;;  %v2097_v19 = vand.u32 4294901760, %v1431_v9  ;;  %v3195_v26 = vand.u32 4294901760, %v1432_v7  ;;  %v5865_v12 = vpop.permute.xlu0 %1496  ;;  %v1387_v62 = vpop.permute.xlu1 %1386  ;;  %v2069_v60 = vsel %vm2067_vm10, %v1940_v4, 0 }
 0x1e9   :  { %v1389_v46 = vsel %vm1388_vm1, %v1385_v11, %v1387_v62  ;;  %v1392_v34 = vsel %vm1388_vm1, %v1387_v62, %v1381_v20  ;;  %v5874_v49 = vand.u32 4294901760, %v2069_v60  ;;  %v5878_v28 = vsub.f32 %v5839_v35, %v3189_v16  ;;  %v5885_v11 = vld [vmem:[#allocation3 + $0xd0] sm:$0xff] }
 0x1ea   :  { %8306 = vst [vmem:[#allocation45_spill] sm:$0xff] %v5863_v42  ;;  %v5880_v33 = vsub.f32 %v1374_v57, %v3191_v27  ;;  %v1418_v3 = vsel %vm54_vm0, %v1392_v34, %v1410_v48  ;;  %v1421_v4 = vsel %vm54_vm0, %v1389_v46, %v1413_v13  ;;  %vm1446_vm11 = vcmp.lt.s32.totalorder %v5416_v32, 2 }
 0x1eb   :  { %8307 = vst [vmem:[#allocation46_spill] sm:$0xff] %v5874_v49  ;;  %8308 = vst [vmem:[#allocation47_spill] sm:$0xff] %v5878_v28  ;;  %v1430_v20 = vsel %vm1426_vm7, %v1418_v3, 0.0  ;;  %v1433_v62 = vsel %vm1429_vm8, %v1421_v4, 0.0  ;;  %v5889_v2 = vpack.c.bf16 %v2097_v19, %v2093_v0  ;;  %v5891_v14 = vpack.c.bf16 %v3195_v26, %v3191_v27 }
 0x1ec   :  { %8309 = vst [vmem:[#allocation48_spill] sm:$0xff] %v5880_v33  ;;  %v5893_v35 = vsub.f32 %v1431_v9, %v2097_v19  ;;  %v2099_v57 = vand.u32 4294901760, %v1430_v20  ;;  %v3193_v6 = vand.u32 4294901760, %v1433_v62  ;;  %v1501_v21 = vpop.permute.xlu0 %1500  ;;  %v1499_v48 = vpop.permute.xlu1 %1498  ;;  %vm1472_vm12 = vcmp.ne.f32.partialorder %v5872_v51, 0.0 }
 0x1ed   :  { %8310 = vst [vmem:[#allocation49_spill] sm:$0xff] %v5889_v2  ;;  %8311 = vst [vmem:[#allocation50_spill] sm:$0xff] %v5891_v14  ;;  %v5897_v13 = vsub.f32 %v2069_v60, %v5874_v49  ;;  %v5902_v56 = vsel %vm1208_vm2, %v5476_v30, 0.0  ;;  %v5907_v19 = vsel %vm1504_vm9, %v1499_v48, %v1501_v21  ;;  %v5912_v0 = vsel %vm1504_vm9, %v5865_v12, %v1499_v48  ;;  %v5921_v30 = vld [vmem:[#allocation3 + $0xc0] sm:$0xff]  ;;  %v5923_v60 = vld [vmem:[#allocation3 + $0xd8] sm:$0xff] }
 0x1ee   :  { %8312 = vst [vmem:[#allocation51_spill] sm:$0xff] %v5893_v35  ;;  %vm1473_vm13 = vcmp.ne.f32.partialorder %v5885_v11, 0.0  ;;  %v5915_v27 = vsub.f32 %v1432_v7, %v3195_v26  ;;  %v5917_v9 = vsub.f32 %v1430_v20, %v2099_v57  ;;  %v5919_v41 = vsub.f32 %v1433_v62, %v3193_v6 }
 0x1ef   :  { %8313 = vst [vmem:[#allocation52_spill] sm:$0xff] %v5897_v13  ;;  %v8317_v46 = vand.u32 4294901760, %v5847_v43  ;;  %v5929_v4 = vpack.c.bf16 %v3193_v6, %v3189_v16  ;;  %v5931_v48 = vpack.c.bf16 %v2099_v57, %v2095_v17  ;;  %v5934_v26 = vand.u32 4294901760, %v5897_v13  ;;  %v5946_v6 = vld [vmem:[#allocation3 + $0xe0] sm:$0xff]  ;;  %v5948_v17 = vld [vmem:[#allocation3 + $0xe8] sm:$0xff] }
 0x1f0   :  { %8314 = vst [vmem:[#allocation53_spill] sm:$0xff] %v5915_v27  ;;  %8315 = vst [vmem:[#allocation54_spill] sm:$0xff] %v5917_v9  ;;  %v1439_v20 = vpop.permute.xlu0 %1438  ;;  %v1503_v62 = vpop.permute.xlu1 %1502  ;;  %v8063_v55 = vand.u32 4294901760, %v5893_v35  ;;  %v8064_v59 = vand.u32 4294901760, %v5878_v28  ;;  %vm1471_vm14 = vcmp.ne.f32.partialorder %v5921_v30, 0.0  ;;  %vm1474_vm15 = vcmp.ne.f32.partialorder %v5923_v60, 0.0 }
 0x1f1   :  { %8316 = vst [vmem:[#allocation55_spill] sm:$0xff] %v5919_v41  ;;  %v2281_v34 = vsub.f32 %v5847_v43, %v8317_v46  ;;  %8318 = vst [vmem:[#allocation56_spill] sm:$0xff] %v5929_v4  ;;  %v5942_v46 = vsel %vm1504_vm9, %v1501_v21, %v1503_v62  ;;  %v2184_v16 = vsub.f32 %v5897_v13, %v5934_v26  ;;  %vm1491_vm1 = vcmp.lt.s32.totalorder %v5416_v32, 126 }
 0x1f2   :  { %8319 = vst [vmem:[#allocation57_spill] sm:$0xff] %v5931_v48  ;;  %8320 = vst [vmem:[#allocation58_spill] sm:$0xff] %v5934_v26  ;;  %v2293_v21 = vsub.f32 %v5893_v35, %v8063_v55  ;;  %v3377_v7 = vsub.f32 %v5878_v28, %v8064_v59  ;;  %v8321_v40 = vand.u32 4294901760, %v5919_v41  ;;  %v8322_v57 = vand.u32 4294901760, %v5863_v42 }
 0x1f3   :  { %v2185_v38 = vand.u32 4294901760, %v2184_v16  ;;  %v2282_v29 = vand.u32 4294901760, %v2281_v34  ;;  %vm1529_vm2 = vcmp.ne.f32.partialorder %v5946_v6, 0.0  ;;  %vm1530_vm4 = vcmp.ne.f32.partialorder %v5948_v17, 0.0 }
 0x1f4   :  { %v3389_v26 = vsub.f32 %v5919_v41, %v8321_v40  ;;  %v2287_v3 = vsub.f32 %v5863_v42, %v8322_v57  ;;  %v1443_v13 = vpop.permute.xlu0 %1442  ;;  %v1441_v49 = vpop.permute.xlu1 %1440  ;;  %v2294_v55 = vand.u32 4294901760, %v2293_v21  ;;  %v3378_v39 = vand.u32 4294901760, %v3377_v7 }
 0x1f5   :  { %v8323_v59 = vand.u32 4294901760, %v5917_v9  ;;  %v8324_v16 = vand.u32 4294901760, %v5880_v33  ;;  %v1448_v10 = vsel %vm1446_vm11, %v1441_v49, %v1443_v13  ;;  %v1449_v57 = vsel %vm1446_vm11, %v1439_v20, %v1441_v49  ;;  %2186 = vmatprep.mubr.f32.mxu0 %v2185_v38  ;;  %3282 = vmatprep.mubr.f32.mxu1 %v2185_v38 }
 0x1f6   :  { %v3390_v7 = vand.u32 4294901760, %v3389_v26  ;;  %v2288_v21 = vand.u32 4294901760, %v2287_v3  ;;  %v5989_v48 = vpack.c.bf16 %v2294_v55, %v2282_v29  ;;  %v1513_v49 = vrot.slane %v5912_v0, 4  ;;  %v5997_v3 = vld [vmem:[#allocation3 + $0x30] sm:$0xff] }
 0x1f7   :  { %v2299_v34 = vsub.f32 %v5917_v9, %v8323_v59  ;;  %v3383_v40 = vsub.f32 %v5880_v33, %v8324_v16  ;;  %v8325_v59 = vrot.slane %v5347_v23, 4  ;;  %v8326_v16 = vrot.slane %v5339_v18, 4 }
 0x1f8   :  { %8327 = vst [vmem:[#allocation59_spill] sm:$0xff] %v5989_v48  ;;  %v1514_v2 = vrot.slane %v5907_v19, 4  ;;  %v5995_v26 = vpack.c.bf16 %v3390_v7, %v3378_v39  ;;  %v1445_v29 = vpop.permute.xlu1 %1444  ;;  %vm1531_vm5 = vcmp.ne.f32.partialorder %v5979_v44, 0.0  ;;  %vm1532_vm7 = vcmp.ne.f32.partialorder %v5981_v50, 0.0 }
 0x1f9   :  { %v1464_v61 = vsel %vm54_vm0, %v1449_v57, %v8325_v59  ;;  %v1465_v63 = vsel %vm54_vm0, %v1448_v10, %v8326_v16  ;;  %v2300_v14 = vand.u32 4294901760, %v2299_v34  ;;  %v1484_v10 = vpop.permute.xlu0 %1483  ;;  %v8330_v51 = vand.u32 4294901760, %v5915_v27 }
 0x1fa   :  { %v1476_v38 = vsel %vm1472_vm12, %v1464_v61, 0.0  ;;  %8328 = vst [vmem:[#allocation60_spill] sm:$0xff] %v5995_v26  ;;  %v6001_v57 = vsel %vm1473_vm13, %v1465_v63, 0.0  ;;  %v1447_v61 = vsel %vm1446_vm11, %v1443_v13, %v1445_v29  ;;  %v1450_v63 = vsel %vm1446_vm11, %v1445_v29, %v1439_v20 }
 0x1fb   :  { %v2101_v59 = vand.u32 4294901760, %v1476_v38  ;;  %v6005_v55 = vpack.c.bf16 %v2300_v14, %v2288_v21  ;;  %v3395_v39 = vsub.f32 %v5915_v27, %v8330_v51  ;;  %v1508_v14 = vsel %vm1504_vm9, %v1503_v62, %v5865_v12 }
 0x1fc   :  { %v8331_v0 = vrot.slane %v5337_v15, 4  ;;  %v8332_v7 = vrot.slane %v5343_v22, 4  ;;  %v3384_v21 = vand.u32 4294901760, %v3383_v40  ;;  %vm1209_vm8 = vcmp.ne.f32.partialorder %v5997_v3, 0.0  ;;  %v1486_v40 = vpop.permute.xlu1 %1485 }
 0x1fd   :  { %8329 = vst [vmem:[#allocation61_spill] sm:$0xff] %v6005_v55  ;;  %v3396_v29 = vand.u32 4294901760, %v3395_v39  ;;  %v6034_v62 = vsub.f32 %v1476_v38, %v2101_v59  ;;  %v3199_v51 = vand.u32 4294901760, %v6001_v57  ;;  %v1494_v30 = vsel %vm1491_vm1, %v1484_v10, %v1486_v40 }
 0x1fe   :  { %v1463_v34 = vsel %vm54_vm0, %v1450_v63, %v8331_v0  ;;  %v1466_v13 = vsel %vm54_vm0, %v1447_v61, %v8332_v7  ;;  %v1488_v61 = vpop.permute.xlu0 %1487  ;;  %v1515_v11 = vrot.slane %v5942_v46, 4  ;;  %v1516_v19 = vrot.slane %v1508_v14, 4 }
 0x1ff   :  { %v1475_v20 = vsel %vm1471_vm14, %v1463_v34, 0.0  ;;  %v1478_v16 = vsel %vm1474_vm15, %v1466_v13, 0.0  ;;  %8333 = vst [vmem:[#allocation62_spill] sm:$0xff] %v6034_v62  ;;  %v1493_v7 = vsel %vm1491_vm1, %v1486_v40, %v1488_v61  ;;  %v6041_v60 = vpack.c.bf16 %v3396_v29, %v3384_v21 }
 0x200   :  { %v2103_v63 = vand.u32 4294901760, %v1475_v20  ;;  %v3197_v0 = vand.u32 4294901760, %v1478_v16  ;;  %v1521_v13 = vsel %vm54_vm0, %v1494_v30, %v1513_v49  ;;  %v1522_v12 = vsel %vm54_vm0, %v1493_v7, %v1514_v2  ;;  %v1490_v39 = vpop.permute.xlu1 %1489 }
 0x201   :  { %8334 = vst [vmem:[#allocation63_spill] sm:$0xff] %v6041_v60  ;;  %v1533_v55 = vsel %vm1529_vm2, %v1521_v13, 0.0  ;;  %v1534_v21 = vsel %vm1530_vm4, %v1522_v12, 0.0  ;;  %v6057_v29 = vsub.f32 %v6001_v57, %v3199_v51  ;;  %v8070_v49 = vand.u32 4294901760, %v6034_v62 }
 0x202   :  { %v6045_v34 = vsub.f32 %v1475_v20, %v2103_v63  ;;  %v6047_v38 = vsub.f32 %v1478_v16, %v3197_v0  ;;  %v2105_v20 = vand.u32 4294901760, %v1534_v21  ;;  %v2107_v40 = vand.u32 4294901760, %v1533_v55  ;;  %v6059_v16 = vpop.permute.xlu0 %1554 }
 0x203   :  { %8337 = vst [vmem:[#allocation66_spill] sm:$0xff] %v6057_v29  ;;  %v1492_v46 = vsel %vm1491_vm1, %v1488_v61, %v1490_v39  ;;  %v1495_v6 = vsel %vm1491_vm1, %v1490_v39, %v1484_v10  ;;  %v2305_v50 = vsub.f32 %v6034_v62, %v8070_v49  ;;  %v8355_v26 = vand.u32 4294901760, %v5655_v37 }
 0x204   :  { %8335 = vst [vmem:[#allocation64_spill] sm:$0xff] %v6045_v34  ;;  %8336 = vst [vmem:[#allocation65_spill] sm:$0xff] %v6047_v38  ;;  %v6068_v14 = vsub.f32 %v1534_v21, %v2105_v20  ;;  %v6070_v57 = vsub.f32 %v1533_v55, %v2107_v40  ;;  %v1523_v12 = vsel %vm54_vm0, %v1492_v46, %v1515_v11  ;;  %v6085_v17 = vpop.permute.xlu1 %1556  ;;  %vm1562_vm9 = vcmp.lt.s32.totalorder %v5416_v32, 94 }
 0x205   :  { %v1524_v7 = vsel %vm54_vm0, %v1495_v6, %v1516_v19  ;;  %v1535_v30 = vsel %vm1531_vm5, %v1523_v12, 0.0  ;;  %v6078_v61 = vpack.c.bf16 %v2105_v20, %v2101_v59  ;;  %v6080_v2 = vpack.c.bf16 %v2107_v40, %v2103_v63 }
 0x206   :  { %8338 = vst [vmem:[#allocation67_spill] sm:$0xff] %v6068_v14  ;;  %8339 = vst [vmem:[#allocation68_spill] sm:$0xff] %v6070_v57  ;;  %v1536_v13 = vsel %vm1532_vm7, %v1524_v7, 0.0  ;;  %v8073_v10 = vand.u32 4294901760, %v6070_v57  ;;  %v3203_v21 = vand.u32 4294901760, %v1535_v30  ;;  %v6083_v55 = vpop.permute.xlu0 %1558  ;;  %v8071_v11 = vand.u32 4294901760, %v6068_v14 }
 0x207   :  { %8340 = vst [vmem:[#allocation69_spill] sm:$0xff] %v6078_v61  ;;  %8341 = vst [vmem:[#allocation70_spill] sm:$0xff] %v6080_v2  ;;  %v3201_v39 = vand.u32 4294901760, %v1536_v13  ;;  %v8342_v59 = vand.u32 4294901760, %v5703_v53  ;;  %v8344_v63 = vand.u32 4294901760, %v5695_v5  ;;  %v6105_v40 = vsel %vm1209_vm8, %v5479_v31, 0.0 }
 0x208   :  { %v6109_v6 = vsub.f32 %v1535_v30, %v3203_v21  ;;  %v8348_v12 = vand.u32 4294901760, %v6045_v34  ;;  %v6121_v49 = vpack.c.bf16 %v3203_v21, %v3199_v51  ;;  %v2317_v31 = vsub.f32 %v6068_v14, %v8071_v11 }
 0x209   :  { %v6095_v19 = vsub.f32 %v5703_v53, %v8342_v59  ;;  %v6100_v20 = vsub.f32 %v5695_v5, %v8344_v63  ;;  %v6107_v46 = vsub.f32 %v1536_v13, %v3201_v39  ;;  %v8349_v53 = vand.u32 4294901760, %v5902_v56  ;;  %v6129_v13 = vpop.permute.xlu1 %1560 }
 0x20a   :  { %8347 = vst [vmem:[#allocation74_spill] sm:$0xff] %v6109_v6  ;;  %v2311_v7 = vsub.f32 %v6045_v34, %v8348_v12  ;;  %v6119_v63 = vpack.c.bf16 %v3201_v39, %v3197_v0  ;;  %8352 = vst [vmem:[#allocation77_spill] sm:$0xff] %v6121_v49  ;;  %v6127_v30 = vpop.permute.xlu0 %1612  ;;  %v8353_v12 = vand.u32 4294901760, %v6047_v38  ;;  %v2323_v51 = vsub.f32 %v6070_v57, %v8073_v10  ;;  %v6218_v0 = vld [vmem:[#allocation3 + $0x110] sm:$0xff] }
 0x20b   :  { %8343 = vst [vmem:[#allocation71_spill] sm:$0xff] %v6095_v19  ;;  %8345 = vst [vmem:[#allocation72_spill] sm:$0xff] %v6100_v20  ;;  %v6117_v59 = vsub.f32 %v5902_v56, %v8349_v53  ;;  %v8075_v53 = vand.u32 4294901760, %v6107_v46  ;;  %v2306_v39 = vand.u32 4294901760, %v2305_v50  ;;  %v2318_v21 = vand.u32 4294901760, %v2317_v31 }
 0x20c   :  { %8346 = vst [vmem:[#allocation73_spill] sm:$0xff] %v6107_v46  ;;  %8351 = vst [vmem:[#allocation76_spill] sm:$0xff] %v6119_v63  ;;  %v3401_v44 = vsub.f32 %v6047_v38, %v8353_v12  ;;  %v8354_v11 = vand.u32 4294901760, %v6057_v29  ;;  %v2312_v48 = vand.u32 4294901760, %v2311_v7  ;;  %v2324_v12 = vand.u32 4294901760, %v2323_v51 }
 0x20d   :  { %8350 = vst [vmem:[#allocation75_spill] sm:$0xff] %v6117_v59  ;;  %v3413_v60 = vsub.f32 %v6107_v46, %v8075_v53  ;;  %v6148_v2 = vsub.f32 %v5655_v37, %v8355_v26  ;;  %v6150_v10 = vpack.c.bf16 %v2318_v21, %v2306_v39  ;;  %v8358_v50 = vand.u32 4294901760, %v6109_v6  ;;  %v6159_v53 = vpop.permute.xlu1 %1614 }
 0x20e   :  { %v3407_v3 = vsub.f32 %v6057_v29, %v8354_v11  ;;  %v6157_v49 = vpop.permute.xlu0 %1616  ;;  %v3402_v51 = vand.u32 4294901760, %v3401_v44  ;;  %v6162_v26 = vpack.c.bf16 %v2324_v12, %v2312_v48  ;;  %v8360_v39 = vand.u32 4294901760, %v6105_v40  ;;  %v1939_v48 = vld [vmem:[%s8020_s2] sm:$0xff] }
 0x20f   :  { %8356 = vst [vmem:[#allocation78_spill] sm:$0xff] %v6148_v2  ;;  %8357 = vst [vmem:[#allocation79_spill] sm:$0xff] %v6150_v10  ;;  %v3419_v31 = vsub.f32 %v6109_v6, %v8358_v50  ;;  %v3414_v61 = vand.u32 4294901760, %v3413_v60  ;;  %v8362_v11 = vand.u32 4294901760, %v5655_v37  ;;  %v8363_v63 = vmov 1.0   ;;  %v6187_v12 = vld [vmem:[#allocation3 + $0x100] sm:$0xff] }
 0x210   :  { %8359 = vst [vmem:[#allocation80_spill] sm:$0xff] %v6162_v26  ;;  %v6167_v21 = vsub.f32 %v6105_v40, %v8360_v39  ;;  %v3408_v50 = vand.u32 4294901760, %v3407_v3  ;;  %v8365_v7 = vand.u32 4294901760, %v5695_v5  ;;  %v6189_v37 = vld [vmem:[#allocation3 + $0x108] sm:$0xff]  ;;  %v8369_v5 = vand.u32 4294901760, %v5822_v8 }
 0x211   :  { %v3420_v10 = vand.u32 4294901760, %v3419_v31  ;;  %v6173_v23 = vpack.c.bf16 %v8363_v63, %v8362_v11  ;;  %v6183_v44 = vpack.c.bf16 %v3414_v61, %v3402_v51  ;;  %v8371_v11 = vand.u32 4294901760, %v6095_v19  ;;  %v6203_v51 = vpop.permute.xlu1 %1618 }
 0x212   :  { %8361 = vst [vmem:[#allocation81_spill] sm:$0xff] %v6167_v21  ;;  %v6178_v60 = vpack.c.bf16 %v8363_v63, %v8365_v7  ;;  %v6196_v63 = vsub.f32 %v5822_v8, %v8369_v5  ;;  %v1542_v7 = vpop.permute.xlu0 %1541  ;;  %v8373_v39 = vand.u32 4294901760, %v6117_v59  ;;  %vm1620_vm11 = vcmp.lt.s32.totalorder %v5416_v32, 64 }
 0x213   :  { %8364 = vst [vmem:[#allocation82_spill] sm:$0xff] %v6173_v23  ;;  %8367 = vst [vmem:[#allocation84_spill] sm:$0xff] %v6183_v44  ;;  %v6191_v31 = vpack.c.bf16 %v3420_v10, %v3408_v50  ;;  %v6201_v61 = vsub.f32 %v6095_v19, %v8371_v11  ;;  %v6220_v8 = vand.u32 4294901760, %v1939_v48  ;;  %v8375_v10 = vand.u32 4294901760, %v6100_v20  ;;  %v6237_v50 = vld [vmem:[#allocation3 + $0x118] sm:$0xff]  ;;  %v6625_v44 = vld [vmem:[#allocation3 + $0x148] sm:$0xff] }
 0x214   :  { %8366 = vst [vmem:[#allocation83_spill] sm:$0xff] %v6178_v60  ;;  %8370 = vst [vmem:[#allocation86_spill] sm:$0xff] %v6196_v63  ;;  %v6208_v3 = vsub.f32 %v6117_v59, %v8373_v39  ;;  %v1942_v39 = vld [vmem:[%s8020_s2 + $0x18] sm:$0xff]  ;;  %v1565_v5 = vsel %vm1562_vm9, %v6059_v16, %v6085_v17  ;;  %vm1549_vm12 = vcmp.lt.s32.totalorder %v5416_v32, 96  ;;  %vm1587_vm13 = vcmp.ne.f32.partialorder %v6187_v12, 0.0 }
 0x215   :  { %8368 = vst [vmem:[#allocation85_spill] sm:$0xff] %v6191_v31  ;;  %8372 = vst [vmem:[#allocation87_spill] sm:$0xff] %v6201_v61  ;;  %v6228_v19 = vsub.f32 %v6100_v20, %v8375_v10  ;;  %vm1588_vm14 = vcmp.ne.f32.partialorder %v6189_v37, 0.0  ;;  %v1564_v11 = vsel %vm1562_vm9, %v6085_v17, %v6083_v55  ;;  %vm1607_vm15 = vcmp.lt.s32.totalorder %v5416_v32, 68  ;;  %v1544_v61 = vpop.permute.xlu1 %1543  ;;  %v1944_v17 = vld [vmem:[%s8020_s2 + $0x28] sm:$0xf] }
 0x216   :  { %8374 = vst [vmem:[#allocation88_spill] sm:$0xff] %v6220_v8  ;;  %v8377_v20 = vand.u32 4294901760, %v5847_v43  ;;  %v1546_v2 = vpop.permute.xlu0 %1545  ;;  %vm1589_vm1 = vcmp.ne.f32.partialorder %v6218_v0, 0.0  ;;  %v2072_v59 = vsel %vm2067_vm10, %v1942_v39, 0  ;;  %v8380_v10 = vand.u32 4294901760, %v5878_v28  ;;  %v6271_v39 = vld [vmem:[#allocation3 + $0x180] sm:$0xff] }
 0x217   :  { %8376 = vst [vmem:[#allocation89_spill] sm:$0xff] %v6228_v19  ;;  %v8378_v19 = vand.u32 4294901760, %v5893_v35  ;;  %v8381_v43 = vand.u32 4294901760, %v5919_v41  ;;  %v1571_v35 = vrot.slane %v1565_v5, 4  ;;  %vm1590_vm2 = vcmp.ne.f32.partialorder %v6237_v50, 0.0 }
 0x218   :  { %v6274_v26 = vsub.f32 %v1939_v48, %v6220_v8  ;;  %v8387_v28 = vand.u32 4294901760, %v6167_v21  ;;  %v8389_v5 = vand.u32 4294901760, %v5915_v27  ;;  %v1551_v48 = vsel %vm1549_vm12, %v1544_v61, %v1546_v2 }
 0x219   :  { %v6250_v63 = vpack.c.bf16 %v8378_v19, %v8377_v20  ;;  %v6262_v31 = vpack.c.bf16 %v8381_v43, %v8380_v10  ;;  %v8383_v19 = vand.u32 4294901760, %v5863_v42  ;;  %v8384_v20 = vand.u32 4294901760, %v5917_v9  ;;  %v1941_v43 = vld [vmem:[%s8020_s2 + $0x10] sm:$0xff] }
 0x21a   :  { %8386 = vst [vmem:[#allocation93_spill] sm:$0xff] %v6274_v26  ;;  %v6279_v41 = vsub.f32 %v6167_v21, %v8387_v28  ;;  %v8388_v10 = vand.u32 4294901760, %v5880_v33  ;;  %v1943_v28 = vld [vmem:[%s8020_s2 + $0x20] sm:$0xf]  ;;  %v8392_v42 = vand.u32 4294901760, %v6068_v14  ;;  %v8395_v33 = vand.u32 4294901760, %v6047_v38 }
 0x21b   :  { %8379 = vst [vmem:[#allocation90_spill] sm:$0xff] %v6250_v63  ;;  %8382 = vst [vmem:[#allocation91_spill] sm:$0xff] %v6262_v31  ;;  %v6268_v63 = vpack.c.bf16 %v8384_v20, %v8383_v19  ;;  %v1572_v20 = vrot.slane %v1564_v11, 4  ;;  %v8391_v31 = vand.u32 4294901760, %v6034_v62  ;;  %v1563_v11 = vsel %vm1562_vm9, %v6083_v55, %v6129_v13  ;;  %v6324_v55 = vpop.permute.xlu0 %1599 }
 0x21c   :  { %v6288_v19 = vpack.c.bf16 %v8389_v5, %v8388_v10  ;;  %v6307_v10 = vld [vmem:[#allocation3 + $0x128] sm:$0xff]  ;;  %v8396_v62 = vand.u32 4294901760, %v6107_v46  ;;  %vm1764_vm4 = vcmp.ne.f32.partialorder %v6271_v39, 0.0  ;;  %v6329_v27 = vand.u32 4294901760, %v1941_v43 }
 0x21d   :  { %8385 = vst [vmem:[#allocation92_spill] sm:$0xff] %v6268_v63  ;;  %v1552_v63 = vsel %vm1549_vm12, %v1542_v7, %v1544_v61  ;;  %v6301_v9 = vpack.c.bf16 %v8392_v42, %v8391_v31  ;;  %v6309_v5 = vld [vmem:[#allocation3 + $0x188] sm:$0xff]  ;;  %v6311_v61 = vand.u32 4294901760, %v2072_v59  ;;  %v1566_v42 = vsel %vm1562_vm9, %v6129_v13, %v6059_v16  ;;  %v1548_v31 = vpop.permute.xlu1 %1547 }
 0x21e   :  { %8390 = vst [vmem:[#allocation94_spill] sm:$0xff] %v6288_v19  ;;  %v2075_v19 = vsel %vm2067_vm10, %v1944_v17, 0  ;;  %v6318_v14 = vpack.c.bf16 %v8396_v62, %v8395_v33  ;;  %8398 = vst [vmem:[#allocation98_spill] sm:$0xff] %v6329_v27  ;;  %v8399_v17 = vand.u32 4294901760, %v6045_v34  ;;  %v8400_v38 = vand.u32 4294901760, %v6070_v57 }
 0x21f   :  { %8393 = vst [vmem:[#allocation95_spill] sm:$0xff] %v6301_v9  ;;  %8394 = vst [vmem:[#allocation96_spill] sm:$0xff] %v6311_v61  ;;  %v6326_v9 = vld [vmem:[#allocation3 + $0x130] sm:$0xff]  ;;  %v8402_v62 = vand.u32 4294901760, %v6057_v29  ;;  %v1579_v13 = vsel %vm54_vm0, %v1552_v63, %v1571_v35  ;;  %v1580_v46 = vsel %vm54_vm0, %v1551_v48, %v1572_v20  ;;  %v1550_v8 = vsel %vm1549_vm12, %v1546_v2, %v1548_v31 }
 0x220   :  { %8397 = vst [vmem:[#allocation97_spill] sm:$0xff] %v6318_v14  ;;  %v6335_v33 = vpack.c.bf16 %v8400_v38, %v8399_v17  ;;  %v8403_v14 = vand.u32 4294901760, %v6109_v6  ;;  %v6347_v21 = vand.u32 4294901760, %v1943_v28  ;;  %v1573_v34 = vrot.slane %v1563_v11, 4  ;;  %v6353_v17 = vld [vmem:[#allocation3 + $0x138] sm:$0xff] }
 0x221   :  { %v1553_v38 = vsel %vm1549_vm12, %v1548_v31, %v1542_v7  ;;  %vm1646_vm10 = vcmp.ne.f32.partialorder %v6307_v10, 0.0  ;;  %vm1765_vm5 = vcmp.ne.f32.partialorder %v6309_v5, 0.0  ;;  %v6356_v35 = vand.u32 4294901760, %v2075_v19  ;;  %v1604_v31 = vpop.permute.xlu0 %1603 }
 0x222   :  { %8401 = vst [vmem:[#allocation99_spill] sm:$0xff] %v6335_v33  ;;  %v6341_v16 = vpack.c.bf16 %v8403_v14, %v8402_v62  ;;  %8405 = vst [vmem:[#allocation101_spill] sm:$0xff] %v6347_v21  ;;  %v1574_v63 = vrot.slane %v1566_v42, 4  ;;  %v1622_v2 = vsel %vm1620_vm11, %v6159_v53, %v6157_v49  ;;  %v1623_v7 = vsel %vm1620_vm11, %v6127_v30, %v6159_v53  ;;  %v1602_v62 = vpop.permute.xlu1 %1601  ;;  %v6379_v14 = vld [vmem:[#allocation3 + $0x120] sm:$0xff] }
 0x223   :  { %8406 = vst [vmem:[#allocation102_spill] sm:$0xff] %v6356_v35  ;;  %vm1647_vm7 = vcmp.ne.f32.partialorder %v6326_v9, 0.0  ;;  %v6368_v20 = vsub.f32 %v2072_v59, %v6311_v61  ;;  %v6372_v48 = vsel %vm1587_vm13, %v1579_v13, 0.0  ;;  %v6376_v11 = vsel %vm1588_vm14, %v1580_v46, 0.0  ;;  %v6399_v13 = vld [vmem:[#allocation3 + $0x190] sm:$0xff] }
 0x224   :  { %8404 = vst [vmem:[#allocation100_spill] sm:$0xff] %v6341_v16  ;;  %v1581_v42 = vsel %vm54_vm0, %v1550_v8, %v1573_v34  ;;  %v6382_v53 = vsub.f32 %v1941_v43, %v6329_v27  ;;  %v1582_v59 = vsel %vm54_vm0, %v1553_v38, %v1574_v63  ;;  %v1610_v12 = vsel %vm1607_vm15, %v6324_v55, %v1602_v62  ;;  %v6401_v38 = vld [vmem:[#allocation3 + $0x198] sm:$0xff] }
 0x225   :  { %8407 = vst [vmem:[#allocation103_spill] sm:$0xff] %v6368_v20  ;;  %vm1648_vm8 = vcmp.ne.f32.partialorder %v6353_v17, 0.0  ;;  %v6390_v46 = vand.u32 4294901760, %v6274_v26  ;;  %v6393_v8 = vsub.f32 %v1943_v28, %v6347_v21  ;;  %v1630_v34 = vrot.slane %v1623_v7, 4  ;;  %v6420_v7 = vpop.permute.xlu0 %1670 }
 0x226   :  { %8408 = vst [vmem:[#allocation104_spill] sm:$0xff] %v6382_v53  ;;  %v1631_v37 = vrot.slane %v1622_v2, 4  ;;  %v1621_v43 = vsel %vm1620_vm11, %v6157_v49, %v6203_v51  ;;  %v6404_v63 = vsub.f32 %v2075_v19, %v6356_v35  ;;  %v6410_v28 = vsel %vm1589_vm1, %v1581_v42, 0.0  ;;  %v1606_v50 = vpop.permute.xlu1 %1605 }
 0x227   :  { %8409 = vst [vmem:[#allocation105_spill] sm:$0xff] %v6390_v46  ;;  %8410 = vst [vmem:[#allocation106_spill] sm:$0xff] %v6393_v8  ;;  %v1609_v2 = vsel %vm1607_vm15, %v1602_v62, %v1604_v31  ;;  %vm1645_vm9 = vcmp.ne.f32.partialorder %v6379_v14, 0.0  ;;  %v6417_v49 = vsel %vm1590_vm2, %v1582_v59, 0.0  ;;  %v1638_v19 = vsel %vm54_vm0, %v1610_v12, %v1630_v34 }
 0x228   :  { %8411 = vst [vmem:[#allocation107_spill] sm:$0xff] %v6404_v63  ;;  %v6423_v33 = vand.u32 4294901760, %v6368_v20  ;;  %v6426_v0 = vand.u32 4294901760, %v6382_v53  ;;  %v1624_v42 = vsel %vm1620_vm11, %v6203_v51, %v6127_v30  ;;  %v1632_v62 = vrot.slane %v1621_v43, 4 }
 0x229   :  { %vm1766_vm12 = vcmp.ne.f32.partialorder %v6399_v13, 0.0  ;;  %vm1767_vm13 = vcmp.ne.f32.partialorder %v6401_v38, 0.0  ;;  %v2190_v59 = vsub.f32 %v6274_v26, %v6390_v46  ;;  %v6437_v12 = vand.u32 4294901760, %v6393_v8  ;;  %v6468_v6 = vpop.permute.xlu0 %1674 }
 0x22a   :  { %8412 = vst [vmem:[#allocation108_spill] sm:$0xff] %v6423_v33  ;;  %8413 = vst [vmem:[#allocation109_spill] sm:$0xff] %v6426_v0  ;;  %v1639_v16 = vsel %vm54_vm0, %v1609_v2, %v1631_v37  ;;  %v1608_v57 = vsel %vm1607_vm15, %v1604_v31, %v1606_v50  ;;  %v6444_v30 = vand.u32 4294901760, %v6404_v63  ;;  %v8416_v51 = vand.u32 4294901760, %v6376_v11  ;;  %v6461_v31 = vld [vmem:[#allocation3 + $0x10] sm:$0xff]  ;;  %v6463_v2 = vld [vmem:[#allocation3 + $0x8] sm:$0xff] }
 0x22b   :  { %8414 = vst [vmem:[#allocation110_spill] sm:$0xff] %v6437_v12  ;;  %v8418_v46 = vand.u32 4294901760, %v6372_v48  ;;  %v6459_v37 = vsel %vm1764_vm4, %v1638_v19, 0.0  ;;  %v1629_v29 = vrot.slane %v1624_v42, 4  ;;  %vm1678_vm11 = vcmp.lt.s32.totalorder %v5416_v32, 4 }
 0x22c   :  { %8415 = vst [vmem:[#allocation111_spill] sm:$0xff] %v6444_v30  ;;  %v6449_v43 = vsub.f32 %v6376_v11, %v8416_v51  ;;  %v1611_v51 = vsel %vm1607_vm15, %v1606_v50, %v6324_v55  ;;  %v2206_v39 = vsub.f32 %v6382_v53, %v6426_v0  ;;  %v1650_v34 = vsel %vm1646_vm10, %v1638_v19, 0.0  ;;  %v1673_v55 = vpop.permute.xlu1 %1672 }
 0x22d   :  { %v6454_v26 = vsub.f32 %v6372_v48, %v8418_v46  ;;  %v2200_v46 = vsub.f32 %v6368_v20, %v6423_v33  ;;  %v6479_v42 = vsel %vm1765_vm5, %v1639_v16, 0.0  ;;  %v1640_v21 = vsel %vm54_vm0, %v1608_v57, %v1632_v62 }
 0x22e   :  { %8417 = vst [vmem:[#allocation112_spill] sm:$0xff] %v6449_v43  ;;  %v2222_v50 = vsub.f32 %v6393_v8, %v6437_v12  ;;  %v8420_v35 = vand.u32 4294901760, %v6410_v28  ;;  %v6491_v0 = vsel %vm1647_vm7, %v1639_v16, 0.0  ;;  %vm1723_vm14 = vcmp.lt.s32.totalorder %v5416_v32, 124  ;;  %v6510_v8 = vpop.permute.xlu0 %1715 }
 0x22f   :  { %8419 = vst [vmem:[#allocation113_spill] sm:$0xff] %v6454_v26  ;;  %vm1151_vm15 = vcmp.ne.f32.partialorder %v6461_v31, 0.0  ;;  %vm1150_vm1 = vcmp.ne.f32.partialorder %v6463_v2, 0.0  ;;  %v2216_v57 = vsub.f32 %v6404_v63, %v6444_v30  ;;  %v1637_v9 = vsel %vm54_vm0, %v1611_v51, %v1629_v29 }
 0x230   :  { %v6487_v33 = vsub.f32 %v6410_v28, %v8420_v35  ;;  %v8422_v35 = vand.u32 4294901760, %v6417_v49  ;;  %v2113_v62 = vand.u32 4294901760, %v1650_v34  ;;  %v1652_v12 = vsel %vm1648_vm8, %v1640_v21, 0.0  ;;  %v6515_v63 = vpop.permute.xlu1 %1676 }
 0x231   :  { %v6512_v30 = vand.u32 4294901760, %v2190_v59  ;;  %v6519_v53 = vand.u32 4294901760, %v2206_v39  ;;  %v6521_v29 = vand.u32 4294901760, %v2222_v50  ;;  %v8428_v10 = vand.u32 4294901760, %v6459_v37 }
 0x232   :  { %8421 = vst [vmem:[#allocation114_spill] sm:$0xff] %v6487_v33  ;;  %v6503_v19 = vsub.f32 %v6417_v49, %v8422_v35  ;;  %v6517_v35 = vand.u32 4294901760, %v2200_v46  ;;  %v6531_v59 = vsel %vm1645_vm9, %v1637_v9, 0.0  ;;  %v6533_v5 = vand.u32 4294901760, %v2216_v57  ;;  %v1119_v50 = vpop.permute.xlu0 %1118 }
 0x233   :  { %8424 = vst [vmem:[#allocation116_spill] sm:$0xff] %v6512_v30  ;;  %8426 = vst [vmem:[#allocation118_spill] sm:$0xff] %v6519_v53  ;;  %v6527_v17 = vsub.f32 %v6459_v37, %v8428_v10  ;;  %v3209_v16 = vand.u32 4294901760, %v1652_v12  ;;  %v8431_v46 = vand.u32 4294901760, %v6449_v43  ;;  %v8432_v51 = vand.u32 4294901760, %v6454_v26 }
 0x234   :  { %8423 = vst [vmem:[#allocation115_spill] sm:$0xff] %v6503_v19  ;;  %8425 = vst [vmem:[#allocation117_spill] sm:$0xff] %v6517_v35  ;;  %v6546_v10 = vsub.f32 %v1650_v34, %v2113_v62  ;;  %v8435_v14 = vand.u32 4294901760, %v6479_v42  ;;  %v6555_v27 = vsel %vm1766_vm12, %v1640_v21, 0.0  ;;  %v1126_v21 = vsel %vm1124_vm3, %v1119_v50, %v5410_v24 }
 0x235   :  { %8427 = vst [vmem:[#allocation119_spill] sm:$0xff] %v6521_v29  ;;  %8429 = vst [vmem:[#allocation120_spill] sm:$0xff] %v6527_v17  ;;  %v6538_v39 = vsub.f32 %v6449_v43, %v8431_v46  ;;  %v6544_v20 = vsub.f32 %v6454_v26, %v8432_v51  ;;  %v6559_v46 = vsel %vm1767_vm13, %v1637_v9, 0.0  ;;  %v8437_v43 = vand.u32 4294901760, %v6491_v0  ;;  %v6567_v26 = vld [vmem:[#allocation3 + $0x160] sm:$0xff] }
 0x236   :  { %8430 = vst [vmem:[#allocation121_spill] sm:$0xff] %v6533_v5  ;;  %8434 = vst [vmem:[#allocation123_spill] sm:$0xff] %v6546_v10  ;;  %v6551_v57 = vsub.f32 %v6479_v42, %v8435_v14  ;;  %v1718_v14 = vpop.permute.xlu1 %1717  ;;  %v1127_v13 = vsel %vm1124_vm3, %v5412_v25, %v1119_v50  ;;  %v1135_v61 = vrot.slane %v1126_v21, 4  ;;  %v6582_v5 = vsub.f32 %v1652_v12, %v3209_v16  ;;  %v6589_v25 = vld [vmem:[#allocation3 + $0x170] sm:$0xff]  ;;  %v1720_v50 = vpop.permute.xlu0 %1719  ;;  %v6602_v21 = vld [vmem:[#allocation3 + $0x158] sm:$0xff] }
 0x237   :  { %8433 = vst [vmem:[#allocation122_spill] sm:$0xff] %v6544_v20  ;;  %v6564_v51 = vsub.f32 %v6491_v0, %v8437_v43  ;;  %v1134_v9 = vrot.slane %v1127_v13, 4  ;;  %v8439_v43 = vand.u32 4294901760, %v6376_v11  ;;  %v6587_v24 = vsel %vm1678_vm11, %v1673_v55, %v6468_v6 }
 0x238   :  { %8436 = vst [vmem:[#allocation124_spill] sm:$0xff] %v6551_v57  ;;  %8441 = vst [vmem:[#allocation127_spill] sm:$0xff] %v6582_v5  ;;  %vm1665_vm3 = vcmp.lt.s32.totalorder %v5416_v32, 60  ;;  %v6595_v11 = vsel %vm1678_vm11, %v6420_v7, %v1673_v55  ;;  %vm1748_vm2 = vcmp.ne.f32.partialorder %v6567_v26, 0.0  ;;  %v1726_v55 = vsel %vm1723_vm14, %v6510_v8, %v1718_v14 }
 0x239   :  { %8438 = vst [vmem:[#allocation125_spill] sm:$0xff] %v6564_v51  ;;  %v6578_v29 = vpack.c.bf16 %v2113_v62, %v8439_v43  ;;  %v1142_v12 = vsel %vm54_vm0, %v5447_v58, %v1134_v9  ;;  %v1143_v62 = vsel %vm54_vm0, %v5443_v52, %v1135_v61  ;;  %v8442_v43 = vand.u32 4294901760, %v6531_v59 }
 0x23a   :  { %v6615_v58 = vsel %vm1151_vm15, %v1143_v62, 0.0  ;;  %v1722_v9 = vpop.permute.xlu1 %1721  ;;  %v6619_v52 = vsel %vm1150_vm1, %v1142_v12, 0.0  ;;  %vm1750_vm4 = vcmp.ne.f32.partialorder %v6589_v25, 0.0  ;;  %v8444_v34 = vand.u32 4294901760, %v6417_v49  ;;  %v6631_v62 = vld [vmem:[#allocation3 + $0x178] sm:$0xff]  ;;  %v6646_v49 = vld [vmem:[#allocation3 + $0x150] sm:$0xff]  ;;  %v1658_v53 = vpop.permute.xlu0 %1657 }
 0x23b   :  { %8440 = vst [vmem:[#allocation126_spill] sm:$0xff] %v6578_v29  ;;  %v6608_v38 = vsub.f32 %v6531_v59, %v8442_v43  ;;  %v8446_v2 = vand.u32 4294901760, %v6559_v46  ;;  %v8448_v61 = vand.u32 4294901760, %v6555_v27  ;;  %v1724_v17 = vsel %vm1723_vm14, %v1720_v50, %v1722_v9  ;;  %v6658_v43 = vld [vmem:[#allocation3 + $0x140] sm:$0xff] }
 0x23c   :  { %v6629_v31 = vpack.c.bf16 %v3209_v16, %v8444_v34  ;;  %vm1706_vm10 = vcmp.ne.f32.partialorder %v6602_v21, 0.0  ;;  %v6649_v16 = vld [vmem:[#allocation3 + $0x168] sm:$0xff]  ;;  %v1732_v34 = vrot.slane %v1726_v55, 4  ;;  %v8453_v35 = vand.u32 4294901760, %v6546_v10  ;;  %v6807_v21 = vld [vmem:[#allocation3 + $0x1f0] sm:$0xff] }
 0x23d   :  { %8443 = vst [vmem:[#allocation128_spill] sm:$0xff] %v6608_v38  ;;  %v6636_v12 = vsub.f32 %v6559_v46, %v8446_v2  ;;  %v6641_v13 = vsub.f32 %v6555_v27, %v8448_v61  ;;  %v8451_v61 = vand.u32 4294901760, %v6105_v40  ;;  %v6668_v55 = vsel %vm1678_vm11, %v6515_v63, %v6420_v7 }
 0x23e   :  { %8445 = vst [vmem:[#allocation129_spill] sm:$0xff] %v6629_v31  ;;  %v2341_v30 = vsub.f32 %v6546_v10, %v8453_v35  ;;  %v1660_v2 = vpop.permute.xlu1 %1659  ;;  %vm1704_vm5 = vcmp.ne.f32.partialorder %v6625_v44, 0.0  ;;  %vm1784_vm7 = vcmp.lt.s32.totalorder %v5416_v32, 8  ;;  %v8454_v40 = vand.u32 4294901760, %v6410_v28 }
 0x23f   :  { %8447 = vst [vmem:[#allocation130_spill] sm:$0xff] %v6636_v12  ;;  %8449 = vst [vmem:[#allocation131_spill] sm:$0xff] %v6641_v13  ;;  %v8450_v12 = vand.u32 4294901760, %v6615_v58  ;;  %vm1751_vm8 = vcmp.ne.f32.partialorder %v6631_v62, 0.0  ;;  %v8154_v35 = vand.u32 4294901760, %v6582_v5  ;;  %v1679_v7 = vsel %vm1678_vm11, %v6468_v6, %v6515_v63 }
 0x240   :  { %v1727_v23 = vsel %vm1723_vm14, %v1722_v9, %v6510_v8  ;;  %v1734_v10 = vrot.slane %v1724_v17, 4  ;;  %v8457_v28 = vand.u32 4294901760, %v6619_v52  ;;  %vm1705_vm9 = vcmp.ne.f32.partialorder %v6646_v49, 0.0 }
 0x241   :  { %v6656_v57 = vpack.c.bf16 %v8451_v61, %v8450_v12  ;;  %v8455_v12 = vand.u32 4294901760, %v6491_v0  ;;  %v8458_v0 = vand.u32 4294901760, %v5902_v56  ;;  %vm1749_vm12 = vcmp.ne.f32.partialorder %v6649_v16, 0.0  ;;  %v6856_v16 = vld [vmem:[#allocation3 + $0x1a0] sm:$0xff] }
 0x242   :  { %v1725_v6 = vsel %vm1723_vm14, %v1718_v14, %v1720_v50  ;;  %vm1703_vm13 = vcmp.ne.f32.partialorder %v6658_v43, 0.0  ;;  %v8460_v8 = vand.u32 4294901760, %v6372_v48  ;;  %v8461_v56 = vand.u32 4294901760, %v6531_v59  ;;  %v1662_v14 = vpop.permute.xlu0 %1661  ;;  %v6712_v50 = vld [vmem:[#allocation3 + $0x1e8] sm:$0xff] }
 0x243   :  { %8452 = vst [vmem:[#allocation132_spill] sm:$0xff] %v6656_v57  ;;  %v6676_v61 = vpack.c.bf16 %v8455_v12, %v8454_v40  ;;  %v6691_v40 = vpack.c.bf16 %v8458_v0, %v8457_v28  ;;  %4650 = vmatpush1.bf16.msra.mxu1 %v6656_v57  ;;  %v2330_v17 = vand.u32 4294901760, %v6538_v39  ;;  %v1687_v9 = vrot.slane %v6668_v55, 4  ;;  %v1664_v39 = vpop.permute.xlu1 %1663  ;;  %v6835_v57 = vld [vmem:[#allocation3 + $0x1b8] sm:$0xff] }
 0x244   :  { %4652 = vmatprep.subr.bf16.mxu1 %v5671_v47  ;;  %v6705_v63 = vpack.c.bf16 %v8461_v56, %v8460_v8  ;;  %v1740_v28 = vsel %vm54_vm0, %v5337_v15, %v1732_v34  ;;  %v2342_v0 = vand.u32 4294901760, %v2341_v30  ;;  %v8463_v12 = vand.u32 4294901760, %v6503_v19 }
 0x245   :  { %8456 = vst [vmem:[#allocation133_spill] sm:$0xff] %v6676_v61  ;;  %8459 = vst [vmem:[#allocation134_spill] sm:$0xff] %v6691_v40  ;;  %4402 = vmatprep.subr.bf16.mxu0 %v6691_v40  ;;  %v1690_v59 = vrot.slane %v1679_v7, 4  ;;  %v1735_v8 = vrot.slane %v1727_v23, 4  ;;  %v6723_v34 = vsub.f32 %v6582_v5, %v8154_v35  ;;  %v8464_v55 = vand.u32 4294901760, %v6608_v38  ;;  %v8483_v40 = vld [vmem:[#allocation77_spill] sm:$0xff] }
 0x246   :  { %8462 = vst [vmem:[#allocation135_spill] sm:$0xff] %v6705_v63  ;;  %v6717_v48 = vsub.f32 %v6503_v19, %v8463_v12  ;;  %4404 = vmatpush1.bf16.msra.mxu0 %v5513_v45  ;;  %v1733_v30 = vrot.slane %v1725_v6, 4  ;;  %v1742_v12 = vsel %vm54_vm0, %v5339_v18, %v1734_v10  ;;  %v6734_v23 = vsel %vm1665_vm3, %v1658_v53, %v1660_v2 }
 0x247   :  { %v6728_v56 = vsub.f32 %v6608_v38, %v8464_v55  ;;  %4406 = vmatprep.subr.bf16.mxu0 %v5637_v36  ;;  %v6739_v7 = vsel %vm1665_vm3, %v1662_v14, %v1664_v39  ;;  %4654 = vmatpush1.bf16.msra.mxu1 %v5675_v54  ;;  %v6744_v55 = vsel %vm1748_vm2, %v1740_v28, 0.0  ;;  %v6748_v6 = vsel %vm1665_vm3, %v1660_v2, %v1662_v14  ;;  %v6763_v28 = vld [vmem:[#allocation3 + $0x1b0] sm:$0xff]  ;;  %v6765_v2 = vpop.permute.xlu0 %1776  ;;  %v6861_v38 = vld [vmem:[#allocation3 + $0x200] sm:$0xff] }
 0x248   :  { %v1698_v10 = vsel %vm54_vm0, %v6739_v7, %v1690_v59  ;;  %4656 = vmatprep.subr.bf16.mxu1 %v5929_v4  ;;  %vm1875_vm11 = vcmp.ne.f32.partialorder %v6712_v50, 0.0  ;;  %v8466_v35 = vand.u32 4294901760, %v6487_v33  ;;  %v6761_v26 = vsel %vm1665_vm3, %v1664_v39, %v1658_v53  ;;  %v8470_v4 = vld [vmem:[#allocation6_spill] sm:$0xff] }
 0x249   :  { %8465 = vst [vmem:[#allocation136_spill] sm:$0xff] %v6728_v56  ;;  %v6767_v14 = vpack.c.bf16 %v2342_v0, %v2330_v17  ;;  %v3426_v59 = vand.u32 4294901760, %v6717_v48  ;;  %v1743_v54 = vsel %vm54_vm0, %v5343_v22, %v1735_v8  ;;  %v8469_v53 = vrot.slane %v6595_v11, 4  ;;  %v1779_v17 = vpop.permute.xlu1 %1778 }
 0x24a   :  { %v6757_v36 = vsub.f32 %v6487_v33, %v8466_v35  ;;  %v6775_v35 = vsel %vm1750_vm4, %v1742_v12, 0.0  ;;  %4408 = vmatpush1.bf16.msra.mxu0 %v5639_v1  ;;  %v3438_v0 = vand.u32 4294901760, %v6723_v34  ;;  %v1741_v45 = vsel %vm54_vm0, %v8470_v4, %v1733_v30  ;;  %v8472_v12 = vld [vmem:[#allocation49_spill] sm:$0xff]  ;;  %v6796_v1 = vld [vmem:[#allocation3 + $0x1e0] sm:$0xff]  ;;  %v8475_v30 = vld [vmem:[#allocation76_spill] sm:$0xff] }
 0x24b   :  { %8468 = vst [vmem:[#allocation138_spill] sm:$0xff] %v6767_v14  ;;  %v1696_v39 = vsel %vm54_vm0, %v6734_v23, %v8469_v53  ;;  %v8471_v8 = vrot.slane %v6587_v24, 4  ;;  %v6792_v11 = vsel %vm1706_vm10, %v1698_v10, 0.0  ;;  %4410 = vmatprep.subr.bf16.mxu0 %v8472_v12  ;;  %v8473_v53 = vld [vmem:[#allocation50_spill] sm:$0xff]  ;;  %v8474_v34 = vand.u32 4294901760, %v6619_v52 }
 0x24c   :  { %8467 = vst [vmem:[#allocation137_spill] sm:$0xff] %v6757_v36  ;;  %4658 = vmatpush1.bf16.msra.mxu1 %v8473_v53  ;;  %v1695_v24 = vsel %vm54_vm0, %v6761_v26, %v1687_v9  ;;  %vm1811_vm14 = vcmp.ne.f32.partialorder %v6763_v28, 0.0  ;;  %vm1829_vm15 = vcmp.lt.s32.totalorder %v5416_v32, 120  ;;  %v6818_v9 = vsel %vm1784_vm7, %v6765_v2, %v1779_v17  ;;  %v8476_v53 = vld [vmem:[#allocation57_spill] sm:$0xff]  ;;  %v8488_v14 = vld [vmem:[#allocation70_spill] sm:$0xff] }
 0x24d   :  { %v1697_v25 = vsel %vm54_vm0, %v6748_v6, %v8471_v8  ;;  %v6801_v48 = vsub.f32 %v6619_v52, %v8474_v34  ;;  %4660 = vmatprep.subr.bf16.mxu1 %v8475_v30  ;;  %v1708_v52 = vsel %vm1704_vm5, %v1696_v39, 0.0  ;;  %v6820_v34 = vld [vmem:[#allocation3 + $0x1f8] sm:$0xff]  ;;  %v1781_v30 = vpop.permute.xlu0 %1780  ;;  %v1755_v12 = vsel %vm1751_vm8, %v1743_v54, 0.0  ;;  %v1783_v44 = vpop.permute.xlu1 %1782  ;;  %v6831_v39 = vld [vmem:[#allocation3 + $0x1c0] sm:$0xff] }
 0x24e   :  { %v6826_v10 = vsel %vm1705_vm9, %v1697_v25, 0.0  ;;  %4412 = vmatpush1.bf16.msra.mxu0 %v8476_v53  ;;  %vm1874_vm1 = vcmp.ne.f32.partialorder %v6796_v1, 0.0  ;;  %v1753_v47 = vsel %vm1749_vm12, %v1741_v45, 0.0  ;;  %v8477_v54 = vand.u32 4294901760, %v6564_v51 }
 0x24f   :  { %v8479_v49 = vand.u32 4294901760, %v6744_v55  ;;  %v8480_v8 = vand.u32 4294901760, %v6615_v58  ;;  %v6854_v45 = vsel %vm1703_vm13, %v1695_v24, 0.0  ;;  %vm1876_vm3 = vcmp.ne.f32.partialorder %v6807_v21, 0.0 }
 0x250   :  { %v6840_v62 = vsub.f32 %v6564_v51, %v8477_v54  ;;  %v8482_v54 = vld [vmem:[#allocation69_spill] sm:$0xff]  ;;  %4662 = vmatpush1.bf16.msra.mxu1 %v8483_v40  ;;  %v6865_v51 = vpack.c.bf16 %v3438_v0, %v3426_v59  ;;  %v8485_v43 = vrot.slane %v8470_v4, 4  ;;  %vm1877_vm2 = vcmp.ne.f32.partialorder %v6820_v34, 0.0 }
 0x251   :  { %v6845_v25 = vsub.f32 %v6744_v55, %v8479_v49  ;;  %v6850_v53 = vsub.f32 %v6615_v58, %v8480_v8  ;;  %4414 = vmatprep.subr.bf16.mxu0 %v8482_v54  ;;  %v6863_v49 = vld [vmem:[#allocation3 + $0x1d0] sm:$0xff]  ;;  %v2117_v58 = vand.u32 4294901760, %v1708_v52  ;;  %4664 = vmatprep.subr.bf16.mxu1 %v6629_v31  ;;  %v3217_v54 = vand.u32 4294901760, %v1755_v12  ;;  %v6874_v40 = vld [vmem:[#allocation3 + $0x218] sm:$0xff]  ;;  %v1822_v8 = vpop.permute.xlu0 %1821  ;;  %v1824_v13 = vpop.permute.xlu1 %1823  ;;  %v6902_v31 = vld [vmem:[#allocation3 + $0x1a8] sm:$0xff] }
 0x252   :  { %8478 = vst [vmem:[#allocation6_spill] sm:$0xff] %v6840_v62  ;;  %8484 = vst [vmem:[#allocation140_spill] sm:$0xff] %v6865_v51  ;;  %v1867_v24 = vsel %vm54_vm0, %v6818_v9, %v8485_v43  ;;  %v8486_v33 = vand.u32 4294901760, %v6775_v35  ;;  %v3215_v0 = vand.u32 4294901760, %v6826_v10  ;;  %vm1854_vm4 = vcmp.ne.f32.partialorder %v6831_v39, 0.0  ;;  %4416 = vmatpush1.bf16.msra.mxu0 %v8488_v14 }
 0x253   :  { %8481 = vst [vmem:[#allocation139_spill] sm:$0xff] %v6850_v53  ;;  %v2121_v5 = vand.u32 4294901760, %v1753_v47  ;;  %vm1812_vm10 = vcmp.ne.f32.partialorder %v6835_v57, 0.0  ;;  %vm1809_vm5 = vcmp.ne.f32.partialorder %v6856_v16, 0.0  ;;  %v6889_v19 = vsel %vm1784_vm7, %v1781_v30, %v1783_v44  ;;  %4418 = vmatprep.subr.bf16.mxu0 %v6578_v29  ;;  %v6931_v29 = vld [vmem:[#allocation3 + $0x1d8] sm:$0xff] }
 0x254   :  { %v6879_v59 = vsub.f32 %v6775_v35, %v8486_v33  ;;  %v6893_v33 = vsel %vm1784_vm7, %v1779_v17, %v1781_v30  ;;  %vm1894_vm8 = vcmp.ne.f32.partialorder %v6861_v38, 0.0  ;;  %v8489_v51 = vand.u32 4294901760, %v6792_v11  ;;  %4666 = vmatpush1.bf16.msra.mxu1 %v6676_v61  ;;  %v6929_v61 = vld [vmem:[#allocation3 + $0x1c8] sm:$0xff]  ;;  %v6935_v30 = vld [vmem:[#allocation3 + $0x230] sm:$0xff] }
 0x255   :  { %vm1856_vm9 = vcmp.ne.f32.partialorder %v6863_v49, 0.0  ;;  %v6911_v17 = vsel %vm1784_vm7, %v1783_v44, %v6765_v2  ;;  %vm1897_vm12 = vcmp.ne.f32.partialorder %v6874_v40, 0.0  ;;  %v6918_v14 = vsub.f32 %v1708_v52, %v2117_v58  ;;  %v1826_v62 = vpop.permute.xlu0 %1825 }
 0x256   :  { %8487 = vst [vmem:[#allocation141_spill] sm:$0xff] %v6879_v59  ;;  %v6899_v43 = vpack.c.bf16 %v3217_v54, %v8489_v51  ;;  %v6906_v59 = vsel %vm1875_vm11, %v1867_v24, 0.0  ;;  %v8491_v50 = vrot.slane %v6818_v9, 4  ;;  %v6925_v2 = vsub.f32 %v1755_v12, %v3217_v54  ;;  %4420 = vmatpush1.bf16.msra.mxu0 %v6705_v63 }
 0x257   :  { %v6927_v44 = vpack.c.bf16 %v2121_v5, %v2117_v58  ;;  %v6937_v36 = vsub.f32 %v1753_v47, %v2121_v5  ;;  %vm1810_vm7 = vcmp.ne.f32.partialorder %v6902_v31, 0.0  ;;  %v6945_v12 = vsub.f32 %v6826_v10, %v3215_v0  ;;  %v1828_v47 = vpop.permute.xlu1 %1827  ;;  %v6953_v5 = vld [vmem:[#allocation3 + $0x208] sm:$0xff] }
 0x258   :  { %8490 = vst [vmem:[#allocation142_spill] sm:$0xff] %v6899_v43  ;;  %v1803_v24 = vsel %vm54_vm0, %v6739_v7, %v8491_v50  ;;  %4668 = vmatprep.subr.bf16.mxu1 %v6899_v43  ;;  %v8493_v7 = vand.u32 4294901760, %v6775_v35  ;;  %v8495_v58 = vrot.slane %v5337_v15, 4  ;;  %v8496_v35 = vand.u32 4294901760, %v6854_v45  ;;  %v6961_v10 = vld [vmem:[#allocation3 + $0x228] sm:$0xff] }
 0x259   :  { %8492 = vst [vmem:[#allocation143_spill] sm:$0xff] %v6927_v44  ;;  %v8499_v54 = vrot.slane %v5339_v18, 4  ;;  %v1832_v63 = vsel %vm1829_vm15, %v1822_v8, %v1824_v13  ;;  %v1833_v43 = vsel %vm1829_vm15, %v1828_v47, %v1822_v8  ;;  %4422 = vmatprep.subr.bf16.mxu0 %v6927_v44  ;;  %vm1855_vm13 = vcmp.ne.f32.partialorder %v6929_v61, 0.0 }
 0x25a   :  { %v6941_v50 = vpack.c.bf16 %v8493_v7, %v3215_v0  ;;  %v1866_v52 = vsel %vm54_vm0, %v6911_v17, %v8495_v58  ;;  %v8497_v7 = vand.u32 4294901760, %v6744_v55  ;;  %v6965_v0 = vsel %vm1811_vm14, %v1803_v24, 0.0  ;;  %v6975_v55 = vld [vmem:[#allocation3 + $0x210] sm:$0xff] }
 0x25b   :  { %v1868_v58 = vsel %vm54_vm0, %v6893_v33, %v8499_v54  ;;  %vm1857_vm11 = vcmp.ne.f32.partialorder %v6931_v29, 0.0  ;;  %v1794_v28 = vrot.slane %v6911_v17, 4  ;;  %v8500_v24 = vrot.slane %v5343_v22, 4 }
 0x25c   :  { %8494 = vst [vmem:[#allocation144_spill] sm:$0xff] %v6941_v50  ;;  %v6959_v51 = vpack.c.bf16 %v8497_v7, %v8496_v35  ;;  %4670 = vmatpush1.bf16.msra.mxu1 %v6941_v50  ;;  %v1838_v8 = vrot.slane %v1833_v43, 4  ;;  %v6987_v35 = vld [vmem:[#allocation3 + $0x220] sm:$0xff]  ;;  %v1830_v7 = vsel %vm1829_vm15, %v1826_v62, %v1828_v47  ;;  %v6991_v50 = vld [vmem:[#allocation3 + $0x238] sm:$0xff]  ;;  %v6995_v44 = vsel %vm1874_vm1, %v1866_v52, 0.0 }
 0x25d   :  { %v1869_v54 = vsel %vm54_vm0, %v6889_v19, %v8500_v24  ;;  %v8501_v17 = vrot.slane %v6889_v19, 4  ;;  %v8502_v24 = vrot.slane %v6893_v33, 4  ;;  %vm1895_vm6 = vcmp.ne.f32.partialorder %v6953_v5, 0.0 }
 0x25e   :  { %8498 = vst [vmem:[#allocation145_spill] sm:$0xff] %v6959_v51  ;;  %v1831_v47 = vsel %vm1829_vm15, %v1824_v13, %v1826_v62  ;;  %vm1911_vm14 = vcmp.ne.f32.partialorder %v6961_v10, 0.0  ;;  %v7011_v1 = vsel %vm1876_vm3, %v1868_v58, 0.0  ;;  %v8503_v52 = vrot.slane %v6818_v9, 4  ;;  %4424 = vmatpush1.bf16.msra.mxu0 %v6959_v51 }
 0x25f   :  { %v1801_v56 = vsel %vm54_vm0, %v6734_v23, %v8501_v17  ;;  %v1804_v20 = vsel %vm54_vm0, %v6761_v26, %v8502_v24  ;;  %v1846_v17 = vsel %vm54_vm0, %v5343_v22, %v1838_v8  ;;  %vm1896_vm1 = vcmp.ne.f32.partialorder %v6975_v55, 0.0 }
 0x260   :  { %v1886_v23 = vsel %vm54_vm0, %v1832_v63, %v8503_v52  ;;  %v1840_v26 = vrot.slane %v1831_v47, 4  ;;  %v7022_v32 = vsel %vm1877_vm2, %v1869_v54, 0.0  ;;  %v1839_v13 = vrot.slane %v1832_v63, 4 }
 0x261   :  { %v1889_v21 = vsel %vm54_vm0, %v1833_v43, %v1794_v28  ;;  %vm1910_vm15 = vcmp.ne.f32.partialorder %v6987_v35, 0.0  ;;  %v1841_v9 = vrot.slane %v1830_v7, 4  ;;  %vm1913_vm3 = vcmp.ne.f32.partialorder %v6991_v50, 0.0 }
 0x262   :  { %v3227_v62 = vand.u32 4294901760, %v6965_v0  ;;  %v7030_v22 = vsel %vm1854_vm4, %v1846_v17, 0.0  ;;  %v1848_v58 = vsel %vm54_vm0, %v8470_v4, %v1840_v26  ;;  %v7036_v34 = vsel %vm1812_vm10, %v1804_v20, 0.0 }
 0x263   :  { %v1802_v63 = vsel %vm54_vm0, %v6748_v6, %v1794_v28  ;;  %v7042_v43 = vsel %vm1809_vm5, %v1801_v56, 0.0  ;;  %v7046_v54 = vsel %vm1894_vm8, %v1886_v23, 0.0  ;;  %v7050_v39 = vsel %vm1856_vm9, %v1848_v58, 0.0 }
 0x264   :  { %v2139_v4 = vand.u32 4294901760, %v6995_v44  ;;  %v8213_v20 = vand.u32 4294901760, %v7022_v32  ;;  %v3235_v57 = vand.u32 4294901760, %v7011_v1  ;;  %v7057_v6 = vsel %vm1897_vm12, %v1889_v21, 0.0 }
 0x265   :  { %v1847_v56 = vsel %vm54_vm0, %v5337_v15, %v1839_v13  ;;  %v8208_v38 = vand.u32 4294901760, %v7030_v22  ;;  %v1849_v16 = vsel %vm54_vm0, %v5339_v18, %v1841_v9  ;;  %v8205_v49 = vand.u32 4294901760, %v7036_v34 }
 0x266   :  { %v2131_v28 = vand.u32 4294901760, %v7042_v43  ;;  %v8212_v8 = vand.u32 4294901760, %v7046_v54  ;;  %v8207_v24 = vand.u32 4294901760, %v7050_v39  ;;  %v7070_v40 = vsel %vm1810_vm7, %v1802_v63, 0.0 }
 0x267   :  { %v8211_v52 = vand.u32 4294901760, %v7057_v6  ;;  %v8504_v15 = vrot.slane %v6893_v33, 4  ;;  %v8505_v18 = vrot.slane %v6889_v19, 4  ;;  %v8506_v13 = vand.u32 4294901760, %v6559_v46 }
 0x268   :  { %v8204_v31 = vand.u32 4294901760, %v7070_v40  ;;  %v8508_v9 = vand.u32 4294901760, %v6555_v27  ;;  %v7094_v33 = vsel %vm1855_vm13, %v1847_v56, 0.0  ;;  %v7098_v19 = vsel %vm1857_vm11, %v1849_v16, 0.0 }
 0x269   :  { %v1887_v23 = vsel %vm54_vm0, %v1831_v47, %v8504_v15  ;;  %v1888_v26 = vsel %vm54_vm0, %v1830_v7, %v8505_v18  ;;  %v7083_v21 = vpack.c.bf16 %v8205_v49, %v8506_v13  ;;  %vm8510_vm0 = vcmp.ne.f32.partialorder %v6935_v30, 0.0 }
 0x26a   :  { %v7090_v63 = vpack.c.bf16 %v3227_v62, %v8508_v9  ;;  %v7102_v46 = vsel %vm8510_vm0, %v1846_v17, 0.0  ;;  %v8206_v27 = vand.u32 4294901760, %v7094_v33  ;;  %v8203_v7 = vand.u32 4294901760, %v7098_v19 }
 0x26b   :  { %8507 = vst [vmem:[#allocation146_spill] sm:$0xff] %v7083_v21  ;;  %4672 = vmatprep.subr.bf16.mxu1 %v7083_v21  ;;  %v7109_v47 = vpack.c.bf16 %v2139_v4, %v8208_v38  ;;  %v1899_v61 = vsel %vm1895_vm6, %v1887_v23, 0.0  ;;  %v8512_v29 = vand.u32 4294901760, %v6479_v42  ;;  %v7122_v17 = vpack.c.bf16 %v3235_v57, %v8207_v24  ;;  %v8526_v38 = vld [vmem:[#allocation7_spill] sm:$0xff] }
 0x26c   :  { %8509 = vst [vmem:[#allocation147_spill] sm:$0xff] %v7090_v63  ;;  %4674 = vmatpush1.bf16.msra.mxu1 %v7090_v63  ;;  %v7126_v15 = vsel %vm1911_vm14, %v1849_v16, 0.0  ;;  %v1900_v5 = vsel %vm1896_vm1, %v1888_v26, 0.0  ;;  %v8515_v23 = vand.u32 4294901760, %v6459_v37  ;;  %v8517_v18 = vand.u32 4294901760, %v6906_v59  ;;  %v8603_v63 = vld [vmem:[#allocation140_spill] sm:$0xff] }
 0x26d   :  { %8511 = vst [vmem:[#allocation148_spill] sm:$0xff] %v7109_v47  ;;  %v7117_v30 = vpack.c.bf16 %v8204_v31, %v8512_v29  ;;  %8514 = vst [vmem:[#allocation150_spill] sm:$0xff] %v7122_v17  ;;  %v7146_v10 = vpack.c.bf16 %v8213_v20, %v8203_v7  ;;  %v3243_v55 = vand.u32 4294901760, %v7102_v46  ;;  %v1914_v37 = vsel %vm1910_vm15, %v1848_v58, 0.0 }
 0x26e   :  { %v7134_v42 = vpack.c.bf16 %v2131_v28, %v8515_v23  ;;  %v7140_v13 = vpack.c.bf16 %v8517_v18, %v8206_v27  ;;  %v8210_v16 = vand.u32 4294901760, %v7126_v15  ;;  %v7155_v26 = vsel %vm1913_vm3, %v1847_v56, 0.0 }
 0x26f   :  { %8513 = vst [vmem:[#allocation149_spill] sm:$0xff] %v7117_v30  ;;  %8519 = vst [vmem:[#allocation153_spill] sm:$0xff] %v7146_v10  ;;  %4426 = vmatprep.subr.bf16.mxu0 %v7117_v30  ;;  %4676 = vmatprep.subr.bf16.mxu1 %v7146_v10  ;;  %v8209_v9 = vand.u32 4294901760, %v7155_v26  ;;  %v8520_v29 = vand.u32 4294901760, %v6801_v48  ;;  %v8521_v35 = vand.u32 4294901760, %v6850_v53  ;;  %v8522_v50 = vand.u32 4294901760, %v6854_v45 }
 0x270   :  { %8516 = vst [vmem:[#allocation151_spill] sm:$0xff] %v7134_v42  ;;  %8518 = vst [vmem:[#allocation152_spill] sm:$0xff] %v7140_v13  ;;  %4428 = vmatpush1.bf16.msra.mxu0 %v7134_v42  ;;  %v7173_v7 = vsub.f32 %v6995_v44, %v2139_v4  ;;  %v2141_v31 = vand.u32 4294901760, %v1899_v61  ;;  %v3239_v49 = vand.u32 4294901760, %v1900_v5  ;;  %4678 = vmatpush1.bf16.msra.mxu1 %v7122_v17  ;;  %vm5067_vm6 = vmmov 1   ;;  %v8605_v30 = vld [vmem:[#allocation131_spill] sm:$0xff] }
 0x271   :  { %v2233_v23 = vsub.f32 %v6801_v48, %v8520_v29  ;;  %v3335_v58 = vsub.f32 %v6850_v53, %v8521_v35  ;;  %v7170_v56 = vsub.f32 %v6854_v45, %v8522_v50  ;;  %4430 = vmatprep.subr.bf16.mxu0 %v7140_v13  ;;  %v2147_v29 = vand.u32 4294901760, %v1914_v37 }
 0x272   :  { %v7181_v35 = vpack.c.bf16 %v8209_v9, %v8211_v52  ;;  %v7184_v45 = vsub.f32 %v7011_v1, %v3235_v57  ;;  %v7189_v44 = vsub.f32 %v7046_v54, %v8212_v8  ;;  %v7193_v4 = vpack.c.bf16 %v8210_v16, %v2141_v31 }
 0x273   :  { %v2234_v27 = vand.u32 4294901760, %v2233_v23  ;;  %v3336_v24 = vand.u32 4294901760, %v3335_v58  ;;  %v7195_v50 = vpack.c.bf16 %v3243_v55, %v3239_v49  ;;  %vm8527_vm2 = vcmp.eq.s32.totalorder %v8526_v38, 0 }
 0x274   :  { %8523 = vst [vmem:[#allocation154_spill] sm:$0xff] %v7181_v35  ;;  %8524 = vst [vmem:[#allocation155_spill] sm:$0xff] %v7193_v4  ;;  %v8528_v23 = vmov 0  ;;  %v8531_v1 = vand.u32 4294901760, %v6792_v11  ;;  %4432 = vmatpush1.bf16.msra.mxu0 %v7109_v47  ;;  %4680 = vmatprep.subr.bf16.mxu1 %v7181_v35  ;;  %v8532_v9 = vand.u32 4294901760, %v6208_v3  ;;  %v8533_v38 = vand.u32 4294901760, %v6279_v41 }
 0x275   :  { %8525 = vst [vmem:[#allocation156_spill] sm:$0xff] %v7195_v50  ;;  %vm7199_vm4 = vmpackc.low %vm8527_vm2, %vm5067_vm6  ;;  %v8215_v52 = vand.u32 4294901760, %v7170_v56  ;;  %v8534_v8 = vand.u32 4294901760, %v6906_v59  ;;  %4434 = vmatprep.subr.bf16.mxu0 %v7193_v4  ;;  %4682 = vmatpush1.bf16.msra.mxu1 %v7195_v50  ;;  %v8214_v3 = vand.u32 4294901760, %v6937_v36  ;;  %v8550_v41 = vand.u32 4294901760, %v7126_v15  ;;  %v8579_v50 = vld [vmem:[#allocation118_spill] sm:$0xff] }
 0x276   :  { %v8529_v23 = vsel %vm7199_vm4, 4294967295, %v8528_v23  ;;  %v7206_v57 = vsub.f32 %v6792_v11, %v8531_v1  ;;  %v4443_v16 = vpack.c.bf16 %v8532_v9, %v2234_v27  ;;  %v4691_v18 = vpack.c.bf16 %v8533_v38, %v3336_v24  ;;  %v8539_v27 = vld [vmem:[#allocation42_spill] sm:$0xff] }
 0x277   :  { %8530 = vst [vmem:[#allocation7_spill] sm:$0xff] %v8529_v23  ;;  %v7219_v20 = vsub.f32 %v6906_v59, %v8534_v8  ;;  %v7224_v11 = vsub.f32 %v6965_v0, %v3227_v62  ;;  %v7233_v24 = vsub.f32 %v7042_v43, %v2131_v28  ;;  %v8536_v59 = vand.u32 4294901760, %v7022_v32  ;;  %4685 = vmatprep.subr.msk.bf16.mxu1 %vm7199_vm4, %v8539_v27  ;;  %v8576_v27 = vld [vmem:[#allocation60_spill] sm:$0xff] }
 0x278   :  { %v8537_v0 = vand.u32 4294901760, %v7046_v54  ;;  %v8540_v43 = vand.u32 4294901760, %v7057_v6  ;;  %v8542_v54 = vand.u32 4294901760, %v7030_v22  ;;  %v7265_v9 = vsub.f32 %v1899_v61, %v2141_v31 }
 0x279   :  { %8535 = vst [vmem:[#allocation157_spill] sm:$0xff] %v7224_v11  ;;  %v7238_v8 = vsub.f32 %v7022_v32, %v8536_v59  ;;  %v8541_v32 = vand.u32 4294901760, %v6918_v14  ;;  %v7267_v1 = vsub.f32 %v1900_v5, %v3239_v49  ;;  %4688 = vmatpush1.bf16.msk.msra.mxu1 %vm7199_vm4, %v6178_v60  ;;  %v8545_v5 = vand.u32 4294901760, %v7094_v33 }
 0x27a   :  { %v7242_v62 = vpack.c.bf16 %v2147_v29, %v8537_v0  ;;  %v7252_v28 = vsub.f32 %v7057_v6, %v8540_v43  ;;  %v7260_v59 = vsub.f32 %v7030_v22, %v8542_v54  ;;  %v7263_v0 = vsub.f32 %v7102_v46, %v3243_v55  ;;  %v8543_v43 = vld [vmem:[#allocation41_spill] sm:$0xff] }
 0x27b   :  { %v2353_v38 = vsub.f32 %v6918_v14, %v8541_v32  ;;  %v7270_v6 = vsub.f32 %v1914_v37, %v2147_v29  ;;  %v2365_v22 = vsub.f32 %v6937_v36, %v8214_v3  ;;  %v8544_v46 = vand.u32 4294901760, %v7050_v39  ;;  %v8546_v37 = vld [vmem:[#allocation18_spill] sm:$0xff]  ;;  %v8555_v32 = vld [vmem:[#allocation136_spill] sm:$0xff] }
 0x27c   :  { %8538 = vst [vmem:[#allocation158_spill] sm:$0xff] %v7242_v62  ;;  %4436 = vmatpush1.bf16.msra.mxu0 %v7242_v62  ;;  %v7291_v55 = vsub.f32 %v7094_v33, %v8545_v5  ;;  %4690 = vmatprep.subr.bf16.mxu1 %v8546_v37  ;;  %v7297_v29 = vsub.f32 %v7170_v56, %v8215_v52  ;;  %v8547_v54 = vand.u32 4294901760, %v7036_v34  ;;  %v8549_v33 = vand.u32 4294901760, %v7098_v19  ;;  %v8559_v52 = vld [vmem:[#allocation6_spill] sm:$0xff] }
 0x27d   :  { %4439 = vmatprep.subr.msk.bf16.mxu0 %vm7199_vm4, %v8543_v43  ;;  %v7286_v61 = vsub.f32 %v7050_v39, %v8544_v46  ;;  %v8548_v39 = vand.u32 4294901760, %v7070_v40  ;;  %v2354_v37 = vand.u32 4294901760, %v2353_v38  ;;  %v7319_v58 = vsub.f32 %v7126_v15, %v8550_v41  ;;  %v8557_v38 = vld [vmem:[#allocation137_spill] sm:$0xff] }
 0x27e   :  { %v7303_v3 = vsub.f32 %v7036_v34, %v8547_v54  ;;  %v7313_v5 = vsub.f32 %v7098_v19, %v8549_v33  ;;  %v8551_v34 = vld [vmem:[#allocation82_spill] sm:$0xff]  ;;  %v8552_v54 = vld [vmem:[#allocation116_spill] sm:$0xff]  ;;  %v8556_v49 = vand.u32 4294901760, %v8555_v32  ;;  %v8558_v33 = vand.u32 4294901760, %v8557_v38  ;;  %v8566_v38 = vld [vmem:[#allocation117_spill] sm:$0xff] }
 0x27f   :  { %v7308_v46 = vsub.f32 %v7070_v40, %v8548_v39  ;;  %3288 = vmatmul.mubr.f32.vlgmr.msra.gmra.mrb[2].mxu1 %v8552_v54  ;;  %v8553_v40 = vld [vmem:[#allocation122_spill] sm:$0xff]  ;;  %v8560_v31 = vand.u32 4294901760, %v8559_v52  ;;  %v8561_v15 = vand.u32 4294901760, %v7155_v26  ;;  %v8564_v52 = vld [vmem:[#allocation33_spill] sm:$0xff]  ;;  %v8570_v43 = vand.u32 4294901760, %v7219_v20 }
 0x280   :  { %4442 = vmatpush1.bf16.msk.msra.mxu0 %vm7199_vm4, %v8551_v34  ;;  %v8554_v39 = vand.u32 4294901760, %v8553_v40  ;;  %4692 = vmatpush1.bf16.msra.mxu1 %v4691_v18  ;;  %v2366_v34 = vand.u32 4294901760, %v2365_v22  ;;  %v8562_v40 = vand.u32 4294901760, %v7206_v57  ;;  %v8220_v18 = vand.u32 4294901760, %v7291_v55 }
 0x281   :  { %v7335_v60 = vpack.c.bf16 %v8560_v31, %v8558_v33  ;;  %v7340_v41 = vsub.f32 %v7155_v26, %v8561_v15  ;;  %4444 = vmatprep.subr.bf16.mxu0 %v4443_v16  ;;  %4694 = vmatprep.subr.bf16.mxu1 %v8564_v52  ;;  %v8565_v26 = vand.u32 4294901760, %v6845_v25  ;;  %v8567_v15 = vand.u32 4294901760, %v6945_v12  ;;  %v8569_v31 = vld [vmem:[#allocation26_spill] sm:$0xff] }
 0x282   :  { %v7329_v19 = vpack.c.bf16 %v8556_v49, %v8554_v39  ;;  %v7345_v32 = vsub.f32 %v7206_v57, %v8562_v40  ;;  %v8563_v49 = vand.u32 4294901760, %v6925_v2  ;;  %3298 = vmatprep.mubr.f32.mxu1 %v8566_v38  ;;  %v7363_v33 = vpack.c.bf16 %v2366_v34, %v2354_v37  ;;  %v8572_v52 = vld [vmem:[#allocation34_spill] sm:$0xff] }
 0x283   :  { %v7357_v16 = vsub.f32 %v6845_v25, %v8565_v26  ;;  %2192 = vmatmul.mubr.f32.vlgmr.msra.gmra.mrb[2].mxu0 %v8552_v54  ;;  %v7368_v40 = vsub.f32 %v6945_v12, %v8567_v15  ;;  %v2401_v22 = vsub.f32 %v7291_v55, %v8220_v18  ;;  %v2413_v37 = vsub.f32 %v7219_v20, %v8570_v43  ;;  %v8571_v15 = vld [vmem:[#allocation31_spill] sm:$0xff]  ;;  %v8573_v26 = vld [vmem:[#allocation124_spill] sm:$0xff] }
 0x284   :  { %v7350_v39 = vsub.f32 %v6925_v2, %v8563_v49  ;;  %v8568_v49 = vld [vmem:[#allocation141_spill] sm:$0xff]  ;;  %4446 = vmatpush1.bf16.msra.mxu0 %v8569_v31  ;;  %2202 = vmatprep.mubr.f32.mxu0 %v8566_v38  ;;  %v8574_v18 = vand.u32 4294901760, %v7313_v5  ;;  %v8575_v43 = vand.u32 4294901760, %v7173_v7  ;;  %v8578_v31 = vand.u32 4294901760, %v7260_v59 }
 0x285   :  { %4448 = vmatprep.subr.bf16.mxu0 %v8571_v15  ;;  %4696 = vmatpush1.bf16.msra.mxu1 %v8572_v52  ;;  %v2402_v54 = vand.u32 4294901760, %v2401_v22  ;;  %v2414_v38 = vand.u32 4294901760, %v2413_v37  ;;  %v8577_v15 = vand.u32 4294901760, %v7238_v8  ;;  %v8581_v22 = vld [vmem:[#allocation32_spill] sm:$0xff]  ;;  %v8607_v51 = vand.u32 4294901760, %v7224_v11 }
 0x286   :  { %v3497_v23 = vsub.f32 %v7313_v5, %v8574_v18  ;;  %v2419_v34 = vsub.f32 %v7173_v7, %v8575_v43  ;;  %4698 = vmatprep.subr.bf16.mxu1 %v8576_v27  ;;  %v2407_v62 = vsub.f32 %v7260_v59, %v8578_v31  ;;  %3304 = vmatmul.mubr.f32.gmra.mrb[4].mxu1 %v8579_v50  ;;  %v8580_v27 = vld [vmem:[#allocation121_spill] sm:$0xff]  ;;  %v8583_v31 = vand.u32 4294901760, %v7184_v45  ;;  %v8587_v43 = vld [vmem:[#allocation130_spill] sm:$0xff] }
 0x287   :  { %v3509_v52 = vsub.f32 %v7238_v8, %v8577_v15  ;;  %2208 = vmatmul.mubr.f32.gmra.mrb[4].mxu0 %v8579_v50  ;;  %3314 = vmatprep.mubr.f32.mxu1 %v8580_v27  ;;  %v7405_v37 = vpack.c.bf16 %v2414_v38, %v2402_v54  ;;  %v8586_v50 = vand.u32 4294901760, %v8568_v49  ;;  %v8588_v54 = vand.u32 4294901760, %v7303_v3 }
 0x288   :  { %v3498_v4 = vand.u32 4294901760, %v3497_v23  ;;  %v2420_v47 = vand.u32 4294901760, %v2419_v34  ;;  %4450 = vmatpush1.bf16.msra.mxu0 %v8581_v22  ;;  %v2408_v35 = vand.u32 4294901760, %v2407_v62  ;;  %v3515_v17 = vsub.f32 %v7184_v45, %v8583_v31  ;;  %2218 = vmatprep.mubr.f32.mxu0 %v8580_v27  ;;  %v8584_v23 = vld [vmem:[#allocation59_spill] sm:$0xff]  ;;  %v8590_v31 = vld [vmem:[#allocation84_spill] sm:$0xff] }
 0x289   :  { %8582 = vst [vmem:[#allocation18_spill] sm:$0xff] %v7405_v37  ;;  %v3510_v15 = vand.u32 4294901760, %v3509_v52  ;;  %4452 = vmatprep.subr.bf16.mxu0 %v8584_v23  ;;  %v8585_v34 = vld [vmem:[#allocation63_spill] sm:$0xff]  ;;  %v3467_v18 = vsub.f32 %v8568_v49, %v8586_v50  ;;  %v3485_v62 = vsub.f32 %v7303_v3, %v8588_v54  ;;  %v8589_v38 = vand.u32 4294901760, %v7286_v61 }
 0x28a   :  { %4700 = vmatpush1.bf16.msra.mxu1 %v8585_v34  ;;  %v7428_v13 = vpack.c.bf16 %v2420_v47, %v2408_v35  ;;  %v8592_v50 = vld [vmem:[#allocation119_spill] sm:$0xff]  ;;  %v3450_v22 = vand.u32 4294901760, %v7345_v32  ;;  %v3462_v54 = vand.u32 4294901760, %v7350_v39  ;;  %v3516_v10 = vand.u32 4294901760, %v3515_v17 }
 0x28b   :  { %v3503_v52 = vsub.f32 %v7286_v61, %v8589_v38  ;;  %4702 = vmatprep.subr.bf16.mxu1 %v8590_v31  ;;  %v7426_v34 = vpack.c.bf16 %v3510_v15, %v3498_v4  ;;  %3320 = vmatmul.mubr.f32.gmra.mrb[6].mxu1 %v8592_v50  ;;  %v8593_v38 = vld [vmem:[#allocation46_spill] sm:$0xff]  ;;  %v8594_v31 = vld [vmem:[#allocation61_spill] sm:$0xff]  ;;  %v2372_v23 = vand.u32 4294901760, %v7357_v16  ;;  %v3456_v4 = vand.u32 4294901760, %v7368_v40  ;;  %v8597_v17 = vld [vmem:[#allocation79_spill] sm:$0xff] }
 0x28c   :  { %8591 = vst [vmem:[#allocation116_spill] sm:$0xff] %v7428_v13  ;;  %2224 = vmatmul.mubr.f32.gmra.mrb[6].mxu0 %v8592_v50  ;;  %3591 = vmatprep.mubr.f32.mxu1 %v8593_v38  ;;  %v8595_v47 = vand.u32 4294901760, %v8573_v26  ;;  %v8596_v32 = vand.u32 4294901760, %v7308_v46  ;;  %v8598_v15 = vld [vmem:[#allocation85_spill] sm:$0xff]  ;;  %v8599_v50 = vand.u32 4294901760, %v8587_v43  ;;  %v8600_v40 = vld [vmem:[#allocation120_spill] sm:$0xff] }
 0x28d   :  { %v3504_v42 = vand.u32 4294901760, %v3503_v52  ;;  %4454 = vmatpush1.bf16.msra.mxu0 %v8594_v31  ;;  %2495 = vmatprep.mubr.f32.mxu0 %v8593_v38  ;;  %v3468_v52 = vand.u32 4294901760, %v3467_v18  ;;  %v8601_v31 = vand.u32 4294901760, %v8600_v40  ;;  %v8604_v38 = vand.u32 4294901760, %v7233_v24  ;;  %v8610_v13 = vld [vmem:[#allocation80_spill] sm:$0xff] }
 0x28e   :  { %v2377_v35 = vsub.f32 %v8573_v26, %v8595_v47  ;;  %v2389_v39 = vsub.f32 %v7308_v46, %v8596_v32  ;;  %4456 = vmatprep.subr.bf16.mxu0 %v8597_v17  ;;  %4704 = vmatpush1.bf16.msra.mxu1 %v8598_v15  ;;  %v3473_v16 = vsub.f32 %v8587_v43, %v8599_v50  ;;  %v3486_v32 = vand.u32 4294901760, %v3485_v62  ;;  %v8609_v62 = vld [vmem:[#allocation81_spill] sm:$0xff] }
 0x28f   :  { %v2383_v27 = vsub.f32 %v8600_v40, %v8601_v31  ;;  %v7453_v47 = vpack.c.bf16 %v3516_v10, %v3504_v42  ;;  %4706 = vmatprep.subr.bf16.mxu1 %v8603_v63  ;;  %v2395_v17 = vsub.f32 %v7233_v24, %v8604_v38  ;;  %v8606_v15 = vand.u32 4294901760, %v8605_v30  ;;  %v8608_v10 = vld [vmem:[#allocation75_spill] sm:$0xff] }
 0x290   :  { %v3491_v50 = vsub.f32 %v7224_v11, %v8607_v51  ;;  %v4709_v38 = vpack.c.bf16 %v3462_v54, %v3450_v22  ;;  %v2378_v37 = vand.u32 4294901760, %v2377_v35  ;;  %v8612_v51 = vld [vmem:[#allocation138_spill] sm:$0xff]  ;;  %v4711_v42 = vpack.c.bf16 %v3468_v52, %v3456_v4 }
 0x291   :  { %8602 = vst [vmem:[#allocation122_spill] sm:$0xff] %v7453_v47  ;;  %v3479_v18 = vsub.f32 %v8605_v30, %v8606_v15  ;;  %4458 = vmatpush1.bf16.msra.mxu0 %v8610_v13  ;;  %v8611_v47 = vand.u32 4294901760, %v7297_v29  ;;  %v3532_v30 = vand.u32 4294901760, %v7340_v41  ;;  %v2390_v21 = vand.u32 4294901760, %v2389_v39 }
 0x292   :  { %4460 = vmatprep.subr.bf16.mxu0 %v8612_v51  ;;  %4708 = vmatpush1.bf16.msra.mxu1 %v7335_v60  ;;  %v3474_v11 = vand.u32 4294901760, %v3473_v16  ;;  %v3538_v63 = vand.u32 4294901760, %v7263_v0  ;;  %v2384_v31 = vand.u32 4294901760, %v2383_v27  ;;  %v2396_v53 = vand.u32 4294901760, %v2395_v17  ;;  %v8615_v16 = vld [vmem:[#allocation87_spill] sm:$0xff] }
 0x293   :  { %v4465_v15 = vpack.c.bf16 %v2372_v23, %v8611_v47  ;;  %4710 = vmatprep.subr.bf16.mxu1 %v4709_v38  ;;  %v3492_v13 = vand.u32 4294901760, %v3491_v50  ;;  %v2424_v22 = vand.u32 4294901760, %v7265_v9  ;;  %v3480_v23 = vand.u32 4294901760, %v3479_v18 }
 0x294   :  { %v4713_v29 = vpack.c.bf16 %v3486_v32, %v3474_v11  ;;  %v8613_v54 = vand.u32 4294901760, %v7319_v58  ;;  %v8614_v47 = vand.u32 4294901760, %v7252_v28  ;;  %v3533_v4 = vsub.f32 %v7340_v41, %v3532_v30  ;;  %v8638_v11 = vld [vmem:[#allocation157_spill] sm:$0xff] }
 0x295   :  { %4462 = vmatpush1.bf16.msra.mxu0 %v7329_v19  ;;  %v2442_v27 = vand.u32 4294901760, %v7270_v6  ;;  %v3539_v52 = vsub.f32 %v7263_v0, %v3538_v63  ;;  %v3546_v32 = vand.u32 4294901760, %v8615_v16  ;;  %v4467_v18 = vpack.c.bf16 %v2390_v21, %v2378_v37 }
 0x296   :  { %v2437_v35 = vsub.f32 %v7319_v58, %v8613_v54  ;;  %v3521_v60 = vsub.f32 %v7252_v28, %v8614_v47  ;;  %4464 = vmatprep.subr.bf16.mxu0 %v7363_v33  ;;  %4712 = vmatpush1.bf16.msra.mxu1 %v4711_v42  ;;  %v4469_v50 = vpack.c.bf16 %v2396_v53, %v2384_v31  ;;  %v8616_v33 = vand.u32 4294901760, %v7189_v44 }
 0x297   :  { %4714 = vmatprep.subr.bf16.mxu1 %v4713_v29  ;;  %v4715_v38 = vpack.c.bf16 %v3492_v13, %v3480_v23  ;;  %v2425_v51 = vsub.f32 %v7265_v9, %v2424_v22  ;;  %v8617_v16 = vand.u32 4294901760, %v7267_v1  ;;  %v3534_v19 = vand.u32 4294901760, %v3533_v4 }
 0x298   :  { %v2438_v54 = vand.u32 4294901760, %v2437_v35  ;;  %v3522_v47 = vand.u32 4294901760, %v3521_v60  ;;  %v2431_v42 = vsub.f32 %v7189_v44, %v8616_v33  ;;  %v2443_v17 = vsub.f32 %v7270_v6, %v2442_v27 }
 0x299   :  { %v3527_v39 = vsub.f32 %v7267_v1, %v8617_v16  ;;  %4466 = vmatpush1.bf16.msra.mxu0 %v4465_v15  ;;  %v8618_v21 = vand.u32 4294901760, %v6918_v14  ;;  %v8619_v53 = vand.u32 4294901760, %v6937_v36  ;;  %v8620_v31 = vand.u32 4294901760, %v7206_v57 }
 0x29a   :  { %v8621_v13 = vand.u32 4294901760, %v6925_v2  ;;  %4468 = vmatprep.subr.bf16.mxu0 %v4467_v18  ;;  %4716 = vmatpush1.bf16.msra.mxu1 %v4715_v38  ;;  %v3540_v23 = vand.u32 4294901760, %v3539_v52  ;;  %v8622_v15 = vand.u32 4294901760, %v7170_v56  ;;  %v8623_v35 = vand.u32 4294901760, %v6845_v25 }
 0x29b   :  { %v7511_v37 = vpack.c.bf16 %v8619_v53, %v8618_v21  ;;  %v8625_v4 = vand.u32 4294901760, %v6945_v12  ;;  %v8626_v33 = vand.u32 4294901760, %v8568_v49  ;;  %v8627_v21 = vand.u32 4294901760, %v8573_v26  ;;  %4718 = vmatprep.subr.bf16.mxu1 %v7426_v34 }
 0x29c   :  { %v7517_v29 = vpack.c.bf16 %v8621_v13, %v8620_v31  ;;  %v7523_v60 = vpack.c.bf16 %v8623_v35, %v8622_v15  ;;  %v8628_v53 = vand.u32 4294901760, %v7308_v46  ;;  %v8630_v52 = vand.u32 4294901760, %v8587_v43 }
 0x29d   :  { %v7529_v16 = vpack.c.bf16 %v8626_v33, %v8625_v4  ;;  %v8631_v18 = vand.u32 4294901760, %v7303_v3  ;;  %v8633_v13 = vand.u32 4294901760, %v8600_v40  ;;  %v8634_v15 = vand.u32 4294901760, %v7233_v24  ;;  %v8636_v4 = vld [vmem:[#allocation131_spill] sm:$0xff]  ;;  %4470 = vmatpush1.bf16.msra.mxu0 %v4469_v50  ;;  %v8662_v50 = vld [vmem:[#allocation78_spill] sm:$0xff] }
 0x29e   :  { %8624 = vst [vmem:[#allocation136_spill] sm:$0xff] %v7523_v60  ;;  %v7535_v31 = vpack.c.bf16 %v8628_v53, %v8627_v21  ;;  %v8637_v33 = vand.u32 4294901760, %v8636_v4  ;;  %v8639_v60 = vand.u32 4294901760, %v8638_v11  ;;  %v8641_v34 = vand.u32 4294901760, %v7291_v55 }
 0x29f   :  { %v7542_v38 = vpack.c.bf16 %v8631_v18, %v8630_v52  ;;  %v7548_v35 = vpack.c.bf16 %v8634_v15, %v8633_v13  ;;  %v8642_v53 = vand.u32 4294901760, %v7219_v20  ;;  %v8644_v52 = vand.u32 4294901760, %v7313_v5 }
 0x2a0   :  { %8629 = vst [vmem:[#allocation137_spill] sm:$0xff] %v7535_v31  ;;  %v7554_v21 = vpack.c.bf16 %v8639_v60, %v8637_v33  ;;  %v8645_v18 = vand.u32 4294901760, %v7238_v8  ;;  %v8647_v13 = vand.u32 4294901760, %v7260_v59  ;;  %v8648_v15 = vand.u32 4294901760, %v7173_v7 }
 0x2a1   :  { %8632 = vst [vmem:[#allocation6_spill] sm:$0xff] %v7542_v38  ;;  %8635 = vst [vmem:[#allocation33_spill] sm:$0xff] %v7548_v35  ;;  %v7560_v31 = vpack.c.bf16 %v8642_v53, %v8641_v34  ;;  %v8650_v60 = vand.u32 4294901760, %v7286_v61  ;;  %v8651_v33 = vand.u32 4294901760, %v7184_v45  ;;  %v8652_v34 = vand.u32 4294901760, %v7319_v58 }
 0x2a2   :  { %8640 = vst [vmem:[#allocation117_spill] sm:$0xff] %v7554_v21  ;;  %v7566_v38 = vpack.c.bf16 %v8645_v18, %v8644_v52  ;;  %v7572_v35 = vpack.c.bf16 %v8648_v15, %v8647_v13  ;;  %v8654_v52 = vand.u32 4294901760, %v7252_v28  ;;  %v8658_v15 = vand.u32 4294901760, %v7267_v1 }
 0x2a3   :  { %8643 = vst [vmem:[#allocation141_spill] sm:$0xff] %v7560_v31  ;;  %v7578_v21 = vpack.c.bf16 %v8651_v33, %v8650_v60  ;;  %v7582_v53 = vpack.c.bf16 %v8652_v34, %v2424_v22  ;;  %v4721_v31 = vpack.c.bf16 %v3534_v19, %v3522_v47  ;;  %v8660_v60 = vld [vmem:[#allocation18_spill] sm:$0xff]  ;;  %v2426_v22 = vand.u32 4294901760, %v2425_v51 }
 0x2a4   :  { %8646 = vst [vmem:[#allocation26_spill] sm:$0xff] %v7566_v38  ;;  %8649 = vst [vmem:[#allocation31_spill] sm:$0xff] %v7572_v35  ;;  %v7586_v18 = vpack.c.bf16 %v3532_v30, %v8654_v52  ;;  %v8656_v38 = vand.u32 4294901760, %v7189_v44  ;;  %v7594_v35 = vpack.c.bf16 %v3538_v63, %v8658_v15  ;;  %4472 = vmatprep.subr.bf16.mxu0 %v8660_v60  ;;  %v8661_v33 = vld [vmem:[#allocation122_spill] sm:$0xff]  ;;  %v3528_v34 = vand.u32 4294901760, %v3527_v39  ;;  %v8666_v63 = vld [vmem:[#allocation116_spill] sm:$0xff] }
 0x2a5   :  { %8653 = vst [vmem:[#allocation34_spill] sm:$0xff] %v7582_v53  ;;  %4720 = vmatpush1.bf16.msra.mxu1 %v8661_v33  ;;  %v2444_v19 = vand.u32 4294901760, %v2443_v17  ;;  %v8663_v47 = vand.u32 4294901760, %v8662_v50  ;;  %v4475_v52 = vpack.c.bf16 %v2438_v54, %v2426_v22  ;;  %4474 = vmatpush1.bf16.msra.mxu0 %v8666_v63  ;;  %v2432_v15 = vand.u32 4294901760, %v2431_v42  ;;  %v8667_v60 = vld [vmem:[#allocation15_spill] sm:$0xff]  ;;  %v8676_v22 = vld [vmem:[#allocation21_spill] sm:$0xff] }
 0x2a6   :  { %8655 = vst [vmem:[#allocation124_spill] sm:$0xff] %v7586_v18  ;;  %v7590_v13 = vpack.c.bf16 %v2442_v27, %v8656_v38  ;;  %8659 = vst [vmem:[#allocation118_spill] sm:$0xff] %v7594_v35  ;;  %4722 = vmatprep.subr.bf16.mxu1 %v4721_v31  ;;  %v4723_v53 = vpack.c.bf16 %v3540_v23, %v3528_v34  ;;  %v8664_v27 = vld [vmem:[#allocation86_spill] sm:$0xff]  ;;  %v4725_v35 = vpack.c.bf16 %v8667_v60, %v3546_v32  ;;  %v8668_v23 = vld [vmem:[#allocation11_spill] sm:$0xff] }
 0x2a7   :  { %v2455_v30 = vsub.f32 %v8662_v50, %v8663_v47  ;;  %v2450_v38 = vand.u32 4294901760, %v8664_v27  ;;  %4476 = vmatprep.subr.bf16.mxu0 %v4475_v52  ;;  %v4477_v39 = vpack.c.bf16 %v2444_v19, %v2432_v15  ;;  %v8671_v32 = vld [vmem:[#allocation88_spill] sm:$0xff]  ;;  %v8672_v42 = vpack.c.bf16 %v8608_v10, %v6801_v48  ;;  %v8685_v15 = vld [vmem:[#allocation27_spill] sm:$0xff] }
 0x2a8   :  { %8657 = vst [vmem:[#allocation60_spill] sm:$0xff] %v7590_v13  ;;  %v8665_v13 = vld [vmem:[#allocation89_spill] sm:$0xff]  ;;  %v8678_v19 = vld [vmem:[#allocation96_spill] sm:$0xff] }
 0x2a9   :  { %v3552_v18 = vand.u32 4294901760, %v8665_v13  ;;  %4724 = vmatpush1.bf16.msra.mxu1 %v4723_v53  ;;  %v2456_v17 = vand.u32 4294901760, %v2455_v30  ;;  %v4479_v51 = vpack.c.bf16 %v8667_v60, %v2450_v38  ;;  %4478 = vmatpush1.bf16.msra.mxu0 %v4477_v39  ;;  %v8669_v13 = vld [vmem:[#allocation8_spill] sm:$0xff]  ;;  %v8680_v30 = vld [vmem:[#allocation14_spill] sm:$0xff]  ;;  %v8683_v38 = vld [vmem:[#allocation17_spill] sm:$0xff] }
 0x2aa   :  { %4726 = vmatprep.subr.bf16.mxu1 %v4725_v35  ;;  %v8670_v33 = vpack.c.bf16 %v8668_v23, %v8669_v13  ;;  %v8673_v35 = vld [vmem:[#allocation139_spill] sm:$0xff]  ;;  %v8679_v47 = vld [vmem:[#allocation16_spill] sm:$0xff]  ;;  %v8692_v23 = vld [vmem:[#allocation102_spill] sm:$0xff] }
 0x2ab   :  { %v4727_v31 = vpack.c.bf16 %v8667_v60, %v3552_v18  ;;  %4480 = vmatprep.subr.bf16.mxu0 %v4479_v51  ;;  %v4481_v54 = vpack.c.bf16 %v8667_v60, %v2456_v17  ;;  %v8674_v53 = vpack.c.bf16 %v8609_v62, %v8673_v35  ;;  %v8675_v18 = vld [vmem:[#allocation28_spill] sm:$0xff]  ;;  %v8681_v52 = vpack.c.bf16 %v8679_v47, %v8680_v30  ;;  %v8688_v17 = vld [vmem:[#allocation55_spill] sm:$0xff]  ;;  %v8693_v13 = vld [vmem:[#allocation25_spill] sm:$0xff] }
 0x2ac   :  { %v8677_v34 = vpack.c.bf16 %v8675_v18, %v8676_v22  ;;  %v8682_v27 = vld [vmem:[#allocation24_spill] sm:$0xff]  ;;  %v8689_v51 = vld [vmem:[#allocation47_spill] sm:$0xff] }
 0x2ad   :  { %4728 = vmatpush1.bf16.msra.mxu1 %v4727_v31  ;;  %4482 = vmatpush1.bf16.msra.mxu0 %v4481_v54  ;;  %v8684_v63 = vpack.c.bf16 %v8682_v27, %v8683_v38  ;;  %v8686_v60 = vld [vmem:[#allocation20_spill] sm:$0xff]  ;;  %v8690_v31 = vpack.c.bf16 %v8688_v17, %v8689_v51  ;;  %v8691_v54 = vld [vmem:[#allocation98_spill] sm:$0xff]  ;;  %v8703_v27 = vld [vmem:[#allocation65_spill] sm:$0xff] }
 0x2ae   :  { %4730 = vmatprep.subr.bf16.mxu1 %v8670_v33  ;;  %4484 = vmatprep.subr.bf16.mxu0 %v8672_v42  ;;  %v8687_v39 = vpack.c.bf16 %v8685_v15, %v8686_v60  ;;  %v8694_v33 = vld [vmem:[#allocation19_spill] sm:$0xff]  ;;  %v8697_v18 = vld [vmem:[#allocation44_spill] sm:$0xff]  ;;  %v8707_v60 = vld [vmem:[#allocation54_spill] sm:$0xff] }
 0x2af   :  { %v8695_v42 = vpack.c.bf16 %v8693_v13, %v8694_v33  ;;  %v8700_v47 = vld [vmem:[#allocation48_spill] sm:$0xff]  ;;  %v8710_v51 = vld [vmem:[#allocation115_spill] sm:$0xff] }
 0x2b0   :  { %3593 = vmatmul.mubr.f32.vlgmr.msra.gmra.mrb[2].mxu1 %v8671_v32  ;;  %2497 = vmatmul.mubr.f32.vlgmr.msra.gmra.mrb[2].mxu0 %v8671_v32  ;;  %v8706_v15 = vld [vmem:[#allocation52_spill] sm:$0xff]  ;;  %v8712_v33 = vld [vmem:[#allocation67_spill] sm:$0xff] }
 0x2b1   :  { %4732 = vmatpush1.bf16.msra.mxu1 %v8674_v53  ;;  %3599 = vmatprep.mubr.f32.mxu1 %v8678_v19  ;;  %v8696_v53 = vld [vmem:[#allocation51_spill] sm:$0xff] }
 0x2b2   :  { %4734 = vmatprep.subr.bf16.mxu1 %v8677_v34  ;;  %4486 = vmatpush1.bf16.msra.mxu0 %v8681_v52  ;;  %v8698_v22 = vpack.c.bf16 %v8696_v53, %v8697_v18  ;;  %v8699_v34 = vld [vmem:[#allocation53_spill] sm:$0xff]  ;;  %v8715_v18 = vld [vmem:[#allocation74_spill] sm:$0xff] }
 0x2b3   :  { %2503 = vmatprep.mubr.f32.mxu0 %v8678_v19  ;;  %4488 = vmatprep.subr.bf16.mxu0 %v8684_v63  ;;  %v8701_v30 = vpack.c.bf16 %v8699_v34, %v8700_v47  ;;  %v8702_v52 = vld [vmem:[#allocation73_spill] sm:$0xff]  ;;  %v8718_v47 = vld [vmem:[#allocation112_spill] sm:$0xff] }
 0x2b4   :  { %3601 = vmatmul.mubr.f32.gmra.mrb[4].mxu1 %v8691_v54  ;;  %2505 = vmatmul.mubr.f32.gmra.mrb[4].mxu0 %v8691_v54  ;;  %v8704_v38 = vpack.c.bf16 %v8702_v52, %v8703_v27  ;;  %v8705_v63 = vld [vmem:[#allocation101_spill] sm:$0xff]  ;;  %v8720_v27 = vld [vmem:[#allocation114_spill] sm:$0xff] }
 0x2b5   :  { %4736 = vmatpush1.bf16.msra.mxu1 %v8687_v39  ;;  %3607 = vmatprep.mubr.f32.mxu1 %v8692_v23  ;;  %v8708_v39 = vld [vmem:[#allocation45_spill] sm:$0xff] }
 0x2b6   :  { %4738 = vmatprep.subr.bf16.mxu1 %v8690_v31  ;;  %4490 = vmatpush1.bf16.msra.mxu0 %v8695_v42  ;;  %v8709_v17 = vpack.c.bf16 %v8707_v60, %v8708_v39  ;;  %v8711_v31 = vld [vmem:[#allocation127_spill] sm:$0xff]  ;;  %v8713_v42 = vld [vmem:[#allocation62_spill] sm:$0xff]  ;;  %v8722_v39 = vld [vmem:[#allocation68_spill] sm:$0xff] }
 0x2b7   :  { %2511 = vmatprep.mubr.f32.mxu0 %v8692_v23  ;;  %4492 = vmatprep.subr.bf16.mxu0 %v8698_v22  ;;  %v4745_v13 = vpack.c.bf16 %v8711_v31, %v8710_v51  ;;  %v8714_v53 = vpack.c.bf16 %v8712_v33, %v8713_v42  ;;  %v8716_v22 = vld [vmem:[#allocation66_spill] sm:$0xff]  ;;  %v8725_v33 = vld [vmem:[#allocation113_spill] sm:$0xff]  ;;  %v8726_v42 = vld [vmem:[#allocation128_spill] sm:$0xff] }
 0x2b8   :  { %3609 = vmatmul.mubr.f32.gmra.mrb[6].mxu1 %v8705_v63  ;;  %2513 = vmatmul.mubr.f32.gmra.mrb[6].mxu0 %v8705_v63  ;;  %v8717_v34 = vpack.c.bf16 %v8715_v18, %v8716_v22  ;;  %v4751_v18 = vpack.c.bf16 %v8568_v49, %v6945_v12  ;;  %v4753_v22 = vpack.c.bf16 %v7303_v3, %v8587_v43  ;;  %v8742_v49 = vld [vmem:[#allocation22_spill] sm:$0xff]  ;;  %v8744_v43 = vld [vmem:[#allocation56_spill] sm:$0xff] }
 0x2b9   :  { %4740 = vmatpush1.bf16.msra.mxu1 %v8701_v30  ;;  %3761 = vmatprep.mubr.f32.mxu1 %v8706_v15  ;;  %v8719_v30 = vld [vmem:[#allocation123_spill] sm:$0xff]  ;;  %v8728_v12 = vpack.c.bf16 %v7219_v20, %v7291_v55  ;;  %v4515_v3 = vpack.c.bf16 %v7319_v58, %v7265_v9  ;;  %v4517_v20 = vpack.c.bf16 %v7270_v6, %v7189_v44  ;;  %v8734_v58 = vld [vmem:[#allocation72_spill] sm:$0xff]  ;;  %v8739_v6 = vld [vmem:[#allocation29_spill] sm:$0xff] }
 0x2ba   :  { %4742 = vmatprep.subr.bf16.mxu1 %v8704_v38  ;;  %4494 = vmatpush1.bf16.msra.mxu0 %v8709_v17  ;;  %v4499_v52 = vpack.c.bf16 %v8719_v30, %v8718_v47  ;;  %v8721_v38 = vld [vmem:[#allocation125_spill] sm:$0xff]  ;;  %v8723_v17 = vld [vmem:[#allocation64_spill] sm:$0xff]  ;;  %v8740_v55 = vld [vmem:[#allocation103_spill] sm:$0xff] }
 0x2bb   :  { %2665 = vmatprep.mubr.f32.mxu0 %v8706_v15  ;;  %4496 = vmatprep.subr.bf16.mxu0 %v8714_v53  ;;  %v4747_v60 = vpack.c.bf16 %v8721_v38, %v8720_v27  ;;  %v8724_v63 = vpack.c.bf16 %v8722_v39, %v8723_v17  ;;  %v4749_v15 = vpack.c.bf16 %v6925_v2, %v7206_v57  ;;  %v8738_v44 = vld [vmem:[#allocation132_spill] sm:$0xff]  ;;  %v8751_v39 = vld [vmem:[#allocation106_spill] sm:$0xff] }
 0x2bc   :  { %v4501_v53 = vpack.c.bf16 %v8726_v42, %v8725_v33  ;;  %v4505_v2 = vpack.c.bf16 %v6845_v25, %v7170_v56  ;;  %v4507_v57 = vpack.c.bf16 %v7308_v46, %v8573_v26  ;;  %v4761_v25 = vpack.c.bf16 %v7340_v41, %v7252_v28  ;;  %v8731_v28 = vld [vmem:[#allocation71_spill] sm:$0xff]  ;;  %v8732_v46 = vld [vmem:[#allocation9_spill] sm:$0xff]  ;;  %v8743_v26 = vld [vmem:[#allocation30_spill] sm:$0xff] }
 0x2bd   :  { %4744 = vmatpush1.bf16.msra.mxu1 %v8717_v34  ;;  %v8729_v56 = vpack.c.bf16 %v7184_v45, %v7286_v61  ;;  %v8733_v45 = vld [vmem:[#allocation43_spill] sm:$0xff]  ;;  %v4767_v9 = vpack.c.bf16 %v8732_v46, %v8734_v58  ;;  %v8741_v41 = vld [vmem:[#allocation13_spill] sm:$0xff]  ;;  %v8752_v17 = vld [vmem:[#allocation58_spill] sm:$0xff] }
 0x2be   :  { %4746 = vmatprep.subr.bf16.mxu1 %v4745_v13  ;;  %4498 = vmatpush1.bf16.msra.mxu0 %v8724_v63  ;;  %v4503_v13 = vpack.c.bf16 %v6937_v36, %v6918_v14  ;;  %v4755_v63 = vpack.c.bf16 %v8638_v11, %v8636_v4  ;;  %v4509_v36 = vpack.c.bf16 %v7233_v24, %v8600_v40  ;;  %v8745_v40 = vld [vmem:[#allocation104_spill] sm:$0xff]  ;;  %v8746_v11 = vld [vmem:[#allocation107_spill] sm:$0xff]  ;;  %v8748_v34 = vld [vmem:[#allocation49_spill] sm:$0xff] }
 0x2bf   :  { %4500 = vmatprep.subr.bf16.mxu0 %v4499_v52  ;;  %v8727_v14 = vpack.c.bf16 %v7238_v8, %v7313_v5  ;;  %v4763_v24 = vpack.c.bf16 %v7263_v0, %v7267_v1  ;;  %v8730_v8 = vpack.c.bf16 %v7173_v7, %v7260_v59  ;;  %v4765_v5 = vpack.c.bf16 %v8732_v46, %v8731_v28  ;;  %v8735_v1 = vld [vmem:[#allocation12_spill] sm:$0xff]  ;;  %v8736_v59 = vld [vmem:[#allocation93_spill] sm:$0xff]  ;;  %v8737_v0 = vld [vmem:[#allocation134_spill] sm:$0xff] }
 0x2c0   :  { %v4519_v61 = vpack.c.bf16 %v8732_v46, %v8733_v45  ;;  %v4521_v7 = vpack.c.bf16 %v8732_v46, %v8662_v50  ;;  %v8747_v4 = vld [vmem:[#allocation23_spill] sm:$0xff]  ;;  %v8749_v52 = vld [vmem:[#allocation50_spill] sm:$0xff]  ;;  %v8763_v46 = vld [vmem:[#allocation144_spill] sm:$0xff] }
 0x2c1   :  { %4748 = vmatpush1.bf16.msra.mxu1 %v4747_v60  ;;  %v8750_v60 = vld [vmem:[#allocation76_spill] sm:$0xff] }
 0x2c2   :  { %4750 = vmatprep.subr.bf16.mxu1 %v4749_v15  ;;  %4502 = vmatpush1.bf16.msra.mxu0 %v4501_v53  ;;  %v8753_v15 = vld [vmem:[#allocation57_spill] sm:$0xff]  ;;  %v2038_v53 = vld [vmem:[%s8022_s4 + $0x8] sm:$0xff] }
 0x2c3   :  { %4504 = vmatprep.subr.bf16.mxu0 %v4503_v13  ;;  %v8754_v13 = vld [vmem:[#allocation69_spill] sm:$0xff] }
 0x2c5   :  { %4752 = vmatpush1.bf16.msra.mxu1 %v4751_v18  ;;  %v8755_v18 = vld [vmem:[#allocation77_spill] sm:$0xff] }
 0x2c6   :  { %4754 = vmatprep.subr.bf16.mxu1 %v4753_v22  ;;  %4506 = vmatpush1.bf16.msra.mxu0 %v4505_v2  ;;  %v2037_v22 = vld [vmem:[%s8022_s4] sm:$0xff]  ;;  %v8756_v2 = vld [vmem:[#allocation129_spill] sm:$0xff] }
 0x2c7   :  { %4508 = vmatprep.subr.bf16.mxu0 %v4507_v57  ;;  %v5068_v57 = vmov 0  }
 0x2c8   :  { %5015 = vset.pattern.permute.xlu1 %v5068_v57  ;;  %5014 = vset.pattern.permute.xlu0 %v5068_v57  ;;  %v8776_v57 = vld [vmem:[#allocation42_spill] sm:$0xff] }
 0x2c9   :  { %4756 = vmatpush1.bf16.msra.mxu1 %v4755_v63  ;;  %2047 = vperm.xlu1 %5015, %v2038_v53   ;;  %v8757_v63 = vld [vmem:[#allocation70_spill] sm:$0xff]  ;;  %v8774_v53 = vld [vmem:[#allocation155_spill] sm:$0xff] }
 0x2ca   :  { %4758 = vmatprep.subr.bf16.mxu1 %v8727_v14  ;;  %4510 = vmatpush1.bf16.msra.mxu0 %v4509_v36  ;;  %v2039_v36 = vld [vmem:[%s8022_s4 + $0x10] sm:$0xf]  ;;  %v8758_v14 = vld [vmem:[#allocation126_spill] sm:$0xff] }
 0x2cb   :  { %4512 = vmatprep.subr.bf16.mxu0 %v8728_v12  ;;  %2042 = vperm.xlu0 %5014, %v2037_v22   ;;  %v4281_v12 = vld [vmem:[%s8023_s5] sm:$0xff]  ;;  %v8775_v22 = vld [vmem:[#allocation156_spill] sm:$0xff] }
 0x2cd   :  { %4760 = vmatpush1.bf16.msra.mxu1 %v8729_v56  ;;  %v8760_v56 = vld [vmem:[#allocation142_spill] sm:$0xff]  ;;  %2052 = vperm.xlu1 %5015, %v2039_v36  }
 0x2ce   :  { %4762 = vmatprep.subr.bf16.mxu1 %v4761_v25  ;;  %4514 = vmatpush1.bf16.msra.mxu0 %v8730_v8  ;;  %v8759_v25 = vld [vmem:[#allocation133_spill] sm:$0xff]  ;;  %v8762_v8 = vld [vmem:[#allocation143_spill] sm:$0xff] }
 0x2cf   :  { %4516 = vmatprep.subr.bf16.mxu0 %v4515_v3  ;;  %v8761_v3 = vld [vmem:[#allocation135_spill] sm:$0xff]  ;;  %4286 = vperm.xlu0 %5014, %v4281_v12   ;;  %v8778_v12 = vld [vmem:[#allocation158_spill] sm:$0xff] }
 0x2d1   :  { %4764 = vmatpush1.bf16.msra.mxu1 %v4763_v24  ;;  %v4282_v24 = vld [vmem:[%s8023_s5 + $0x8] sm:$0xff] }
 0x2d2   :  { %4766 = vmatprep.subr.bf16.mxu1 %v4765_v5  ;;  %4518 = vmatpush1.bf16.msra.mxu0 %v4517_v20  ;;  %v4283_v5 = vld [vmem:[%s8023_s5 + $0x10] sm:$0xf]  ;;  %v8764_v20 = vld [vmem:[#allocation146_spill] sm:$0xff] }
 0x2d3   :  { %4520 = vmatprep.subr.bf16.mxu0 %v4519_v61  ;;  %4291 = vperm.xlu1 %5015, %v4282_v24   ;;  %v8765_v61 = vld [vmem:[#allocation145_spill] sm:$0xff] }
 0x2d4   :  { %4296 = vperm.xlu0 %5014, %v4283_v5   ;;  %v8779_v24 = vld [vmem:[#allocation41_spill] sm:$0xff]  ;;  %v8780_v5 = vld [vmem:[#allocation83_spill] sm:$0xff] }
 0x2d5   :  { %4768 = vmatpush1.bf16.msra.mxu1 %v4767_v9  ;;  %v8766_v9 = vld [vmem:[#allocation149_spill] sm:$0xff] }
 0x2d6   :  { %4770 = vmatprep.subr.bf16.mxu1 %v8735_v1  ;;  %4522 = vmatpush1.bf16.msra.mxu0 %v4521_v7  ;;  %v8767_v7 = vld [vmem:[#allocation147_spill] sm:$0xff] }
 0x2d7   :  { %4524 = vmatprep.subr.bf16.mxu0 %v8737_v0 }
 0x2d8   :  { %3764 = vmatmul.mubr.f32.vlgmr.msra.gmra.mrb[2].mxu1 %v8736_v59 }
 0x2d9   :  { %4772 = vmatpush1.bf16.msra.mxu1 %v8738_v44  ;;  %3771 = vmatprep.mubr.f32.mxu1 %v8740_v55 }
 0x2da   :  { %4774 = vmatprep.subr.bf16.mxu1 %v8739_v6  ;;  %2668 = vmatmul.mubr.f32.vlgmr.msra.gmra.mrb[2].mxu0 %v8736_v59  ;;  %v8768_v59 = vld [vmem:[#allocation153_spill] sm:$0xff] }
 0x2db   :  { %4526 = vmatpush1.bf16.msra.mxu0 %v8741_v41  ;;  %2675 = vmatprep.mubr.f32.mxu0 %v8740_v55  ;;  %v8769_v55 = vld [vmem:[#allocation151_spill] sm:$0xff] }
 0x2dc   :  { %4528 = vmatprep.subr.bf16.mxu0 %v8742_v49  ;;  %3774 = vmatmul.mubr.f32.gmra.mrb[4].mxu1 %v8745_v40 }
 0x2dd   :  { %4776 = vmatpush1.bf16.msra.mxu1 %v8743_v26  ;;  %3781 = vmatprep.mubr.f32.mxu1 %v8746_v11 }
 0x2de   :  { %4778 = vmatprep.subr.bf16.mxu1 %v8744_v43  ;;  %2678 = vmatmul.mubr.f32.gmra.mrb[4].mxu0 %v8745_v40  ;;  %v8770_v40 = vld [vmem:[#allocation152_spill] sm:$0xff] }
 0x2df   :  { %4530 = vmatpush1.bf16.msra.mxu0 %v8747_v4  ;;  %2685 = vmatprep.mubr.f32.mxu0 %v8746_v11  ;;  %v8771_v11 = vld [vmem:[#allocation150_spill] sm:$0xff] }
 0x2e0   :  { %4532 = vmatprep.subr.bf16.mxu0 %v8748_v34  ;;  %3784 = vmatmul.mubr.f32.gmra.mrb[6].mxu1 %v8751_v39 }
 0x2e1   :  { %4780 = vmatpush1.bf16.msra.mxu1 %v8749_v52  ;;  %3897 = vmatprep.mubr.f32.mxu1 %v8752_v17 }
 0x2e2   :  { %4782 = vmatprep.subr.bf16.mxu1 %v8750_v60  ;;  %2688 = vmatmul.mubr.f32.gmra.mrb[6].mxu0 %v8751_v39  ;;  %v8772_v39 = vld [vmem:[#allocation154_spill] sm:$0xff] }
 0x2e3   :  { %4534 = vmatpush1.bf16.msra.mxu0 %v8753_v15  ;;  %2801 = vmatprep.mubr.f32.mxu0 %v8752_v17  ;;  %v8773_v17 = vld [vmem:[#allocation148_spill] sm:$0xff] }
 0x2e4   :  { %4536 = vmatprep.subr.bf16.mxu0 %v8754_v13 }
 0x2e5   :  { %4784 = vmatpush1.bf16.msra.mxu1 %v8755_v18 }
 0x2e6   :  { %4786 = vmatprep.subr.bf16.mxu1 %v8756_v2 }
 0x2e7   :  { %4538 = vmatpush1.bf16.msra.mxu0 %v8757_v63 }
 0x2e8   :  { %4540 = vmatprep.subr.bf16.mxu0 %v8758_v14 }
 0x2e9   :  { %4788 = vmatpush1.bf16.msra.mxu1 %v8759_v25 }
 0x2ea   :  { %4790 = vmatprep.subr.bf16.mxu1 %v8760_v56 }
 0x2eb   :  { %4542 = vmatpush1.bf16.msra.mxu0 %v8761_v3 }
 0x2ec   :  { %4544 = vmatprep.subr.bf16.mxu0 %v8762_v8 }
 0x2ed   :  { %4792 = vmatpush1.bf16.msra.mxu1 %v8763_v46 }
 0x2ee   :  { %4794 = vmatprep.subr.bf16.mxu1 %v8764_v20 }
 0x2ef   :  { %4546 = vmatpush1.bf16.msra.mxu0 %v8765_v61 }
 0x2f0   :  { %4548 = vmatprep.subr.bf16.mxu0 %v8766_v9 }
 0x2f1   :  { %4796 = vmatpush1.bf16.msra.mxu1 %v8767_v7 }
 0x2f2   :  { %4798 = vmatprep.subr.bf16.mxu1 %v8768_v59 }
 0x2f3   :  { %4550 = vmatpush1.bf16.msra.mxu0 %v8769_v55 }
 0x2f4   :  { %4552 = vmatprep.subr.bf16.mxu0 %v8770_v40  ;;  %v8786_v40 = vld [vmem:[#allocation82_spill] sm:$0xff] }
 0x2f5   :  { %4800 = vmatpush1.bf16.msra.mxu1 %v8771_v11  ;;  %v8784_v11 = vand.u32 4294901760, %v8673_v35  ;;  %v8793_v35 = vld [vmem:[#allocation91_spill] sm:$0xff] }
 0x2f6   :  { %4802 = vmatprep.subr.bf16.mxu1 %v8772_v39  ;;  %v8781_v39 = vld [vmem:[#allocation35_spill] sm:$0xff] }
 0x2f7   :  { %4554 = vmatpush1.bf16.msra.mxu0 %v8773_v17 }
 0x2f8   :  { %4556 = vmatprep.subr.bf16.mxu0 %v8774_v53  ;;  %v8782_v53 = vand.u32 4294901760, %v6801_v48  ;;  %v8790_v48 = vld [vmem:[#allocation36_spill] sm:$0xff] }
 0x2f9   :  { %4804 = vmatpush1.bf16.msra.mxu1 %v8775_v22  ;;  %v8783_v22 = vand.u32 4294901760, %v8608_v10  ;;  %v8791_v10 = vld [vmem:[#allocation37_spill] sm:$0xff] }
 0x2fa   :  { %4807 = vmatprep.subr.msk.bf16.mxu1 %vm7199_vm4, %v8776_v57  ;;  %v8785_v57 = vand.u32 4294901760, %v8609_v62  ;;  %v8792_v62 = vld [vmem:[#allocation40_spill] sm:$0xff] }
 0x2fb   :  { %4558 = vmatpush1.bf16.msra.mxu0 %v8778_v12  ;;  %v4565_v17 = vpack.c.bf16 %v8783_v22, %v8782_v53  ;;  %v8796_v53 = vld [vmem:[#allocation39_spill] sm:$0xff]  ;;  %v8797_v22 = vld [vmem:[#allocation90_spill] sm:$0xff] }
 0x2fc   :  { %4561 = vmatprep.subr.msk.bf16.mxu0 %vm7199_vm4, %v8779_v24  ;;  %v4813_v12 = vpack.c.bf16 %v8785_v57, %v8784_v11  ;;  %v8787_v24 = vld [vmem:[#allocation105_spill] sm:$0xff]  ;;  %v8798_v57 = vld [vmem:[#allocation94_spill] sm:$0xff] }
 0x2fd   :  { %4810 = vmatpush1.bf16.msk.msra.mxu1 %vm7199_vm4, %v8780_v5  ;;  %v8788_v5 = vld [vmem:[#allocation38_spill] sm:$0xff]  ;;  %v8794_v11 = vld [vmem:[#allocation109_spill] sm:$0xff] }
 0x2fe   :  { %4812 = vmatprep.subr.bf16.mxu1 %v8781_v39  ;;  %v8789_v39 = vld [vmem:[#allocation108_spill] sm:$0xff] }
 0x2ff   :  { %4564 = vmatpush1.bf16.msk.msra.mxu0 %vm7199_vm4, %v8786_v40 }
 0x300   :  { %3901 = vmatmul.mubr.f32.vlgmr.msra.gmra.mrb[2].mxu1 %v8787_v24  ;;  %4566 = vmatprep.subr.bf16.mxu0 %v4565_v17  ;;  %v8795_v17 = vld [vmem:[#allocation111_spill] sm:$0xff] }
 0x301   :  { %4814 = vmatpush1.bf16.msra.mxu1 %v4813_v12  ;;  %3909 = vmatprep.mubr.f32.mxu1 %v8789_v39  ;;  %v8799_v12 = vld [vmem:[#allocation97_spill] sm:$0xff] }
 0x302   :  { %4816 = vmatprep.subr.bf16.mxu1 %v8788_v5  ;;  %2805 = vmatmul.mubr.f32.vlgmr.msra.gmra.mrb[2].mxu0 %v8787_v24  ;;  %v8800_v24 = vld [vmem:[#allocation110_spill] sm:$0xff] }
 0x303   :  { %4568 = vmatpush1.bf16.msra.mxu0 %v8790_v48  ;;  %2813 = vmatprep.mubr.f32.mxu0 %v8789_v39  ;;  %v8801_v5 = vld [vmem:[#allocation46_spill] sm:$0xff]  ;;  %v8802_v39 = vld [vmem:[#allocation92_spill] sm:$0xff]  ;;  %v8803_v48 = vand.u32 4294901760, %v8710_v51 }
 0x304   :  { %4570 = vmatprep.subr.bf16.mxu0 %v8791_v10  ;;  %3913 = vmatmul.mubr.f32.gmra.mrb[4].mxu1 %v8794_v11  ;;  %v8804_v10 = vand.u32 4294901760, %v8711_v31  ;;  %v8812_v31 = vand.u32 4294901760, %v8725_v33  ;;  %v8819_v33 = vld [vmem:[#allocation33_spill] sm:$0xff] }
 0x305   :  { %4818 = vmatpush1.bf16.msra.mxu1 %v8792_v62  ;;  %3921 = vmatprep.mubr.f32.mxu1 %v8795_v17 }
 0x306   :  { %4820 = vmatprep.subr.bf16.mxu1 %v8793_v35  ;;  %2817 = vmatmul.mubr.f32.gmra.mrb[4].mxu0 %v8794_v11  ;;  %v4827_v62 = vpack.c.bf16 %v8804_v10, %v8803_v48  ;;  %v8805_v35 = vld [vmem:[#allocation95_spill] sm:$0xff]  ;;  %v8806_v11 = vld [vmem:[#allocation100_spill] sm:$0xff]  ;;  %v8818_v10 = vld [vmem:[#allocation26_spill] sm:$0xff] }
 0x307   :  { %4572 = vmatpush1.bf16.msra.mxu0 %v8796_v53  ;;  %2825 = vmatprep.mubr.f32.mxu0 %v8795_v17  ;;  %v8807_v17 = vand.u32 4294901760, %v8718_v47  ;;  %v8808_v53 = vand.u32 4294901760, %v8719_v30  ;;  %v8814_v47 = vld [vmem:[#allocation6_spill] sm:$0xff]  ;;  %v8815_v30 = vld [vmem:[#allocation136_spill] sm:$0xff] }
 0x308   :  { %4574 = vmatprep.subr.bf16.mxu0 %v8797_v22  ;;  %3925 = vmatmul.mubr.f32.gmra.mrb[6].mxu1 %v8800_v24 }
 0x309   :  { %4822 = vmatpush1.bf16.msra.mxu1 %v8798_v57  ;;  %4116 = vmatprep.mubr.f32.mxu1 %v8801_v5  ;;  %v4581_v22 = vpack.c.bf16 %v8808_v53, %v8807_v17  ;;  %v8809_v57 = vand.u32 4294901760, %v8720_v27  ;;  %v8816_v27 = vld [vmem:[#allocation137_spill] sm:$0xff]  ;;  %v8826_v17 = vld [vmem:[#allocation118_spill] sm:$0xff]  ;;  %v8827_v53 = vand.u32 4294901760, %v8733_v45  ;;  %v8832_v45 = vld [vmem:[#allocation152_spill] sm:$0xff] }
 0x30a   :  { %4824 = vmatprep.subr.bf16.mxu1 %v8799_v12  ;;  %2829 = vmatmul.mubr.f32.gmra.mrb[6].mxu0 %v8800_v24  ;;  %v8810_v12 = vand.u32 4294901760, %v8721_v38  ;;  %v8811_v24 = vld [vmem:[#allocation99_spill] sm:$0xff]  ;;  %v8817_v38 = vld [vmem:[#allocation117_spill] sm:$0xff] }
 0x30b   :  { %4576 = vmatpush1.bf16.msra.mxu0 %v8802_v39  ;;  %3020 = vmatprep.mubr.f32.mxu0 %v8801_v5  ;;  %v8813_v39 = vand.u32 4294901760, %v8726_v42  ;;  %v8820_v42 = vld [vmem:[#allocation141_spill] sm:$0xff] }
 0x30c   :  { %4578 = vmatprep.subr.bf16.mxu0 %v8805_v35  ;;  %v4829_v51 = vpack.c.bf16 %v8810_v12, %v8809_v57  ;;  %v8828_v57 = vand.u32 4294901760, %v8734_v58  ;;  %v8829_v12 = vld [vmem:[#allocation60_spill] sm:$0xff]  ;;  %v8833_v58 = vld [vmem:[#allocation150_spill] sm:$0xff] }
 0x30d   :  { %4826 = vmatpush1.bf16.msra.mxu1 %v8806_v11  ;;  %v4583_v48 = vpack.c.bf16 %v8813_v39, %v8812_v31  ;;  %v8825_v11 = vld [vmem:[#allocation34_spill] sm:$0xff] }
 0x30e   :  { %4828 = vmatprep.subr.bf16.mxu1 %v4827_v62  ;;  %v8824_v62 = vld [vmem:[#allocation10_spill] sm:$0xff] }
 0x30f   :  { %4580 = vmatpush1.bf16.msra.mxu0 %v8811_v24 }
 0x310   :  { %4582 = vmatprep.subr.bf16.mxu0 %v4581_v22  ;;  %v4601_v22 = vpack.c.bf16 %v8824_v62, %v8827_v53 }
 0x311   :  { %4830 = vmatpush1.bf16.msra.mxu1 %v4829_v51 }
 0x312   :  { %4832 = vmatprep.subr.bf16.mxu1 %v7517_v29  ;;  %v8821_v29 = vld [vmem:[#allocation124_spill] sm:$0xff] }
 0x313   :  { %4584 = vmatpush1.bf16.msra.mxu0 %v4583_v48 }
 0x314   :  { %4586 = vmatprep.subr.bf16.mxu0 %v7511_v37  ;;  %v8822_v37 = vld [vmem:[#allocation31_spill] sm:$0xff] }
 0x315   :  { %4834 = vmatpush1.bf16.msra.mxu1 %v7529_v16  ;;  %v8823_v16 = vand.u32 4294901760, %v8731_v28  ;;  %v8830_v28 = vand.u32 4294901760, %v8662_v50  ;;  %v8831_v50 = vld [vmem:[#allocation101_spill] sm:$0xff] }
 0x316   :  { %4836 = vmatprep.subr.bf16.mxu1 %v8814_v47 }
 0x317   :  { %4588 = vmatpush1.bf16.msra.mxu0 %v8815_v30  ;;  %v4847_v35 = vpack.c.bf16 %v8824_v62, %v8823_v16  ;;  %v4603_v51 = vpack.c.bf16 %v8824_v62, %v8830_v28 }
 0x318   :  { %4590 = vmatprep.subr.bf16.mxu0 %v8816_v27 }
 0x319   :  { %4838 = vmatpush1.bf16.msra.mxu1 %v8817_v38 }
 0x31a   :  { %4840 = vmatprep.subr.bf16.mxu1 %v8818_v10 }
 0x31b   :  { %4592 = vmatpush1.bf16.msra.mxu0 %v8819_v33 }
 0x31c   :  { %4594 = vmatprep.subr.bf16.mxu0 %v8820_v42 }
 0x31d   :  { %4842 = vmatpush1.bf16.msra.mxu1 %v7578_v21  ;;  %v4849_v21 = vpack.c.bf16 %v8824_v62, %v8828_v57 }
 0x31e   :  { %4844 = vmatprep.subr.bf16.mxu1 %v8821_v29 }
 0x31f   :  { %4596 = vmatpush1.bf16.msra.mxu0 %v8822_v37 }
 0x320   :  { %4598 = vmatprep.subr.bf16.mxu0 %v8825_v11 }
 0x321   :  { %4846 = vmatpush1.bf16.msra.mxu1 %v8826_v17 }
 0x322   :  { %4848 = vmatprep.subr.bf16.mxu1 %v4847_v35 }
 0x323   :  { %4600 = vmatpush1.bf16.msra.mxu0 %v8829_v12 }
 0x324   :  { %4602 = vmatprep.subr.bf16.mxu0 %v4601_v22 }
 0x325   :  { %4850 = vmatpush1.bf16.msra.mxu1 %v4849_v21 }
 0x326   :  { %4852 = vmatprep.subr.bf16.mxu1 %v8735_v1  ;;  %v8834_v1 = vld [vmem:[#allocation154_spill] sm:$0xff] }
 0x327   :  { %4604 = vmatpush1.bf16.msra.mxu0 %v4603_v51 }
 0x328   :  { %4118 = vmatmul.mubr.f32.vlgmr.msra.gmra.mrb[2].mxu1 %v8671_v32  ;;  %4606 = vmatprep.subr.bf16.mxu0 %v8737_v0  ;;  %v8835_v0 = vld [vmem:[#allocation148_spill] sm:$0xff] }
 0x329   :  { %4854 = vmatpush1.bf16.msra.mxu1 %v8738_v44  ;;  %4124 = vmatprep.mubr.f32.mxu1 %v8678_v19  ;;  %v8836_v44 = vld [vmem:[#allocation155_spill] sm:$0xff] }
 0x32a   :  { %4856 = vmatprep.subr.bf16.mxu1 %v8739_v6  ;;  %3022 = vmatmul.mubr.f32.vlgmr.msra.gmra.mrb[2].mxu0 %v8671_v32  ;;  %v8837_v6 = vld [vmem:[#allocation156_spill] sm:$0xff] }
 0x32b   :  { %4608 = vmatpush1.bf16.msra.mxu0 %v8741_v41  ;;  %3028 = vmatprep.mubr.f32.mxu0 %v8678_v19  ;;  %v8838_v41 = vld [vmem:[#allocation42_spill] sm:$0xff] }
 0x32c   :  { %4610 = vmatprep.subr.bf16.mxu0 %v8742_v49  ;;  %4126 = vmatmul.mubr.f32.gmra.mrb[4].mxu1 %v8691_v54  ;;  %v8839_v49 = vld [vmem:[#allocation158_spill] sm:$0xff] }
 0x32d   :  { %4858 = vmatpush1.bf16.msra.mxu1 %v8743_v26  ;;  %4132 = vmatprep.mubr.f32.mxu1 %v8692_v23  ;;  %v8840_v26 = vld [vmem:[#allocation41_spill] sm:$0xff] }
 0x32e   :  { %4860 = vmatprep.subr.bf16.mxu1 %v8744_v43  ;;  %3030 = vmatmul.mubr.f32.gmra.mrb[4].mxu0 %v8691_v54  ;;  %v8841_v43 = vld [vmem:[#allocation83_spill] sm:$0xff] }
 0x32f   :  { %4612 = vmatpush1.bf16.msra.mxu0 %v8747_v4  ;;  %3036 = vmatprep.mubr.f32.mxu0 %v8692_v23 }
 0x330   :  { %4614 = vmatprep.subr.bf16.mxu0 %v8748_v34  ;;  %4134 = vmatmul.mubr.f32.gmra.mrb[6].mxu1 %v8831_v50  ;;  %v2027_v34 = vld [vmem:[%s8018_s0 + $0x10] sm:$0xff] }
 0x331   :  { %4862 = vmatpush1.bf16.msra.mxu1 %v8749_v52  ;;  %4245 = vmatprep.mubr.f32.mxu1 %v8801_v5 }
 0x332   :  { %4864 = vmatprep.subr.bf16.mxu1 %v8750_v60  ;;  %3038 = vmatmul.mubr.f32.gmra.mrb[6].mxu0 %v8831_v50  ;;  %v2026_v60 = vld [vmem:[%s8018_s0 + $0x8] sm:$0xff] }
 0x333   :  { %4616 = vmatpush1.bf16.msra.mxu0 %v8753_v15  ;;  %3149 = vmatprep.mubr.f32.mxu0 %v8801_v5  ;;  %v2031_v15 = vld [vmem:[%s8018_s0 + $0x30] sm:$0xff]  ;;  %v2036_v5 = vld [vmem:[%s8018_s0 + $0x58] sm:$0xf] }
 0x334   :  { %4618 = vmatprep.subr.bf16.mxu0 %v8754_v13  ;;  %v2029_v13 = vld [vmem:[%s8018_s0 + $0x20] sm:$0xff] }
 0x335   :  { %4866 = vmatpush1.bf16.msra.mxu1 %v8755_v18  ;;  %v2032_v18 = vld [vmem:[%s8018_s0 + $0x38] sm:$0xff] }
 0x336   :  { %4868 = vmatprep.subr.bf16.mxu1 %v8756_v2  ;;  %v2030_v2 = vld [vmem:[%s8018_s0 + $0x28] sm:$0xff] }
 0x337   :  { %4620 = vmatpush1.bf16.msra.mxu0 %v8757_v63 }
 0x338   :  { %4622 = vmatprep.subr.bf16.mxu0 %v8758_v14 }
 0x339   :  { %4870 = vmatpush1.bf16.msra.mxu1 %v8759_v25 }
 0x33a   :  { %4872 = vmatprep.subr.bf16.mxu1 %v8760_v56  ;;  %v2033_v56 = vld [vmem:[%s8018_s0 + $0x40] sm:$0xf] }
 0x33b   :  { %4624 = vmatpush1.bf16.msra.mxu0 %v8761_v3  ;;  %v2035_v3 = vld [vmem:[%s8018_s0 + $0x50] sm:$0xf] }
 0x33c   :  { %4626 = vmatprep.subr.bf16.mxu0 %v8762_v8 }
 0x33d   :  { %4874 = vmatpush1.bf16.msra.mxu1 %v8763_v46 }
 0x33e   :  { %4876 = vmatprep.subr.bf16.mxu1 %v8764_v20 }
 0x33f   :  { %4628 = vmatpush1.bf16.msra.mxu0 %v8765_v61 }
 0x340   :  { %4630 = vmatprep.subr.bf16.mxu0 %v8766_v9  ;;  %v2034_v9 = vld [vmem:[%s8018_s0 + $0x48] sm:$0xf] }
 0x341   :  { %4878 = vmatpush1.bf16.msra.mxu1 %v8767_v7 }
 0x342   :  { %4880 = vmatprep.subr.bf16.mxu1 %v8768_v59 }
 0x343   :  { %4632 = vmatpush1.bf16.msra.mxu0 %v8769_v55 }
 0x344   :  { %4634 = vmatprep.subr.bf16.mxu0 %v8832_v45 }
 0x345   :  { %4882 = vmatpush1.bf16.msra.mxu1 %v8833_v58 }
 0x346   :  { %4884 = vmatprep.subr.bf16.mxu1 %v8834_v1 }
 0x347   :  { %4636 = vmatpush1.bf16.msra.mxu0 %v8835_v0 }
 0x348   :  { %4638 = vmatprep.subr.bf16.mxu0 %v8836_v44  ;;  %v2048_v4 = vpop.permute.xlu1 %2047 }
 0x349   :  { %4886 = vmatpush1.bf16.msra.mxu1 %v8837_v6  ;;  %v2061_v61 = vmul.f32 %v2048_v4, %v2031_v15  ;;  %v2059_v55 = vmul.f32 %v2048_v4, %v2029_v13  ;;  %v2060_v36 = vmul.f32 %v2048_v4, %v2030_v2 }
 0x34a   :  { %4889 = vmatprep.subr.msk.bf16.mxu1 %vm7199_vm4, %v8838_v41 }
 0x34b   :  { %4640 = vmatpush1.bf16.msra.mxu0 %v8839_v49 }
 0x34c   :  { %4643 = vmatprep.subr.msk.bf16.mxu0 %vm7199_vm4, %v8840_v26  ;;  %v2053_v25 = vpop.permute.xlu1 %2052 }
 0x34d   :  { %4892 = vmatpush1.bf16.msk.msra.mxu1 %vm7199_vm4, %v8841_v43  ;;  %v2063_v39 = vmul.f32 %v2053_v25, %v2033_v56  ;;  %v2065_v48 = vmul.f32 %v2053_v25, %v2035_v3  ;;  %v2064_v10 = vmul.f32 %v2053_v25, %v2034_v9  ;;  %v2066_v16 = vmul.f32 %v2053_v25, %v2036_v5 }
 0x34f   :  { %4646 = vmatpush1.bf16.msk.msra.mxu0 %vm7199_vm4, %v8786_v40  ;;  %v2062_v40 = vmul.f32 %v2048_v4, %v2032_v18 }
 0x350   :  { %4247 = vmatmul.mubr.f32.vlgmr.msra.gmra.mrb[2].mxu1 %v8671_v32 }
 0x351   :  { %4253 = vmatprep.mubr.f32.mxu1 %v8678_v19 }
 0x352   :  { %3151 = vmatmul.mubr.f32.vlgmr.msra.gmra.mrb[2].mxu0 %v8671_v32  ;;  %v2028_v32 = vld [vmem:[%s8018_s0 + $0x18] sm:$0xff]  ;;  %v4292_v11 = vpop.permute.xlu1 %4291 }
 0x353   :  { %3157 = vmatprep.mubr.f32.mxu0 %v8678_v19  ;;  %v2043_v19 = vpop.permute.xlu0 %2042 }
 0x354   :  { %4255 = vmatmul.mubr.f32.gmra.mrb[4].mxu1 %v8691_v54  ;;  %v2057_v52 = vmul.f32 %v2043_v19, %v2027_v34  ;;  %v2056_v20 = vmul.f32 %v2043_v19, %v2026_v60 }
 0x355   :  { %4261 = vmatprep.mubr.f32.mxu1 %v8692_v23 }
 0x356   :  { %3159 = vmatmul.mubr.f32.gmra.mrb[4].mxu0 %v8691_v54  ;;  %v2025_v54 = vld [vmem:[%s8018_s0] sm:$0xff] }
 0x357   :  { %3165 = vmatprep.mubr.f32.mxu0 %v8692_v23  ;;  %v2058_v23 = vmul.f32 %v2043_v19, %v2028_v32  ;;  %v2055_v63 = vmul.f32 %v2043_v19, %v2025_v54  ;;  %v4287_v59 = vpop.permute.xlu0 %4286 }
 0x358   :  { %4263 = vmatmul.mubr.f32.gmra.mrb[6].mxu1 %v8831_v50 }
 0x35a   :  { %3167 = vmatmul.mubr.f32.gmra.mrb[6].mxu0 %v8831_v50 }
 0x35b   :  { %v4297_v49 = vpop.permute.xlu0 %4296 }
 0x423   :  { %v4248_v14 = vpop.f32.mrb[2].mxu1 }
 0x424   :  { %v4899_v8 = vadd.f32 %v4248_v14, %v2057_v52  ;;  %v4250_v46 = vpop.f32.mrb[3].mxu1 }
 0x425   :  { %v4900_v7 = vadd.f32 %v4250_v46, %v2058_v23  ;;  %v3152_v24 = vpop.f32.mrb[2].mxu0 }
 0x426   :  { %vm4271_vm10 = vcmp.ge.f32.partialorder %v4899_v8, 0.0  ;;  %v4301_v31 = vmul.f32 %v4899_v8, %v4287_v59  ;;  %v4893_v47 = vadd.f32 %v3152_v24, %v2055_v63  ;;  %v3154_v27 = vpop.f32.mrb[3].mxu0 }
 0x427   :  { %vm4272_vm5 = vcmp.ge.f32.partialorder %v4900_v7, 0.0  ;;  %v4302_v30 = vmul.f32 %v4900_v7, %v4287_v59  ;;  %v4256_v38 = vpop.f32.mrb[4].mxu1  ;;  %v4894_v42 = vadd.f32 %v3154_v27, %v2056_v20 }
 0x428   :  { %v4313_v33 = vsel %vm4271_vm10, %v4899_v8, %v4301_v31  ;;  %v4901_v29 = vadd.f32 %v4256_v38, %v2061_v61  ;;  %v4258_v37 = vpop.f32.mrb[5].mxu1  ;;  %vm4269_vm8 = vcmp.ge.f32.partialorder %v4893_v47, 0.0  ;;  %v4299_v62 = vmul.f32 %v4893_v47, %v4287_v59 }
 0x429   :  { %v4314_v35 = vsel %vm4272_vm5, %v4900_v7, %v4302_v30  ;;  %4325 = vst [vmem:[%s8024_s6 + $0x10] sm:$0xff] %v4313_v33  ;;  %v4902_v17 = vadd.f32 %v4258_v37, %v2062_v40  ;;  %vm4270_vm9 = vcmp.ge.f32.partialorder %v4894_v42, 0.0  ;;  %v4300_v53 = vmul.f32 %v4894_v42, %v4287_v59  ;;  %v3160_v22 = vpop.f32.mrb[4].mxu0 }
 0x42a   :  { %4326 = vst [vmem:[%s8024_s6 + $0x18] sm:$0xff] %v4314_v35  ;;  %vm4275_vm12 = vcmp.ge.f32.partialorder %v4901_v29, 0.0  ;;  %v4305_v57 = vmul.f32 %v4901_v29, %v4292_v11  ;;  %v4311_v21 = vsel %vm4269_vm8, %v4893_v47, %v4299_v62  ;;  %v4895_v12 = vadd.f32 %v3160_v22, %v2059_v55  ;;  %v3162_v51 = vpop.f32.mrb[5].mxu0 }
 0x42b   :  { %vm4276_vm7 = vcmp.ge.f32.partialorder %v4902_v17, 0.0  ;;  %v4306_v28 = vmul.f32 %v4902_v17, %v4292_v11  ;;  %v4264_v50 = vpop.f32.mrb[6].mxu1  ;;  %4323 = vst [vmem:[%s8024_s6] sm:$0xff] %v4311_v21  ;;  %v4312_v45 = vsel %vm4270_vm9, %v4894_v42, %v4300_v53  ;;  %v4896_v1 = vadd.f32 %v3162_v51, %v2060_v36 }
 0x42c   :  { %v4317_v58 = vsel %vm4275_vm12, %v4901_v29, %v4305_v57  ;;  %v4903_v0 = vadd.f32 %v4264_v50, %v2065_v48  ;;  %v4266_v44 = vpop.f32.mrb[7].mxu1  ;;  %4324 = vst [vmem:[%s8024_s6 + $0x8] sm:$0xff] %v4312_v45  ;;  %vm4273_vm13 = vcmp.ge.f32.partialorder %v4895_v12, 0.0  ;;  %v4303_v6 = vmul.f32 %v4895_v12, %v4292_v11 }
 0x42d   :  { %4329 = vst [vmem:[%s8024_s6 + $0x30] sm:$0xff] %v4317_v58  ;;  %v4318_v41 = vsel %vm4276_vm7, %v4902_v17, %v4306_v28  ;;  %v4904_v26 = vadd.f32 %v4266_v44, %v2066_v16  ;;  %vm4274_vm11 = vcmp.ge.f32.partialorder %v4896_v1, 0.0  ;;  %v4304_v43 = vmul.f32 %v4896_v1, %v4292_v11  ;;  %v3168_v4 = vpop.f32.mrb[6].mxu0 }
 0x42e   :  { %4330 = vst [vmem:[%s8024_s6 + $0x38] sm:$0xff] %v4318_v41  ;;  %vm4279_vm14 = vcmp.ge.f32.partialorder %v4903_v0, 0.0  ;;  %v4309_v34 = vmul.f32 %v4903_v0, %v4297_v49  ;;  %v4315_v32 = vsel %vm4273_vm13, %v4895_v12, %v4303_v6  ;;  %v4897_v19 = vadd.f32 %v3168_v4, %v2063_v39  ;;  %v3170_v54 = vpop.f32.mrb[7].mxu0 }
 0x42f   :  { %vm4280_vm1 = vcmp.ge.f32.partialorder %v4904_v26, 0.0  ;;  %v4310_v52 = vmul.f32 %v4904_v26, %v4297_v49  ;;  %4327 = vst [vmem:[%s8024_s6 + $0x20] sm:$0xff] %v4315_v32  ;;  %v4316_v23 = vsel %vm4274_vm11, %v4896_v1, %v4304_v43  ;;  %v4898_v15 = vadd.f32 %v3170_v54, %v2064_v10 }
 0x430   :  { %v4321_v60 = vsel %vm4279_vm14, %v4903_v0, %v4309_v34  ;;  %4328 = vst [vmem:[%s8024_s6 + $0x28] sm:$0xff] %v4316_v23  ;;  %vm4277_vm15 = vcmp.ge.f32.partialorder %v4897_v19, 0.0  ;;  %v4307_v13 = vmul.f32 %v4897_v19, %v4297_v49 }
 0x431   :  { %4333 = vst [vmem:[%s8024_s6 + $0x50] sm:$0xf] %v4321_v60  ;;  %v4322_v18 = vsel %vm4280_vm1, %v4904_v26, %v4310_v52  ;;  %vm4278_vm3 = vcmp.ge.f32.partialorder %v4898_v15, 0.0  ;;  %v4308_v2 = vmul.f32 %v4898_v15, %v4297_v49 }
 0x432   :  { %4334 = vst [vmem:[%s8024_s6 + $0x58] sm:$0xf] %v4322_v18  ;;  %v4319_v63 = vsel %vm4277_vm15, %v4897_v19, %v4307_v13 }
 0x433   :  { %4331 = vst [vmem:[%s8024_s6 + $0x40] sm:$0xf] %v4319_v63  ;;  %v4320_v14 = vsel %vm4278_vm3, %v4898_v15, %v4308_v2 }
 0x434   :  { %4332 = vst [vmem:[%s8024_s6 + $0x48] sm:$0xf] %v4320_v14 }
 0x435   :  { %4339 = vsyncpa [#allocation4], 1 }

</bundles_post_ra>
